<compile_context>
chip_gen: v5e
topology: v5e:2x2
jax: 0.10.0
libtpu: 0.0.40
codegen_flags: <defaults>
</compile_context>

<pallas_src>
import functools

import jax
import jax.numpy as jnp
from jax.experimental import pallas as pl
from jax.experimental.pallas import tpu as pltpu

FEATURESLEN = 10
POLYBERT_DIM = 600    # polyBERT hidden size -> concat gives 1200
D_LANES = 640         # 600 padded to the 128-lane tile (for VMEM budgeting)
FEAT_PAD = 128        # featureslen zero-padded to a full lane tile
OUT_PAD = 128         # head output padded to a full lane tile (col 0 is real)


def _round_up(x, m):
    return ((x + m - 1) // m) * m


def _auto_tiles(itemsize, vmem_cap):
    """Largest (batch_tile, seq_tile) whose double-buffered embedding windows
    (2 tensors x 2 buffers x TB x TS x 640 lanes x itemsize) fit in VMEM with
    ~20 MiB headroom for weights, masks, scratch and Mosaic internals."""
    budget = max(vmem_cap - 20 * 2**20, 8 * 2**20)
    for tb, ts in ((64, 256), (64, 128), (32, 128), (16, 128), (8, 128)):
        if 4 * tb * ts * D_LANES * itemsize <= budget:
            return tb, ts
    return 8, 128


def _ipec_kernel(emb_a_ref, mask_a_ref, emb_b_ref, mask_b_ref,
                 feat_ref, cnt_ref,
                 w1a_ref, w1b_ref, b1_ref,        # chem Linear(1200,600), split
                 w2_ref, b2_ref,                  # chem Linear(600,128)
                 wf_ref, bf_ref,                  # feature Linear(128pad,128)
                 w3c_ref, w3f_ref, b3_ref,        # head Linear(256,64), split
                 w4_ref, b4_ref,                  # head Linear(64,128pad)
                 out_ref,
                 acc_a, acc_b,
                 *, seq_valid, seq_tile):
    s = pl.program_id(1)
    f32 = jnp.float32
    bf16 = jnp.bfloat16

    @pl.when(s == 0)
    def _init():
        acc_a[...] = jnp.zeros_like(acc_a)
        acc_b[...] = jnp.zeros_like(acc_b)

    # In-kernel downcast (no-op when embeddings already arrive bf16): the
    # HBM->VMEM stream stays in the input dtype, so there is no wrapper-side
    # cast/pad pass over the dominant [B,S,600] traffic.
    ea = emb_a_ref[...].astype(bf16)
    eb = emb_b_ref[...].astype(bf16)

    if seq_valid is not None:
        # Seq grid does not divide S: the last block reads past the end of the
        # (unpadded) embeddings.  Zero those rows with a select so undefined
        # VMEM contents (possibly NaN/Inf) cannot poison the masked sum.
        pos = s * seq_tile + jax.lax.broadcasted_iota(
            jnp.int32, (1, ea.shape[1], 1), 1)
        ok = pos < seq_valid
        ea = jnp.where(ok, ea, jnp.zeros_like(ea))
        eb = jnp.where(ok, eb, jnp.zeros_like(eb))

    # Masked token-sum on the MXU with f32 accumulation (no large f32
    # elementwise temporaries); masks are zero-padded so tail rows add 0.
    ma = mask_a_ref[...]          # [TB, 1, TS] bf16 (0/1 attention mask)
    mb = mask_b_ref[...]
    acc_a[...] += jnp.einsum("bts,bsd->btd", ma, ea, preferred_element_type=f32)
    acc_b[...] += jnp.einsum("bts,bsd->btd", mb, eb, preferred_element_type=f32)

    @pl.when(s == pl.num_programs(1) - 1)
    def _finalize():
        def dot(a, b):
            return jnp.dot(a, b, preferred_element_type=f32)

        # Masked mean pooling; denominators (already clamp(1e-9)-ed) were
        # computed once in the wrapper from the tiny [B,S] masks.
        cnts = cnt_ref[...]                        # [TB, 2] f32
        o1 = (acc_a[...][:, 0, :] / cnts[:, 0:1]).astype(bf16)
        o2 = (acc_b[...][:, 0, :] / cnts[:, 1:2]).astype(bf16)

        # layers_stack_chem: Linear(1200,600)+ReLU+Linear(600,128)+ReLU
        # (concat folded into split weights; dropout = identity in eval).
        h = jnp.maximum(dot(o1, w1a_ref[...]) + dot(o2, w1b_ref[...])
                        + b1_ref[...], 0.0)
        chem = jnp.maximum(dot(h.astype(bf16), w2_ref[...]) + b2_ref[...], 0.0)

        # feature_net: Linear(featureslen,128)+ReLU (featureslen zero-padded).
        fich = jnp.maximum(dot(feat_ref[...], wf_ref[...]) + bf_ref[...], 0.0)

        # layers_stack_all: Linear(256,64)+ReLU+Linear(64,1) (concat folded;
        # output padded to 128 lanes so the store is lane-dense).
        g = jnp.maximum(dot(chem.astype(bf16), w3c_ref[...])
                        + dot(fich.astype(bf16), w3f_ref[...]) + b3_ref[...],
                        0.0)
        out_ref[...] = dot(g.astype(bf16), w4_ref[...]) + b4_ref[...]


def ipec_forward(emb_a, mask_a, emb_b, mask_b, feats, params,
                 *, batch_tile=None, seq_tile=None):
    """Everything downstream of polyBERT.

    emb_a, emb_b : [B, S, 600] token embeddings (bf16 preferred; f32 accepted
                   and downcast inside the kernel -- never in the wrapper)
    mask_a, mask_b : [B, S] 0/1 attention masks
    feats : [B, featureslen]
    """
    B, S, D = emb_a.shape
    assert emb_b.shape == (B, S, D) and D == POLYBERT_DIM
    bf16, f32 = jnp.bfloat16, jnp.float32

    # --- chip-aware tile selection (VMEM capacity + embedding dtype) --------
    try:
        vmem_cap = int(getattr(pltpu.get_tpu_info(), "vmem_capacity_bytes",
                               64 * 2**20))
    except Exception:
        vmem_cap = 64 * 2**20                      # conservative (v7x-sized)
    itemsize = max(jnp.dtype(emb_a.dtype).itemsize,
                   jnp.dtype(emb_b.dtype).itemsize)
    auto_tb, auto_ts = _auto_tiles(itemsize, vmem_cap)
    batch_tile = auto_tb if batch_tile is None else batch_tile
    seq_tile = auto_ts if seq_tile is None else seq_tile
    assert batch_tile % 8 == 0 and seq_tile % 128 == 0

    if B > batch_tile:
        TB = batch_tile
    elif B >= 16:
        # >= 2 blocks on the "parallel" batch axis so both v7x TensorCores get
        # work (harmless on single-core chips).  TB stays a multiple of 8 for
        # the 2-D feats/cnt/output blocks.
        TB = min(batch_tile, _round_up((B + 1) // 2, 8))
    else:
        TB = B
    num_b = -(-B // TB)
    Bp = num_b * TB

    TS = seq_tile if S > seq_tile else S
    num_s = -(-S // TS)
    Sp = num_s * TS
    seq_valid = S if Sp != S else None             # guard only if non-divisible

    # --- tiny side inputs (masks / features / pooling denominators) ---------
    # These are the only arrays the wrapper touches; the [B,S,600] embeddings
    # go straight into the kernel with no cast/pad pre-pass.
    def prep_mask(m):
        m3 = jnp.zeros((Bp, 1, Sp), bf16)
        return m3.at[:B, 0, :S].set(m.astype(bf16))

    mask_a_p = prep_mask(mask_a)
    mask_b_p = prep_mask(mask_b)

    flen = feats.shape[1]
    assert flen <= FEAT_PAD
    feats_p = jnp.zeros((Bp, FEAT_PAD), bf16).at[:B, :flen].set(
        feats.astype(bf16))

    cnt_a = jnp.maximum(jnp.sum(mask_a.astype(f32), axis=1), 1e-9)
    cnt_b = jnp.maximum(jnp.sum(mask_b.astype(f32), axis=1), 1e-9)
    cnts = jnp.ones((Bp, 2), f32)
    cnts = cnts.at[:B, 0].set(cnt_a).at[:B, 1].set(cnt_b)

    grid = (num_b, num_s)

    emb_spec = pl.BlockSpec((TB, TS, D), lambda b, s: (b, s, 0))
    mask_spec = pl.BlockSpec((TB, 1, TS), lambda b, s: (b, 0, s))
    feat_spec = pl.BlockSpec((TB, FEAT_PAD), lambda b, s: (b, 0))
    cnt_spec = pl.BlockSpec((TB, 2), lambda b, s: (b, 0))

    def const_spec(arr):                           # VMEM-resident weights
        return pl.BlockSpec(arr.shape, lambda b, s: (0, 0))

    weight_names = ("w1a", "w1b", "b1", "w2", "b2", "wf", "bf",
                    "w3c", "w3f", "b3", "w4", "b4")
    weights = [params[n] for n in weight_names]

    vmem_limit = int(min(max(vmem_cap - 4 * 2**20, 32 * 2**20), 100 * 2**20))

    kernel = functools.partial(_ipec_kernel, seq_valid=seq_valid, seq_tile=TS)

    out = pl.pallas_call(
        kernel,
        out_shape=jax.ShapeDtypeStruct((Bp, OUT_PAD), jnp.float32),
        grid_spec=pltpu.PrefetchScalarGridSpec(
            num_scalar_prefetch=0,
            grid=grid,
            in_specs=[emb_spec, mask_spec, emb_spec, mask_spec,
                      feat_spec, cnt_spec]
                     + [const_spec(w) for w in weights],
            out_specs=pl.BlockSpec((TB, OUT_PAD), lambda b, s: (b, 0)),
            scratch_shapes=[
                pltpu.VMEM((TB, 1, D), jnp.float32),   # acc_a (masked sum)
                pltpu.VMEM((TB, 1, D), jnp.float32),   # acc_b
            ]),
        compiler_params=pltpu.CompilerParams(
            dimension_semantics=("parallel", "arbitrary"),
            vmem_limit_bytes=vmem_limit),
    )(emb_a, mask_a_p, emb_b, mask_b_p, feats_p, cnts, *weights)

    return out[:B, :1]


def init_params(key, featureslen=FEATURESLEN):
    # PyTorch Linear(in,out) weight is [out,in]; we store the transpose [in,out].
    # Concats are folded by splitting weights along the input axis.
    ks = jax.random.split(key, 5)
    bf16 = jnp.bfloat16

    def lin(k, fan_in, fan_out):
        bound = 1.0 / jnp.sqrt(fan_in)
        kw, kb = jax.random.split(k)
        w = jax.random.uniform(kw, (fan_in, fan_out), jnp.float32, -bound, bound)
        b = jax.random.uniform(kb, (1, fan_out), jnp.float32, -bound, bound)
        return w, b

    w1, b1 = lin(ks[0], 2 * POLYBERT_DIM, 600)      # Linear(1200, 600)
    w2, b2 = lin(ks[1], 600, 128)                    # Linear(600, 128)
    wf, bfe = lin(ks[2], featureslen, 128)           # Linear(featureslen, 128)
    w3, b3 = lin(ks[3], 256, 64)                     # Linear(256, 64)
    w4, b4 = lin(ks[4], 64, 1)                       # Linear(64, 1)

    wf_p = jnp.zeros((FEAT_PAD, 128), bf16).at[:featureslen].set(wf.astype(bf16))
    w4_p = jnp.zeros((64, OUT_PAD), bf16).at[:, :1].set(w4.astype(bf16))
    b4_p = jnp.zeros((1, OUT_PAD), jnp.float32).at[:, :1].set(b4)

    return {
        "w1a": w1[:POLYBERT_DIM].astype(bf16),
        "w1b": w1[POLYBERT_DIM:].astype(bf16),
        "b1": b1,
        "w2": w2.astype(bf16), "b2": b2,
        "wf": wf_p, "bf": bfe,
        "w3c": w3[:128].astype(bf16), "w3f": w3[128:].astype(bf16), "b3": b3,
        "w4": w4_p, "b4": b4_p,
    }


def _reference(emb_a, mask_a, emb_b, mask_b, feats, p, featureslen=FEATURESLEN):
    f32, bf16 = jnp.float32, jnp.bfloat16
    dot = lambda a, b: jnp.dot(a, b, preferred_element_type=f32)

    def pool(e, m):
        mm = m.astype(f32)[:, :, None]
        return (jnp.sum(e.astype(f32) * mm, axis=1)
                / jnp.maximum(jnp.sum(mm, axis=1), 1e-9))

    o1 = pool(emb_a, mask_a).astype(bf16)
    o2 = pool(emb_b, mask_b).astype(bf16)
    h = jnp.maximum(dot(o1, p["w1a"]) + dot(o2, p["w1b"]) + p["b1"], 0.0)
    chem = jnp.maximum(dot(h.astype(bf16), p["w2"]) + p["b2"], 0.0)
    f_pad = jnp.zeros((feats.shape[0], FEAT_PAD), bf16).at[:, :featureslen].set(
        feats.astype(bf16))
    fich = jnp.maximum(dot(f_pad, p["wf"]) + p["bf"], 0.0)
    g = jnp.maximum(dot(chem.astype(bf16), p["w3c"])
                    + dot(fich.astype(bf16), p["w3f"]) + p["b3"], 0.0)
    return (dot(g.astype(bf16), p["w4"]) + p["b4"])[:, :1]


if __name__ == "__main__":
    # TODO(synk): the pretrained polyBERT tokenizer/encoder is not reproducible
    # in-kernel; the kernel consumes its token embeddings + attention masks.
    B, S = 2, 8
    key = jax.random.PRNGKey(0)
    k_emb_a, k_emb_b, k_feat, k_par = jax.random.split(key, 4)

    emb_a = jax.random.normal(k_emb_a, (B, S, POLYBERT_DIM), jnp.float32
                              ).astype(jnp.bfloat16)
    emb_b = jax.random.normal(k_emb_b, (B, S, POLYBERT_DIM), jnp.float32
                              ).astype(jnp.bfloat16)
    # simple deterministic padding masks
    mask_a = jnp.array([[1] * S, [1] * (S // 2) + [0] * (S - S // 2)], jnp.float32)
    mask_b = jnp.array([[1] * (S - 2) + [0, 0], [1] * S], jnp.float32)
    feats = jax.random.normal(k_feat, (B, FEATURESLEN), jnp.float32)

    params = init_params(k_par)

    out = ipec_forward(emb_a, mask_a, emb_b, mask_b, feats, params)
    out = jax.block_until_ready(out)

    ref = _reference(emb_a, mask_a, emb_b, mask_b, feats, params)
    assert out.shape == (B, 1)
    assert jnp.allclose(out, ref, atol=5e-3, rtol=5e-3), (out, ref)
    print("KERNEL_OK")
</pallas_src>

<mosaic_0001>
module attributes {stable_mosaic.version = 11 : i64} {
  func.func @_ipec_kernel(%arg0: i32, %arg1: i32, %arg2: memref<2x8x600xbf16, #tpu.memory_space<vmem>>, %arg3: memref<2x1x8xbf16, #tpu.memory_space<vmem>>, %arg4: memref<2x8x600xbf16, #tpu.memory_space<vmem>>, %arg5: memref<2x1x8xbf16, #tpu.memory_space<vmem>>, %arg6: memref<2x128xbf16, #tpu.memory_space<vmem>>, %arg7: memref<2x2xf32, #tpu.memory_space<vmem>>, %arg8: memref<600x600xbf16, #tpu.memory_space<vmem>>, %arg9: memref<600x600xbf16, #tpu.memory_space<vmem>>, %arg10: memref<1x600xf32, #tpu.memory_space<vmem>>, %arg11: memref<600x128xbf16, #tpu.memory_space<vmem>>, %arg12: memref<1x128xf32, #tpu.memory_space<vmem>>, %arg13: memref<128x128xbf16, #tpu.memory_space<vmem>>, %arg14: memref<1x128xf32, #tpu.memory_space<vmem>>, %arg15: memref<128x64xbf16, #tpu.memory_space<vmem>>, %arg16: memref<128x64xbf16, #tpu.memory_space<vmem>>, %arg17: memref<1x64xf32, #tpu.memory_space<vmem>>, %arg18: memref<64x128xbf16, #tpu.memory_space<vmem>>, %arg19: memref<1x128xf32, #tpu.memory_space<vmem>>, %arg20: memref<2x128xf32, #tpu.memory_space<vmem>>, %arg21: memref<2x1x600xf32, #tpu.memory_space<vmem>>, %arg22: memref<2x1x600xf32, #tpu.memory_space<vmem>>) attributes {dimension_semantics = [#tpu.dimension_semantics<parallel>, #tpu.dimension_semantics<arbitrary>], iteration_bounds = array<i64: 1, 1>, scalar_prefetch = 0 : i64, scratch_operands = 2 : i64, tpu.core_type = #tpu.core_type<tc>, window_params = [{transform_indices = @transform_0, window_bounds = array<i64: 2, 8, 600>}, {transform_indices = @transform_1, window_bounds = array<i64: 2, 1, 8>}, {transform_indices = @transform_2, window_bounds = array<i64: 2, 8, 600>}, {transform_indices = @transform_3, window_bounds = array<i64: 2, 1, 8>}, {transform_indices = @transform_4, window_bounds = array<i64: 2, 128>}, {transform_indices = @transform_5, window_bounds = array<i64: 2, 2>}, {pipeline_mode = #tpu.pipeline_mode<synchronous>, transform_indices = @transform_6, window_bounds = array<i64: 600, 600>}, {pipeline_mode = #tpu.pipeline_mode<synchronous>, transform_indices = @transform_7, window_bounds = array<i64: 600, 600>}, {pipeline_mode = #tpu.pipeline_mode<synchronous>, transform_indices = @transform_8, window_bounds = array<i64: 1, 600>}, {pipeline_mode = #tpu.pipeline_mode<synchronous>, transform_indices = @transform_9, window_bounds = array<i64: 600, 128>}, {pipeline_mode = #tpu.pipeline_mode<synchronous>, transform_indices = @transform_10, window_bounds = array<i64: 1, 128>}, {pipeline_mode = #tpu.pipeline_mode<synchronous>, transform_indices = @transform_11, window_bounds = array<i64: 128, 128>}, {pipeline_mode = #tpu.pipeline_mode<synchronous>, transform_indices = @transform_12, window_bounds = array<i64: 1, 128>}, {pipeline_mode = #tpu.pipeline_mode<synchronous>, transform_indices = @transform_13, window_bounds = array<i64: 128, 64>}, {pipeline_mode = #tpu.pipeline_mode<synchronous>, transform_indices = @transform_14, window_bounds = array<i64: 128, 64>}, {pipeline_mode = #tpu.pipeline_mode<synchronous>, transform_indices = @transform_15, window_bounds = array<i64: 1, 64>}, {pipeline_mode = #tpu.pipeline_mode<synchronous>, transform_indices = @transform_16, window_bounds = array<i64: 64, 128>}, {pipeline_mode = #tpu.pipeline_mode<synchronous>, transform_indices = @transform_17, window_bounds = array<i64: 1, 128>}, {transform_indices = @transform_18, window_bounds = array<i64: 2, 128>}]} {
    %c0_i32 = arith.constant 0 : i32
    %0 = arith.cmpi eq, %arg1, %c0_i32 : i32
    %1 = arith.extui %0 : i1 to i32
    %c0_i32_0 = arith.constant 0 : i32
    %2 = arith.cmpi ne, %1, %c0_i32_0 : i32
    scf.if %2 {
      %cst_27 = arith.constant 0.000000e+00 : f32
      %18 = vector.broadcast %cst_27 : f32 to vector<2x1x600xf32>
      %c0_28 = arith.constant 0 : index
      %c0_29 = arith.constant 0 : index
      %c0_30 = arith.constant 0 : index
      %19 = vector.load %arg21[%c0_28, %c0_29, %c0_30] : memref<2x1x600xf32, #tpu.memory_space<vmem>>, vector<2x1x600xf32>
      tpu.vector_store %arg21[%c0_28, %c0_29, %c0_30], %18 {strides = array<i32>} : memref<2x1x600xf32, #tpu.memory_space<vmem>>, vector<2x1x600xf32>,
      %cst_31 = arith.constant 0.000000e+00 : f32
      %20 = vector.broadcast %cst_31 : f32 to vector<2x1x600xf32>
      %c0_32 = arith.constant 0 : index
      %c0_33 = arith.constant 0 : index
      %c0_34 = arith.constant 0 : index
      %21 = vector.load %arg22[%c0_32, %c0_33, %c0_34] : memref<2x1x600xf32, #tpu.memory_space<vmem>>, vector<2x1x600xf32>
      tpu.vector_store %arg22[%c0_32, %c0_33, %c0_34], %20 {strides = array<i32>} : memref<2x1x600xf32, #tpu.memory_space<vmem>>, vector<2x1x600xf32>,
    } else {
    }
    %c0 = arith.constant 0 : index
    %c0_1 = arith.constant 0 : index
    %c0_2 = arith.constant 0 : index
    %3 = vector.load %arg2[%c0, %c0_1, %c0_2] : memref<2x8x600xbf16, #tpu.memory_space<vmem>>, vector<2x8x600xbf16>
    %c0_3 = arith.constant 0 : index
    %c0_4 = arith.constant 0 : index
    %c0_5 = arith.constant 0 : index
    %4 = vector.load %arg4[%c0_3, %c0_4, %c0_5] : memref<2x8x600xbf16, #tpu.memory_space<vmem>>, vector<2x8x600xbf16>
    %c0_6 = arith.constant 0 : index
    %c0_7 = arith.constant 0 : index
    %c0_8 = arith.constant 0 : index
    %5 = vector.load %arg3[%c0_6, %c0_7, %c0_8] : memref<2x1x8xbf16, #tpu.memory_space<vmem>>, vector<2x1x8xbf16>
    %c0_9 = arith.constant 0 : index
    %c0_10 = arith.constant 0 : index
    %c0_11 = arith.constant 0 : index
    %6 = vector.load %arg5[%c0_9, %c0_10, %c0_11] : memref<2x1x8xbf16, #tpu.memory_space<vmem>>, vector<2x1x8xbf16>
    %c0_12 = arith.constant 0 : index
    %c0_13 = arith.constant 0 : index
    %c0_14 = arith.constant 0 : index
    %7 = vector.load %arg21[%c0_12, %c0_13, %c0_14] : memref<2x1x600xf32, #tpu.memory_space<vmem>>, vector<2x1x600xf32>
    "tpu.trace_start"() <{level = 10 : i32, message = "bts,bsd->btd"}> : () -> ()
    %cst = arith.constant dense<0.000000e+00> : vector<2x1x600xf32>
    %8 = tpu.matmul %5, %3, %cst {dimension_numbers = #tpu.dot_dimension_numbers<[2], [1], [1], [2], [0, 0, 0, 1, 1, 2], [0], [0]>} : vector<2x1x8xbf16>, vector<2x8x600xbf16>, vector<2x1x600xf32> -> vector<2x1x600xf32>
    "tpu.trace_stop"() : () -> ()
    %9 = arith.addf %7, %8 : vector<2x1x600xf32>
    %c0_15 = arith.constant 0 : index
    %c0_16 = arith.constant 0 : index
    %c0_17 = arith.constant 0 : index
    %10 = vector.load %arg21[%c0_15, %c0_16, %c0_17] : memref<2x1x600xf32, #tpu.memory_space<vmem>>, vector<2x1x600xf32>
    tpu.vector_store %arg21[%c0_15, %c0_16, %c0_17], %9 {strides = array<i32>} : memref<2x1x600xf32, #tpu.memory_space<vmem>>, vector<2x1x600xf32>,
    %c0_18 = arith.constant 0 : index
    %c0_19 = arith.constant 0 : index
    %c0_20 = arith.constant 0 : index
    %11 = vector.load %arg22[%c0_18, %c0_19, %c0_20] : memref<2x1x600xf32, #tpu.memory_space<vmem>>, vector<2x1x600xf32>
    "tpu.trace_start"() <{level = 10 : i32, message = "bts,bsd->btd"}> : () -> ()
    %cst_21 = arith.constant dense<0.000000e+00> : vector<2x1x600xf32>
    %12 = tpu.matmul %6, %4, %cst_21 {dimension_numbers = #tpu.dot_dimension_numbers<[2], [1], [1], [2], [0, 0, 0, 1, 1, 2], [0], [0]>} : vector<2x1x8xbf16>, vector<2x8x600xbf16>, vector<2x1x600xf32> -> vector<2x1x600xf32>
    "tpu.trace_stop"() : () -> ()
    %13 = arith.addf %11, %12 : vector<2x1x600xf32>
    %c0_22 = arith.constant 0 : index
    %c0_23 = arith.constant 0 : index
    %c0_24 = arith.constant 0 : index
    %14 = vector.load %arg22[%c0_22, %c0_23, %c0_24] : memref<2x1x600xf32, #tpu.memory_space<vmem>>, vector<2x1x600xf32>
    tpu.vector_store %arg22[%c0_22, %c0_23, %c0_24], %13 {strides = array<i32>} : memref<2x1x600xf32, #tpu.memory_space<vmem>>, vector<2x1x600xf32>,
    %c0_i32_25 = arith.constant 0 : i32
    %15 = arith.cmpi eq, %arg1, %c0_i32_25 : i32
    %16 = arith.extui %15 : i1 to i32
    %c0_i32_26 = arith.constant 0 : i32
    %17 = arith.cmpi ne, %16, %c0_i32_26 : i32
    scf.if %17 {
      %c0_27 = arith.constant 0 : index
      %c0_28 = arith.constant 0 : index
      %18 = vector.load %arg7[%c0_27, %c0_28] : memref<2x2xf32, #tpu.memory_space<vmem>>, vector<2x2xf32>
      %c0_29 = arith.constant 0 : index
      %c0_30 = arith.constant 0 : index
      %c0_31 = arith.constant 0 : index
      %19 = vector.load %arg21[%c0_29, %c0_30, %c0_31] : memref<2x1x600xf32, #tpu.memory_space<vmem>>, vector<2x1x600xf32>
      %20 = vector.shape_cast %19 : vector<2x1x600xf32> to vector<2x600xf32>
      %21 = vector.extract_strided_slice %18 {offsets = [0, 0], sizes = [2, 1], strides = [1, 1]} : vector<2x2xf32> to vector<2x1xf32>
      %22 = vector.broadcast %21 : vector<2x1xf32> to vector<2x600xf32>
      %23 = arith.divf %20, %22 : vector<2x600xf32>
      %24 = arith.truncf %23 : vector<2x600xf32> to vector<2x600xbf16>
      %c0_32 = arith.constant 0 : index
      %c0_33 = arith.constant 0 : index
      %c0_34 = arith.constant 0 : index
      %25 = vector.load %arg22[%c0_32, %c0_33, %c0_34] : memref<2x1x600xf32, #tpu.memory_space<vmem>>, vector<2x1x600xf32>
      %26 = vector.shape_cast %25 : vector<2x1x600xf32> to vector<2x600xf32>
      %27 = vector.extract_strided_slice %18 {offsets = [0, 1], sizes = [2, 1], strides = [1, 1]} : vector<2x2xf32> to vector<2x1xf32>
      %28 = vector.broadcast %27 : vector<2x1xf32> to vector<2x600xf32>
      %29 = arith.divf %26, %28 : vector<2x600xf32>
      %30 = arith.truncf %29 : vector<2x600xf32> to vector<2x600xbf16>
      %c0_35 = arith.constant 0 : index
      %c0_36 = arith.constant 0 : index
      %31 = vector.load %arg8[%c0_35, %c0_36] : memref<600x600xbf16, #tpu.memory_space<vmem>>, vector<600x600xbf16>
      %cst_37 = arith.constant dense<0.000000e+00> : vector<2x600xf32>
      %32 = tpu.matmul %24, %31, %cst_37 {dimension_numbers = #tpu.dot_dimension_numbers<[1], [0], [0], [1], [0, 0, 1, 1], [], []>} : vector<2x600xbf16>, vector<600x600xbf16>, vector<2x600xf32> -> vector<2x600xf32>
      %c0_38 = arith.constant 0 : index
      %c0_39 = arith.constant 0 : index
      %33 = vector.load %arg9[%c0_38, %c0_39] : memref<600x600xbf16, #tpu.memory_space<vmem>>, vector<600x600xbf16>
      %cst_40 = arith.constant dense<0.000000e+00> : vector<2x600xf32>
      %34 = tpu.matmul %30, %33, %cst_40 {dimension_numbers = #tpu.dot_dimension_numbers<[1], [0], [0], [1], [0, 0, 1, 1], [], []>} : vector<2x600xbf16>, vector<600x600xbf16>, vector<2x600xf32> -> vector<2x600xf32>
      %35 = arith.addf %32, %34 : vector<2x600xf32>
      %c0_41 = arith.constant 0 : index
      %c0_42 = arith.constant 0 : index
      %36 = vector.load %arg10[%c0_41, %c0_42] : memref<1x600xf32, #tpu.memory_space<vmem>>, vector<1x600xf32>
      %37 = vector.broadcast %36 : vector<1x600xf32> to vector<2x600xf32>
      %38 = arith.addf %35, %37 : vector<2x600xf32>
      %cst_43 = arith.constant 0.000000e+00 : f32
      %39 = vector.broadcast %cst_43 : f32 to vector<2x600xf32>
      %40 = arith.maximumf %38, %39 : vector<2x600xf32>
      %41 = arith.truncf %40 : vector<2x600xf32> to vector<2x600xbf16>
      %c0_44 = arith.constant 0 : index
      %c0_45 = arith.constant 0 : index
      %42 = vector.load %arg11[%c0_44, %c0_45] : memref<600x128xbf16, #tpu.memory_space<vmem>>, vector<600x128xbf16>
      %cst_46 = arith.constant dense<0.000000e+00> : vector<2x128xf32>
      %43 = tpu.matmul %41, %42, %cst_46 {dimension_numbers = #tpu.dot_dimension_numbers<[1], [0], [0], [1], [0, 0, 1, 1], [], []>} : vector<2x600xbf16>, vector<600x128xbf16>, vector<2x128xf32> -> vector<2x128xf32>
      %c0_47 = arith.constant 0 : index
      %c0_48 = arith.constant 0 : index
      %44 = vector.load %arg12[%c0_47, %c0_48] : memref<1x128xf32, #tpu.memory_space<vmem>>, vector<1x128xf32>
      %45 = vector.broadcast %44 : vector<1x128xf32> to vector<2x128xf32>
      %46 = arith.addf %43, %45 : vector<2x128xf32>
      %cst_49 = arith.constant 0.000000e+00 : f32
      %47 = vector.broadcast %cst_49 : f32 to vector<2x128xf32>
      %48 = arith.maximumf %46, %47 : vector<2x128xf32>
      %c0_50 = arith.constant 0 : index
      %c0_51 = arith.constant 0 : index
      %49 = vector.load %arg6[%c0_50, %c0_51] : memref<2x128xbf16, #tpu.memory_space<vmem>>, vector<2x128xbf16>
      %c0_52 = arith.constant 0 : index
      %c0_53 = arith.constant 0 : index
      %50 = vector.load %arg13[%c0_52, %c0_53] : memref<128x128xbf16, #tpu.memory_space<vmem>>, vector<128x128xbf16>
      %cst_54 = arith.constant dense<0.000000e+00> : vector<2x128xf32>
      %51 = tpu.matmul %49, %50, %cst_54 {dimension_numbers = #tpu.dot_dimension_numbers<[1], [0], [0], [1], [0, 0, 1, 1], [], []>} : vector<2x128xbf16>, vector<128x128xbf16>, vector<2x128xf32> -> vector<2x128xf32>
      %c0_55 = arith.constant 0 : index
      %c0_56 = arith.constant 0 : index
      %52 = vector.load %arg14[%c0_55, %c0_56] : memref<1x128xf32, #tpu.memory_space<vmem>>, vector<1x128xf32>
      %53 = vector.broadcast %52 : vector<1x128xf32> to vector<2x128xf32>
      %54 = arith.addf %51, %53 : vector<2x128xf32>
      %cst_57 = arith.constant 0.000000e+00 : f32
      %55 = vector.broadcast %cst_57 : f32 to vector<2x128xf32>
      %56 = arith.maximumf %54, %55 : vector<2x128xf32>
      %57 = arith.truncf %48 : vector<2x128xf32> to vector<2x128xbf16>
      %c0_58 = arith.constant 0 : index
      %c0_59 = arith.constant 0 : index
      %58 = vector.load %arg15[%c0_58, %c0_59] : memref<128x64xbf16, #tpu.memory_space<vmem>>, vector<128x64xbf16>
      %cst_60 = arith.constant dense<0.000000e+00> : vector<2x64xf32>
      %59 = tpu.matmul %57, %58, %cst_60 {dimension_numbers = #tpu.dot_dimension_numbers<[1], [0], [0], [1], [0, 0, 1, 1], [], []>} : vector<2x128xbf16>, vector<128x64xbf16>, vector<2x64xf32> -> vector<2x64xf32>
      %60 = arith.truncf %56 : vector<2x128xf32> to vector<2x128xbf16>
      %c0_61 = arith.constant 0 : index
      %c0_62 = arith.constant 0 : index
      %61 = vector.load %arg16[%c0_61, %c0_62] : memref<128x64xbf16, #tpu.memory_space<vmem>>, vector<128x64xbf16>
      %cst_63 = arith.constant dense<0.000000e+00> : vector<2x64xf32>
      %62 = tpu.matmul %60, %61, %cst_63 {dimension_numbers = #tpu.dot_dimension_numbers<[1], [0], [0], [1], [0, 0, 1, 1], [], []>} : vector<2x128xbf16>, vector<128x64xbf16>, vector<2x64xf32> -> vector<2x64xf32>
      %63 = arith.addf %59, %62 : vector<2x64xf32>
      %c0_64 = arith.constant 0 : index
      %c0_65 = arith.constant 0 : index
      %64 = vector.load %arg17[%c0_64, %c0_65] : memref<1x64xf32, #tpu.memory_space<vmem>>, vector<1x64xf32>
      %65 = vector.broadcast %64 : vector<1x64xf32> to vector<2x64xf32>
      %66 = arith.addf %63, %65 : vector<2x64xf32>
      %cst_66 = arith.constant 0.000000e+00 : f32
      %67 = vector.broadcast %cst_66 : f32 to vector<2x64xf32>
      %68 = arith.maximumf %66, %67 : vector<2x64xf32>
      %69 = arith.truncf %68 : vector<2x64xf32> to vector<2x64xbf16>
      %c0_67 = arith.constant 0 : index
      %c0_68 = arith.constant 0 : index
      %70 = vector.load %arg18[%c0_67, %c0_68] : memref<64x128xbf16, #tpu.memory_space<vmem>>, vector<64x128xbf16>
      %cst_69 = arith.constant dense<0.000000e+00> : vector<2x128xf32>
      %71 = tpu.matmul %69, %70, %cst_69 {dimension_numbers = #tpu.dot_dimension_numbers<[1], [0], [0], [1], [0, 0, 1, 1], [], []>} : vector<2x64xbf16>, vector<64x128xbf16>, vector<2x128xf32> -> vector<2x128xf32>
      %c0_70 = arith.constant 0 : index
      %c0_71 = arith.constant 0 : index
      %72 = vector.load %arg19[%c0_70, %c0_71] : memref<1x128xf32, #tpu.memory_space<vmem>>, vector<1x128xf32>
      %73 = vector.broadcast %72 : vector<1x128xf32> to vector<2x128xf32>
      %74 = arith.addf %71, %73 : vector<2x128xf32>
      %c0_72 = arith.constant 0 : index
      %c0_73 = arith.constant 0 : index
      %75 = vector.load %arg20[%c0_72, %c0_73] : memref<2x128xf32, #tpu.memory_space<vmem>>, vector<2x128xf32>
      tpu.vector_store %arg20[%c0_72, %c0_73], %74 {strides = array<i32>} : memref<2x128xf32, #tpu.memory_space<vmem>>, vector<2x128xf32>,
    } else {
    }
    return
  }
  func.func @transform_0(%arg0: i32, %arg1: i32) -> (i32, i32, i32) {
    %c0_i32 = arith.constant 0 : i32
    %c0_i32_0 = arith.constant 0 : i32
    return %arg0, %arg1, %c0_i32 : i32, i32, i32
  }
  func.func @transform_1(%arg0: i32, %arg1: i32) -> (i32, i32, i32) {
    %c0_i32 = arith.constant 0 : i32
    %c0_i32_0 = arith.constant 0 : i32
    return %arg0, %c0_i32, %arg1 : i32, i32, i32
  }
  func.func @transform_2(%arg0: i32, %arg1: i32) -> (i32, i32, i32) {
    %c0_i32 = arith.constant 0 : i32
    %c0_i32_0 = arith.constant 0 : i32
    return %arg0, %arg1, %c0_i32 : i32, i32, i32
  }
  func.func @transform_3(%arg0: i32, %arg1: i32) -> (i32, i32, i32) {
    %c0_i32 = arith.constant 0 : i32
    %c0_i32_0 = arith.constant 0 : i32
    return %arg0, %c0_i32, %arg1 : i32, i32, i32
  }
  func.func @transform_4(%arg0: i32, %arg1: i32) -> (i32, i32) {
    %c0_i32 = arith.constant 0 : i32
    %c0_i32_0 = arith.constant 0 : i32
    return %arg0, %c0_i32 : i32, i32
  }
  func.func @transform_5(%arg0: i32, %arg1: i32) -> (i32, i32) {
    %c0_i32 = arith.constant 0 : i32
    %c0_i32_0 = arith.constant 0 : i32
    return %arg0, %c0_i32 : i32, i32
  }
  func.func @transform_6(%arg0: i32, %arg1: i32) -> (i32, i32) {
    %c0_i32 = arith.constant 0 : i32
    %c0_i32_0 = arith.constant 0 : i32
    %c0_i32_1 = arith.constant 0 : i32
    return %c0_i32, %c0_i32_0 : i32, i32
  }
  func.func @transform_7(%arg0: i32, %arg1: i32) -> (i32, i32) {
    %c0_i32 = arith.constant 0 : i32
    %c0_i32_0 = arith.constant 0 : i32
    %c0_i32_1 = arith.constant 0 : i32
    return %c0_i32, %c0_i32_0 : i32, i32
  }
  func.func @transform_8(%arg0: i32, %arg1: i32) -> (i32, i32) {
    %c0_i32 = arith.constant 0 : i32
    %c0_i32_0 = arith.constant 0 : i32
    %c0_i32_1 = arith.constant 0 : i32
    return %c0_i32, %c0_i32_0 : i32, i32
  }
  func.func @transform_9(%arg0: i32, %arg1: i32) -> (i32, i32) {
    %c0_i32 = arith.constant 0 : i32
    %c0_i32_0 = arith.constant 0 : i32
    %c0_i32_1 = arith.constant 0 : i32
    return %c0_i32, %c0_i32_0 : i32, i32
  }
  func.func @transform_10(%arg0: i32, %arg1: i32) -> (i32, i32) {
    %c0_i32 = arith.constant 0 : i32
    %c0_i32_0 = arith.constant 0 : i32
    %c0_i32_1 = arith.constant 0 : i32
    return %c0_i32, %c0_i32_0 : i32, i32
  }
  func.func @transform_11(%arg0: i32, %arg1: i32) -> (i32, i32) {
    %c0_i32 = arith.constant 0 : i32
    %c0_i32_0 = arith.constant 0 : i32
    %c0_i32_1 = arith.constant 0 : i32
    return %c0_i32, %c0_i32_0 : i32, i32
  }
  func.func @transform_12(%arg0: i32, %arg1: i32) -> (i32, i32) {
    %c0_i32 = arith.constant 0 : i32
    %c0_i32_0 = arith.constant 0 : i32
    %c0_i32_1 = arith.constant 0 : i32
    return %c0_i32, %c0_i32_0 : i32, i32
  }
  func.func @transform_13(%arg0: i32, %arg1: i32) -> (i32, i32) {
    %c0_i32 = arith.constant 0 : i32
    %c0_i32_0 = arith.constant 0 : i32
    %c0_i32_1 = arith.constant 0 : i32
    return %c0_i32, %c0_i32_0 : i32, i32
  }
  func.func @transform_14(%arg0: i32, %arg1: i32) -> (i32, i32) {
    %c0_i32 = arith.constant 0 : i32
    %c0_i32_0 = arith.constant 0 : i32
    %c0_i32_1 = arith.constant 0 : i32
    return %c0_i32, %c0_i32_0 : i32, i32
  }
  func.func @transform_15(%arg0: i32, %arg1: i32) -> (i32, i32) {
    %c0_i32 = arith.constant 0 : i32
    %c0_i32_0 = arith.constant 0 : i32
    %c0_i32_1 = arith.constant 0 : i32
    return %c0_i32, %c0_i32_0 : i32, i32
  }
  func.func @transform_16(%arg0: i32, %arg1: i32) -> (i32, i32) {
    %c0_i32 = arith.constant 0 : i32
    %c0_i32_0 = arith.constant 0 : i32
    %c0_i32_1 = arith.constant 0 : i32
    return %c0_i32, %c0_i32_0 : i32, i32
  }
  func.func @transform_17(%arg0: i32, %arg1: i32) -> (i32, i32) {
    %c0_i32 = arith.constant 0 : i32
    %c0_i32_0 = arith.constant 0 : i32
    %c0_i32_1 = arith.constant 0 : i32
    return %c0_i32, %c0_i32_0 : i32, i32
  }
  func.func @transform_18(%arg0: i32, %arg1: i32) -> (i32, i32) {
    %c0_i32 = arith.constant 0 : i32
    %c0_i32_0 = arith.constant 0 : i32
    return %arg0, %c0_i32 : i32, i32
  }
}

</mosaic_0001>

<bundles_post_ra>
// kernel: tpu_custom_call.1
= control target key start
LH: loop header
LB: loop body
LE: loop exit
PB: predicated region body
PF: predicated region fallthrough
CT: control target
= control target key end

     0   :  { %s7636_s0 = inlined_call_operand.vmem [shape: bf16[2,8,600], index: 0, kind: input, shape index: {}]   ;;  %s7637_s1 = inlined_call_operand.vmem [shape: bf16[2,1,8], index: 1, kind: input, shape index: {}]   ;;  %s7638_s2 = inlined_call_operand.vmem [shape: bf16[2,8,600], index: 2, kind: input, shape index: {}]   ;;  %s7639_s3 = inlined_call_operand.vmem [shape: bf16[2,1,8], index: 3, kind: input, shape index: {}]   ;;  %s7640_s4 = inlined_call_operand.vmem [shape: bf16[2,128], index: 4, kind: input, shape index: {}]   ;;  %s7641_s5 = inlined_call_operand.vmem [shape: f32[2,2], index: 5, kind: input, shape index: {}]   ;;  %s7642_s6 = inlined_call_operand.hbm [shape: bf16[600,600], index: 6, kind: input, shape index: {}]   ;;  %s7643_s7 = inlined_call_operand.hbm [shape: bf16[600,600], index: 7, kind: input, shape index: {}]   ;;  %s7644_s8 = inlined_call_operand.vmem [shape: f32[1,600], index: 8, kind: input, shape index: {}]   ;;  %s7645_s9 = inlined_call_operand.hbm [shape: bf16[600,128], index: 9, kind: input, shape index: {}]   ;;  %s7646_s10 = inlined_call_operand.vmem [shape: f32[1,128], index: 10, kind: input, shape index: {}]   ;;  %s7647_s11 = inlined_call_operand.vmem [shape: bf16[128,128], index: 11, kind: input, shape index: {}]   ;;  %s7648_s12 = inlined_call_operand.vmem [shape: f32[1,128], index: 12, kind: input, shape index: {}]   ;;  %s7649_s13 = inlined_call_operand.vmem [shape: bf16[128,64], index: 13, kind: input, shape index: {}]   ;;  %s7650_s14 = inlined_call_operand.vmem [shape: bf16[128,64], index: 14, kind: input, shape index: {}]   ;;  %s7651_s15 = inlined_call_operand.vmem [shape: f32[1,64], index: 15, kind: input, shape index: {}]   ;;  %s7652_s16 = inlined_call_operand.hbm [shape: bf16[64,128], index: 16, kind: input, shape index: {}]   ;;  %s7653_s17 = inlined_call_operand.vmem [shape: f32[1,128], index: 17, kind: input, shape index: {}]   ;;  %s7654_s18 = inlined_call_operand.hbm [shape: f32[2,128], index: 18, kind: output, shape index: {}]  }
   0x1   :  { %7658 = sst [smem:[#allocation17_spill]] %s7636_s0 }
   0x2   :  { %7659 = sst [smem:[#allocation18_spill]] %s7637_s1 }
   0x3   :  { %7660 = sst [smem:[#allocation19_spill]] %s7638_s2 }
   0x4   :  { %23 = vsyncpa [#allocation5], 0 }
   0x5   :  { %24 = vsyncpa [#allocation8], 0 }
   0x6   :  { %25 = vsyncpa [#allocation11], 0 }
   0x7   :  { %26 = vsyncpa [#allocation6], 0  ;;  %s56_s29 = sshll.u32 %s7643_s7, 4  ;;  %s7011_s30 = smov [#allocation7]   ;;  %s57_s29 = int_to_ptr.hbm [resolvable:$true] %s56_s29 }
   0x8   :  { %s58_s0 = sshll.u32 %s7011_s30, 4  ;;  %s43_s20 = sshll.u32 %s7642_s6, 4  ;;  %s59_s0 = int_to_ptr.vmem [resolvable:$true] %s58_s0  ;;  %s44_s20 = int_to_ptr.hbm [resolvable:$true] %s43_s20 }
   0x9   :  { %s7012_s21 = smov 320   ;;  %s7013_s22 = smov 20  }
   0xa   :  { %64 = dma.hbm_to_vmem [thread:$0]  %s57_s29, 24000, %s59_s0, [#allocation8], %s7012_s21, %s7012_s21, %s7013_s22  }
   0xb   :  { %s7014_s2 = smov [#allocation4]   ;;  %s71_s26 = sshll.u32 %s7645_s9, 4  ;;  %s72_s26 = int_to_ptr.hbm [resolvable:$true] %s71_s26 }
   0xc   :  { %s45_s23 = sshll.u32 %s7014_s2, 4  ;;  %s7015_s7 = smov [#allocation9]   ;;  %s46_s23 = int_to_ptr.vmem [resolvable:$true] %s45_s23 }
   0xd   :  { %51 = dma.hbm_to_vmem [thread:$0]  %s44_s20, 24000, %s46_s23, [#allocation5], %s7012_s21, %s7012_s21, %s7013_s22  }
   0xe   :  { %s73_s27 = sshll.u32 %s7015_s7, 4  ;;  %s96_s6 = sshll.u32 %s7652_s16, 4  ;;  %s74_s27 = int_to_ptr.vmem [resolvable:$true] %s73_s27  ;;  %s97_s6 = int_to_ptr.hbm [resolvable:$true] %s96_s6 }
   0xf   :  { %s7016_s19 = smov 64   ;;  %s7017_s1 = smov 4  }
  0x10   :  { %79 = dma.hbm_to_vmem [thread:$0]  %s72_s26, 4800, %s74_s27, [#allocation8], %s7016_s19, %s7016_s19, %s7017_s1  }
  0x11   :  { %s7018_s29 = smov [#allocation10]  }
  0x12   :  { %s98_s0 = sshll.u32 %s7018_s29, 4  ;;  %s99_s0 = int_to_ptr.vmem [resolvable:$true] %s98_s0 }
  0x13   :  { %104 = dma.hbm_to_vmem [thread:$0]  %s97_s6, 512, %s99_s0, [#allocation11], %s7016_s19, %s7016_s19, %s7017_s1  }
  0x14   :  { %7003 = dma.done.wait [#allocation5], 24000  }
  0x15   :  { %7004 = vsyncadd [#allocation5], 4294943296 }
  0x16   :  { %7005 = dma.done.wait [#allocation8], 28800  }
  0x17   :  { %7006 = vsyncadd [#allocation8], 4294938496 }
  0x18   :  { %7007 = dma.done.wait [#allocation11], 512  }
  0x19   :  { %7008 = vsyncadd [#allocation11], 4294966784  ;;  %v7019_v0 = vmov 1   ;;  %s7661_s16 = sld [smem:[#allocation17_spill]]  ;;  %vm171_vm0 = vcmask 1043456   ;;  %vm167_vm1 = vcmask 64512  }
  0x1a   :  { %6868 = vset.pattern.permute.xlu0 %v7019_v0  ;;  %v617_v12 = vld [vmem:[%s7641_s5] sm:$0x3]  ;;  %s7662_s19 = sld [smem:[#allocation19_spill]]  ;;  %v7020_v43 = vmov 0   ;;  %vm366_vm3 = vcmask 1040384   ;;  %vm368_vm4 = vcmask 1041408  }
  0x1b   :  { %693 = vperm.xlu0 %6868, %v617_v12   ;;  %s7663_s9 = sld [smem:[#allocation18_spill]]  ;;  %vm370_vm5 = vcmask 1043459   ;;  %vm372_vm6 = vcmask 1042432   ;;  %vm1232_vm15 = vcmask 1041409   ;;  %s4637_s23 = sshll.u32 %s7654_s18, 4  ;;  %s4638_s23 = int_to_ptr.hbm [resolvable:$true] %s4637_s23 }
  0x1f   :  { %v136_v1 = vld [vmem:[%s7661_s16] sm:$0xff]  ;;  %v137_v2 = vld [vmem:[%s7661_s16 + $0x8] sm:$0xff]  ;;  %v139_v7 = vld [vmem:[%s7661_s16 + $0x14] sm:$0xff] }
  0x20   :  { %v157_v3 = vunpack.c.l.b16 %v136_v1  ;;  %v159_v4 = vunpack.c.l.b16 %v137_v2  ;;  %v158_v5 = vunpack.c.h.b16 %v136_v1  ;;  %v160_v6 = vunpack.c.h.b16 %v137_v2  ;;  %v138_v8 = vld [vmem:[%s7661_s16 + $0x10] sm:$0xf]  ;;  %v140_v13 = vld [vmem:[%s7661_s16 + $0x1c] sm:$0xff]  ;;  %v141_v27 = vld [vmem:[%s7661_s16 + $0x24] sm:$0xf]  ;;  %s7022_s16 = smov [#allocation12]  }
  0x21   :  { %v256_v9 = vunpack.c.h.b16 %v139_v7  ;;  %v161_v10 = vunpack.c.l.b16 %v138_v8  ;;  %v255_v11 = vunpack.c.l.b16 %v139_v7  ;;  %v257_v21 = vunpack.c.l.b16 %v140_v13  ;;  %v142_v22 = vld [vmem:[%s7662_s19] sm:$0xff]  ;;  %v144_v44 = vld [vmem:[%s7662_s19 + $0x10] sm:$0xf]  ;;  %v143_v49 = vld [vmem:[%s7662_s19 + $0x8] sm:$0xff]  ;;  %s4635_s21 = sshll.u32 %s7022_s16, 4  ;;  %s4636_s21 = int_to_ptr.vmem [resolvable:$true] %s4635_s21 }
  0x22   :  { %v162_v14 = vpack.c.b16 %v157_v3, %v157_v3  ;;  %v164_v15 = vpack.c.b16 %v159_v4, %v159_v4  ;;  %v163_v16 = vpack.c.b16 %v158_v5, %v158_v5  ;;  %v165_v17 = vpack.c.b16 %v160_v6, %v160_v6  ;;  %v148_v28 = vld [vmem:[%s7663_s9] sm:$0x1]  ;;  %v149_v51 = vld [vmem:[%s7663_s9 + $0x1] sm:$0x1]  ;;  %v145_v59 = vld [vmem:[%s7662_s19 + $0x14] sm:$0xff] }
  0x23   :  { %v261_v18 = vpack.c.b16 %v256_v9, %v256_v9  ;;  %v166_v19 = vpack.c.b16 %v161_v10, %v161_v10  ;;  %v260_v20 = vpack.c.b16 %v255_v11, %v255_v11  ;;  %v262_v31 = vpack.c.b16 %v257_v21, %v257_v21  ;;  %6869 = vset.pattern.permute.xlu0 %v7020_v43  ;;  %v146_v63 = vld [vmem:[%s7662_s19 + $0x1c] sm:$0xff]  ;;  %v147_v9 = vld [vmem:[%s7662_s19 + $0x24] sm:$0xf] }
  0x24   :  { %v173_v23 = vsel %vm171_vm0, %v162_v14, 0  ;;  %v179_v24 = vsel %vm171_vm0, %v164_v15, 0  ;;  %v176_v25 = vsel %vm171_vm0, %v163_v16, 0  ;;  %v182_v26 = vsel %vm171_vm0, %v165_v17, 0  ;;  %622 = vperm.xlu0 %6869, %v617_v12   ;;  %v151_v14 = vld [vmem:[%s7639_s3 + $0x1] sm:$0x1] }
  0x25   :  { %194 = vmatpush.bf16.msra.mxu3 %v173_v23  ;;  %220 = vmatpush.bf16.msra.mxu2 %v179_v24  ;;  %v272_v29 = vsel %vm171_vm0, %v261_v18, 0  ;;  %v185_v30 = vsel %vm171_vm0, %v166_v19, 0  ;;  %v393_v32 = vunpack.c.l.b16 %v142_v22  ;;  %v258_v33 = vunpack.c.h.b16 %v140_v13 }
  0x26   :  { %207 = vmatpush.bf16.msra.mxu1 %v176_v25  ;;  %v259_v34 = vunpack.c.l.b16 %v141_v27  ;;  %246 = vmatpush.bf16.msra.mxu0 %v185_v30  ;;  %v269_v35 = vsel %vm171_vm0, %v260_v20, 0  ;;  %v275_v36 = vsel %vm171_vm0, %v262_v31, 0  ;;  %v394_v45 = vunpack.c.h.b16 %v142_v22  ;;  %v4971_v31 = vld [vmem:[#allocation7 + $0x258] sm:$0xf] }
  0x27   :  { %v398_v37 = vpack.c.b16 %v393_v32, %v393_v32  ;;  %v263_v38 = vpack.c.b16 %v258_v33, %v258_v33  ;;  %v397_v46 = vunpack.c.l.b16 %v144_v44  ;;  %v395_v50 = vunpack.c.l.b16 %v143_v49  ;;  %v6683_v32 = vld [vmem:[#allocation7 + $0x268] sm:$0xf0]  ;;  %v5131_v33 = vld [vmem:[#allocation7 + $0x398] sm:$0xf] }
  0x28   :  { %4649 = vmatmul.msk.bf16.vlgmr.msra.gmra.mxu3 %vm167_vm1, %v148_v28  ;;  %4651 = vmatmul.msk.bf16.vlgmr.msra.gmra.mxu2 %vm167_vm1, %v148_v28  ;;  %v264_v39 = vpack.c.b16 %v259_v34, %v259_v34  ;;  %v399_v47 = vpack.c.b16 %v394_v45, %v394_v45  ;;  %v396_v52 = vunpack.c.h.b16 %v143_v49  ;;  %v489_v60 = vunpack.c.l.b16 %v145_v59  ;;  %v6678_v49 = vld [vmem:[#allocation7 + $0x240] sm:$0xf0] }
  0x29   :  { %233 = vmatpush.bf16.msrb.mxu3 %v182_v26  ;;  %303 = vmatpush.bf16.msrb.mxu2 %v272_v29  ;;  %v407_v40 = vsel %vm171_vm0, %v398_v37, 0  ;;  %v278_v41 = vsel %vm171_vm0, %v263_v38, 0  ;;  %v402_v48 = vpack.c.b16 %v397_v46, %v397_v46  ;;  %v400_v54 = vpack.c.b16 %v395_v50, %v395_v50  ;;  %v6723_v38 = vld [vmem:[#allocation7 + $0x3a8] sm:$0xf0]  ;;  %v5111_v50 = vld [vmem:[#allocation7 + $0x370] sm:$0xf] }
  0x2a   :  { %4650 = vmatmul.msk.bf16.vlgmr.msra.gmra.mxu1 %vm167_vm1, %v148_v28  ;;  %4653 = vmatmul.msk.bf16.vlgmr.msra.gmra.mxu0 %vm167_vm1, %v148_v28  ;;  %v281_v42 = vsel %vm171_vm0, %v264_v39, 0  ;;  %v410_v53 = vsel %vm171_vm0, %v399_v47, 0  ;;  %v401_v56 = vpack.c.b16 %v396_v52, %v396_v52  ;;  %v494_v61 = vpack.c.b16 %v489_v60, %v489_v60  ;;  %v5291_v39 = vld [vmem:[#allocation7 + $0x4d8] sm:$0xf] }
  0x2b   :  { %290 = vmatpush.bf16.msrb.mxu1 %v269_v35  ;;  %329 = vmatpush.bf16.msrb.mxu0 %v278_v41  ;;  %v419_v55 = vsel %vm171_vm0, %v402_v48, 0  ;;  %v413_v57 = vsel %vm171_vm0, %v400_v54, 0  ;;  %v490_v62 = vunpack.c.h.b16 %v145_v59  ;;  %v491_v1 = vunpack.c.l.b16 %v146_v63  ;;  %v4951_v48 = vld [vmem:[#allocation7 + $0x230] sm:$0xf]  ;;  %v6718_v54 = vld [vmem:[#allocation7 + $0x380] sm:$0xf0] }
  0x2c   :  { %6870 = vset.pattern.permute.xlu0 %v7019_v0  ;;  %v416_v58 = vsel %vm171_vm0, %v401_v56, 0  ;;  %v150_v0 = vld [vmem:[%s7639_s3] sm:$0x1]  ;;  %v503_v2 = vsel %vm171_vm0, %v494_v61, 0  ;;  %v492_v6 = vunpack.c.h.b16 %v146_v63  ;;  %v493_v11 = vunpack.c.l.b16 %v147_v9  ;;  %v4811_v60 = vld [vmem:[#allocation7 + $0x118] sm:$0xf] }
  0x2d   :  { %316 = vmatpush.bf16.msra.mxu3 %v275_v36  ;;  %428 = vmatpush.bf16.msra.mxu2 %v407_v40  ;;  %v495_v3 = vpack.c.b16 %v490_v62, %v490_v62  ;;  %v496_v4 = vpack.c.b16 %v491_v1, %v491_v1  ;;  %v128_v15 = vlaneseq  ;;  %v7021_v17 = vmov 0.0   ;;  %v6763_v40 = vld [vmem:[#allocation7 + $0x4e8] sm:$0xf0]  ;;  %v4931_v1 = vld [vmem:[#allocation7 + $0x208] sm:$0xf] }
  0x2e   :  { %v497_v8 = vpack.c.b16 %v492_v6, %v492_v6  ;;  %v498_v12 = vpack.c.b16 %v493_v11, %v493_v11  ;;  %v4972_v37 = vor.u32 %v6683_v32, %v4971_v31  ;;  %v5292_v43 = vor.u32 %v6763_v40, %v5291_v39  ;;  %v6643_v61 = vld [vmem:[#allocation7 + $0x128] sm:$0xf0]  ;;  %v5251_v6 = vld [vmem:[#allocation7 + $0x488] sm:$0xf]  ;;  %v6638_v11 = vld [vmem:[#allocation7 + $0x100] sm:$0xf0] }
  0x2f   :  { %342 = vmatpush.bf16.msra.mxu1 %v281_v42  ;;  %454 = vmatpush.bf16.msra.mxu0 %v413_v57  ;;  %v506_v5 = vsel %vm171_vm0, %v495_v3, 0  ;;  %v509_v7 = vsel %vm171_vm0, %v496_v4, 0  ;;  %vm7223_vm2 = vcmp.lt.s32.totalorder %v128_v15, 600  ;;  %v5132_v42 = vor.u32 %v6723_v38, %v5131_v33  ;;  %v5091_v3 = vld [vmem:[#allocation7 + $0x348] sm:$0xf] }
  0x30   :  { %v512_v10 = vsel %vm171_vm0, %v497_v8, 0  ;;  %v515_v13 = vsel %vm171_vm0, %v498_v12, 0  ;;  %132 = vst.msk [vmem:[#allocation2] sm:$0x1f] %vm7223_vm2, %v7021_v17  ;;  %v5112_v57 = vor.u32 %v6718_v54, %v5111_v50  ;;  %v4911_v12 = vld [vmem:[#allocation7 + $0x1e0] sm:$0xf] }
  0x31   :  { %133 = vst.msk [vmem:[#allocation2 + $0x5] sm:$0x1f] %vm7223_vm2, %v7021_v17  ;;  %v6668_v15 = vld [vmem:[#allocation7 + $0x1f0] sm:$0xf0]  ;;  %v6633_v31 = vld [vmem:[#allocation7 + $0xd8] sm:$0xf0] }
  0x32   :  { %134 = vst.msk [vmem:[#allocation3] sm:$0x1f] %vm7223_vm2, %v7021_v17  ;;  %v4891_v32 = vld [vmem:[#allocation7 + $0x1b8] sm:$0xf]  ;;  %v6663_v38 = vld [vmem:[#allocation7 + $0x1c8] sm:$0xf0] }
  0x33   :  { %135 = vst.msk [vmem:[#allocation3 + $0x5] sm:$0x1f] %vm7223_vm2, %v7021_v17  ;;  %v5071_v17 = vld [vmem:[#allocation7 + $0x320] sm:$0xf]  ;;  %v5051_v39 = vld [vmem:[#allocation7 + $0x2f8] sm:$0xf] }
  0x34   :  { %v6698_v54 = vld [vmem:[#allocation7 + $0x2e0] sm:$0xf0] }
  0x37   :  { %v152_v44 = vld [vmem:[#allocation2] sm:$0x1f] }
  0x38   :  { %4652 = vmatmul.msk.bf16.vlgmr.msrb.gmra.mxu3 %vm167_vm1, %v148_v28  ;;  %4655 = vmatmul.msk.bf16.vlgmr.msrb.gmra.mxu2 %vm167_vm1, %v149_v51 }
  0x39   :  { %441 = vmatpush.bf16.msrb.mxu3 %v410_v53  ;;  %480 = vmatpush.bf16.msrb.mxu2 %v419_v55  ;;  %v4952_v53 = vor.u32 %v6678_v49, %v4951_v48  ;;  %v5271_v55 = vld [vmem:[#allocation7 + $0x4b0] sm:$0xf] }
  0x3a   :  { %4654 = vmatmul.msk.bf16.vlgmr.msrb.gmra.mxu1 %vm167_vm1, %v149_v51  ;;  %4657 = vmatmul.msk.bf16.vlgmr.msrb.gmra.mxu0 %vm167_vm1, %v149_v51  ;;  %v4871_v48 = vld [vmem:[#allocation7 + $0x190] sm:$0xf] }
  0x3b   :  { %467 = vmatpush.bf16.msrb.mxu1 %v416_v58  ;;  %537 = vmatpush.bf16.msrb.mxu0 %v506_v5  ;;  %v6758_v58 = vld [vmem:[#allocation7 + $0x4c0] sm:$0xf0]  ;;  %v6713_v5 = vld [vmem:[#allocation7 + $0x358] sm:$0xf0] }
  0x3c   :  { %v5272_v59 = vor.u32 %v6758_v58, %v5271_v55  ;;  %v5092_v8 = vor.u32 %v6713_v5, %v5091_v3  ;;  %v6653_v5 = vld [vmem:[#allocation7 + $0x178] sm:$0xf0] }
  0x48   :  { %4656 = vmatmul.msk.bf16.vlgmr.msra.gmra.mxu3 %vm167_vm1, %v149_v51  ;;  %4659 = vmatmul.msk.bf16.vlgmr.msra.gmra.mxu2 %vm167_vm1, %v150_v0 }
  0x49   :  { %524 = vmatpush.bf16.msra.mxu3 %v503_v2  ;;  %563 = vmatpush.bf16.msra.mxu2 %v512_v10  ;;  %v6673_v2 = vld [vmem:[#allocation7 + $0x218] sm:$0xf0]  ;;  %v4791_v10 = vld [vmem:[#allocation7 + $0xf0] sm:$0xf] }
  0x4a   :  { %4658 = vmatmul.msk.bf16.vlgmr.msra.gmra.mxu1 %vm167_vm1, %v149_v51  ;;  %4661 = vmatmul.msk.bf16.vlgmr.msra.gmra.mxu0 %vm167_vm1, %v150_v0  ;;  %v4932_v4 = vor.u32 %v6673_v2, %v4931_v1 }
  0x4b   :  { %550 = vmatpush.bf16.msra.mxu1 %v509_v7  ;;  %v6753_v7 = vld [vmem:[#allocation7 + $0x498] sm:$0xf0] }
  0x4c   :  { %v5252_v9 = vor.u32 %v6753_v7, %v5251_v6  ;;  %v5011_v6 = vld [vmem:[#allocation7 + $0x2a8] sm:$0xf] }
  0x58   :  { %4660 = vmatmul.msk.bf16.vlgmr.msrb.gmra.mxu3 %vm167_vm1, %v150_v0  ;;  %4663 = vmatmul.msk.bf16.vlgmr.msrb.gmra.mxu2 %vm167_vm1, %v150_v0 }
  0x59   :  { %576 = vmatpush.bf16.msrb.mxu3 %v515_v13  ;;  %2271 = vmatpush.bf16.msrb.mxu2 %v5132_v42  ;;  %v4892_v42 = vor.u32 %v6663_v38, %v4891_v32  ;;  %v4813_v32 = vld [vmem:[#allocation7 + $0x12c] sm:$0xf0] }
  0x5a   :  { %4662 = vmatmul.msk.bf16.vlgmr.msrb.gmra.mxu1 %vm167_vm1, %v150_v0  ;;  %4665 = vmatmul.msk.bf16.vlgmr.msrb.gmra.mxu0 %vm167_vm1, %v151_v14  ;;  %v4812_v0 = vor.u32 %v6643_v61, %v4811_v60  ;;  %v6738_v60 = vld [vmem:[#allocation7 + $0x420] sm:$0xf0] }
  0x5b   :  { %2258 = vmatpush.bf16.msrb.mxu1 %v4972_v37 }
  0x5c   :  { %2245 = vmatpush.bf16.msra.mxu0 %v4812_v0  ;;  %v6623_v0 = vld [vmem:[#allocation7 + $0x88] sm:$0xf0] }
  0x5d   :  { %2272 = vmatpush.bf16.msrb.mxu2 %v5112_v57 }
  0x5f   :  { %2259 = vmatpush.bf16.msrb.mxu1 %v4952_v53  ;;  %v5031_v53 = vld [vmem:[#allocation7 + $0x2d0] sm:$0xf] }
  0x60   :  { %v5032_v58 = vor.u32 %v6698_v54, %v5031_v53 }
  0x61   :  { %2273 = vmatpush.bf16.msrb.mxu2 %v5092_v8  ;;  %v6693_v8 = vld [vmem:[#allocation7 + $0x2b8] sm:$0xf0] }
  0x63   :  { %2260 = vmatpush.bf16.msrb.mxu1 %v4932_v4  ;;  %v4851_v4 = vld [vmem:[#allocation7 + $0x168] sm:$0xf] }
  0x64   :  { %v4852_v7 = vor.u32 %v6653_v5, %v4851_v4  ;;  %v6631_v5 = vld [vmem:[#allocation7 + $0xcc] sm:$0xf] }
  0x68   :  { %4664 = vmatmul.msk.bf16.vlgmr.msra.gmra.mxu3 %vm167_vm1, %v151_v14  ;;  %4667 = vmatmul.msk.bf16.vlgmr.msra.gmra.mxu2 %vm167_vm1, %v151_v14 }
  0x69   :  { %2284 = vmatpush.bf16.msra.mxu3 %v5292_v43 }
  0x6a   :  { %4666 = vmatmul.msk.bf16.vlgmr.msra.gmra.mxu1 %vm167_vm1, %v151_v14 }
  0x6d   :  { %2285 = vmatpush.bf16.msra.mxu3 %v5272_v59  ;;  %v5191_v59 = vld [vmem:[#allocation7 + $0x410] sm:$0xf] }
  0x71   :  { %2286 = vmatpush.bf16.msra.mxu3 %v5252_v9  ;;  %v5171_v9 = vld [vmem:[#allocation7 + $0x3e8] sm:$0xf] }
  0x78   :  { %4668 = vmatmul.msk.bf16.vlgmr.msrb.gmra.mxu3 %vm167_vm1, %v151_v14  ;;  %v4792_v14 = vor.u32 %v6638_v11, %v4791_v10  ;;  %v6733_v10 = vld [vmem:[#allocation7 + $0x3f8] sm:$0xf0]  ;;  %v5012_v11 = vor.u32 %v6693_v8, %v5011_v6  ;;  %v4773_v6 = vld [vmem:[#allocation7 + $0xdc] sm:$0xf0]  ;;  %vm2226_vm1 = vcmask 719872  }
  0x7a   :  { %2246 = vmatpush.bf16.msra.mxu0 %v4792_v14  ;;  %v6618_v14 = vld [vmem:[#allocation7 + $0x60] sm:$0xf0] }
  0xa7   :  { %v209_v18 = vpop.f32.mrf.mxu1  ;;  %v248_v19 = vpop.f32.mrf.mxu0 }
  0xa8   :  { %v358_v27 = vrot.slane %v209_v18, 7  ;;  %v361_v30 = vrot.slane %v248_v19, 4  ;;  %v6708_v18 = vld [vmem:[#allocation7 + $0x330] sm:$0xf0] }
  0xab   :  { %v196_v20 = vpop.f32.mrf.mxu3  ;;  %v222_v21 = vpop.f32.mrf.mxu2 }
  0xac   :  { %v359_v29 = vrot.slane %v222_v21, 6  ;;  %v367_v34 = vsel %vm366_vm3, %v196_v20, %v358_v27  ;;  %v4912_v21 = vor.u32 %v6668_v15, %v4911_v12  ;;  %v5172_v12 = vor.u32 %v6733_v10, %v5171_v9  ;;  %v4831_v15 = vld [vmem:[#allocation7 + $0x140] sm:$0xf] }
  0xad   :  { %v4776_v9 = vor.u32 %v6631_v5, %v4773_v6  ;;  %v4933_v10 = vld [vmem:[#allocation7 + $0x21c] sm:$0xf0]  ;;  %v6611_v5 = vld [vmem:[#allocation7 + $0x2c] sm:$0xf] }
  0xae   :  { %v369_v45 = vsel %vm368_vm4, %v367_v34, %v359_v29  ;;  %2261 = vmatpush.bf16.msrb.mxu1 %v4912_v21  ;;  %v153_v34 = vld [vmem:[#allocation2 + $0x5] sm:$0x1f]  ;;  %v4991_v21 = vld [vmem:[#allocation7 + $0x280] sm:$0xf] }
  0xaf   :  { %v211_v22 = vpop.f32.mrf.mxu1  ;;  %v250_v23 = vpop.f32.mrf.mxu0 }
  0xb0   :  { %v5072_v22 = vor.u32 %v6708_v18, %v5071_v17  ;;  %v5231_v23 = vld [vmem:[#allocation7 + $0x460] sm:$0xf] }
  0xb2   :  { %2274 = vmatpush.bf16.msrb.mxu2 %v5072_v22  ;;  %2262 = vmatpush.bf16.msrb.mxu1 %v4892_v42  ;;  %v6688_v22 = vld [vmem:[#allocation7 + $0x290] sm:$0xf0] }
  0xb3   :  { %v198_v24 = vpop.f32.mrf.mxu3  ;;  %v224_v25 = vpop.f32.mrf.mxu2 }
  0xb4   :  { %v6748_v24 = vld [vmem:[#allocation7 + $0x470] sm:$0xf0] }
  0xb5   :  { %v5232_v29 = vor.u32 %v6748_v24, %v5231_v23 }
  0xb7   :  { %v7235_v26 = vpop.f32.mrf.mxu1  ;;  %v7237_v28 = vpop.f32.mrf.mxu0  ;;  %2287 = vmatpush.bf16.msra.mxu3 %v5232_v29  ;;  %v6728_v29 = vld [vmem:[#allocation7 + $0x3d0] sm:$0xf0] }
  0xb8   :  { %v364_v25 = vrot.slane %v7237_v28, 5  ;;  %v6703_v28 = vld [vmem:[#allocation7 + $0x308] sm:$0xf0] }
  0xb9   :  { %v5052_v43 = vor.u32 %v6703_v28, %v5051_v39 }
  0xbb   :  { %v235_v35 = vpop.f32.mrf.mxu3  ;;  %v7240_v36 = vpop.f32.mrf.mxu2  ;;  %2275 = vmatpush.bf16.msrb.mxu2 %v5052_v43 }
  0xbc   :  { %v360_v41 = vrot.slane %v235_v35, 5  ;;  %v362_v19 = vrot.slane %v7240_v36, 7 }
  0xbe   :  { %v371_v46 = vsel %vm370_vm5, %v360_v41, %v361_v30  ;;  %v4771_v30 = vld [vmem:[#allocation7 + $0xc8] sm:$0xf]  ;;  %v374_v33 = vsel %vm366_vm3, %v7235_v26, %v362_v19  ;;  %v4751_v26 = vld [vmem:[#allocation7 + $0xa0] sm:$0xf]  ;;  %v6648_v19 = vld [vmem:[#allocation7 + $0x150] sm:$0xf0] }
  0xbf   :  { %v294_v47 = vpop.f32.mrf.mxu1  ;;  %v373_v51 = vsel %vm372_vm6, %v369_v45, %v371_v46  ;;  %v333_v52 = vpop.f32.mrf.mxu0  ;;  %v4772_v37 = vor.u32 %v6633_v31, %v4771_v30  ;;  %v6743_v45 = vld [vmem:[#allocation7 + $0x448] sm:$0xf0]  ;;  %2276 = vmatpush.bf16.msrb.mxu2 %v5032_v58  ;;  %v4832_v24 = vor.u32 %v6648_v19, %v4831_v15  ;;  %v6641_v31 = vld [vmem:[#allocation7 + $0x11c] sm:$0xf] }
  0xc0   :  { %v380_v56 = vadd.f32 %v373_v51, %v152_v44  ;;  %v5211_v44 = vld [vmem:[#allocation7 + $0x438] sm:$0xf]  ;;  %v6628_v47 = vld [vmem:[#allocation7 + $0xb0] sm:$0xf0]  ;;  %v6658_v52 = vld [vmem:[#allocation7 + $0x1a0] sm:$0xf0] }
  0xc1   :  { %2247 = vmatpush.bf16.msra.mxu0 %v4772_v37  ;;  %v5212_v46 = vor.u32 %v6743_v45, %v5211_v44  ;;  %v4752_v51 = vor.u32 %v6628_v47, %v4751_v26  ;;  %v4872_v57 = vor.u32 %v6658_v52, %v4871_v48  ;;  %v6721_v37 = vld [vmem:[#allocation7 + $0x39c] sm:$0xf]  ;;  %v4793_v26 = vld [vmem:[#allocation7 + $0x104] sm:$0xf0]  ;;  %v694_v47 = vpop.permute.xlu0 %693 }
  0xc2   :  { %386 = vst.msk [vmem:[#allocation2] sm:$0x1f] %vm7223_vm2, %v380_v56  ;;  %v6613_v45 = vld [vmem:[#allocation7 + $0x38] sm:$0xf0]  ;;  %v4953_v52 = vld [vmem:[#allocation7 + $0x244] sm:$0xf0] }
  0xc3   :  { %v237_v62 = vpop.f32.mrf.mxu3  ;;  %v307_v63 = vpop.f32.mrf.mxu2  ;;  %2288 = vmatpush.bf16.msra.mxu3 %v5212_v46  ;;  %2263 = vmatpush.bf16.msrb.mxu1 %v4872_v57  ;;  %v6636_v46 = vld [vmem:[#allocation7 + $0xf4] sm:$0xf]  ;;  %v7263_v53 = vperm.slane %v694_v47, 0  ;;  %v7265_v57 = vld [vmem:[#allocation7 + $0x5c8] sm:$0xff] }
  0xc4   :  { %v5192_v62 = vor.u32 %v6738_v60, %v5191_v59  ;;  %v4731_v63 = vld [vmem:[#allocation7 + $0x78] sm:$0xf]  ;;  %2277 = vmatpush.bf16.msrb.mxu2 %v5012_v11  ;;  %v6711_v11 = vld [vmem:[#allocation7 + $0x34c] sm:$0xf] }
  0xc5   :  { %2248 = vmatpush.bf16.msra.mxu0 %v4752_v51  ;;  %v4732_v3 = vor.u32 %v6623_v0, %v4731_v63  ;;  %v6676_v51 = vld [vmem:[#allocation7 + $0x234] sm:$0xf]  ;;  %v388_v59 = vld [vmem:[#allocation3] sm:$0x1f]  ;;  %v4671_v63 = vld [vmem:[#allocation7] sm:$0xf]  ;;  %6875 = vrcp.f32 %v7263_v53  ;;  %vm704_vm7 = vweird.f32 %v7263_v53 }
  0xc6   :  { %v4956_v54 = vor.u32 %v6676_v51, %v4953_v52  ;;  %v6608_v0 = vld [vmem:[#allocation7 + $0x10] sm:$0xf0]  ;;  %v5351_v51 = vld [vmem:[#allocation7 + $0x550] sm:$0xf]  ;;  %v6778_v52 = vld [vmem:[#allocation7 + $0x560] sm:$0xf0] }
  0xc7   :  { %v344_v13 = vpop.f32.mrf.mxu1  ;;  %v7248_v20 = vpop.f32.mrf.mxu0  ;;  %2289 = vmatpush.bf16.msra.mxu3 %v5192_v62  ;;  %2264 = vmatpush.bf16.msrb.mxu1 %v4852_v7  ;;  %v4672_v4 = vor.u32 %v6608_v0, %v4671_v63  ;;  %v6671_v7 = vld [vmem:[#allocation7 + $0x20c] sm:$0xf]  ;;  %v5033_v63 = vld [vmem:[#allocation7 + $0x2e4] sm:$0xf0] }
  0xc8   :  { %v365_v27 = vrot.slane %v344_v13, 4  ;;  %v4711_v13 = vld [vmem:[#allocation7 + $0x50] sm:$0xf]  ;;  %v593_v38 = vrot.slane %v7248_v20, 6  ;;  %v4796_v20 = vor.u32 %v6636_v46, %v4793_v26 }
  0xc9   :  { %2249 = vmatpush.bf16.msra.mxu0 %v4732_v3  ;;  %v4712_v18 = vor.u32 %v6618_v14, %v4711_v13  ;;  %v4936_v14 = vor.u32 %v6671_v7, %v4933_v10 }
  0xca   :  { %v376_v40 = vsel %vm370_vm5, %v364_v25, %v365_v27  ;;  %v4992_v25 = vor.u32 %v6688_v22, %v4991_v21  ;;  %v5151_v27 = vld [vmem:[#allocation7 + $0x3c0] sm:$0xf] }
  0xcb   :  { %v318_v35 = vpop.f32.mrf.mxu3  ;;  %v7253_v36 = vpop.f32.mrf.mxu2  ;;  %2290 = vmatpush.bf16.msra.mxu3 %v5172_v12  ;;  %v5152_v30 = vor.u32 %v6728_v29, %v5151_v27  ;;  %2265 = vmatpush.bf16.msrb.mxu1 %v4832_v24  ;;  %v5093_v12 = vld [vmem:[#allocation7 + $0x35c] sm:$0xf0]  ;;  %v6788_v24 = vld [vmem:[#allocation7 + $0x5b0] sm:$0xf0]  ;;  %v6626_v27 = vld [vmem:[#allocation7 + $0xa4] sm:$0xf] }
  0xcc   :  { %v363_v41 = vrot.slane %v318_v35, 6  ;;  %v4973_v35 = vld [vmem:[#allocation7 + $0x26c] sm:$0xf0]  ;;  %2278 = vmatpush.bf16.msrb.mxu2 %v4992_v25  ;;  %v5096_v15 = vor.u32 %v6711_v11, %v5093_v12  ;;  %v5391_v22 = vld [vmem:[#allocation7 + $0x5a0] sm:$0xf]  ;;  %v7280_v46 = vpop.eup %6875 }
  0xcd   :  { %2250 = vmatpush.bf16.msra.mxu0 %v4712_v18  ;;  %v5392_v25 = vor.u32 %v6788_v24, %v5391_v22  ;;  %v4753_v29 = vld [vmem:[#allocation7 + $0xb4] sm:$0xf0]  ;;  %v6691_v11 = vld [vmem:[#allocation7 + $0x2ac] sm:$0xf]  ;;  %v5013_v12 = vld [vmem:[#allocation7 + $0x2bc] sm:$0xf0]  ;;  %vm705_vm8 = vweird.f32 %v7280_v46 }
  0xce   :  { %v375_v49 = vsel %vm368_vm4, %v374_v33, %v363_v41  ;;  %v4816_v33 = vor.u32 %v6641_v31, %v4813_v32  ;;  %v4691_v41 = vld [vmem:[#allocation7 + $0x28] sm:$0xf]  ;;  %v4756_v31 = vor.u32 %v6626_v27, %v4753_v29  ;;  %v4913_v32 = vld [vmem:[#allocation7 + $0x1f4] sm:$0xf0]  ;;  %v6606_v22 = vld [vmem:[#allocation7 + $0x4] sm:$0xf]  ;;  %v5016_v24 = vor.u32 %v6691_v11, %v5013_v12 }
  0xcf   :  { %v346_v50 = vpop.f32.mrf.mxu1  ;;  %v377_v55 = vsel %vm372_vm6, %v375_v49, %v376_v40  ;;  %v458_v56 = vpop.f32.mrf.mxu0  ;;  %v5133_v40 = vld [vmem:[#allocation7 + $0x3ac] sm:$0xf0]  ;;  %2291 = vmatpush.bf16.msra.mxu3 %v5152_v30  ;;  %v6666_v30 = vld [vmem:[#allocation7 + $0x1e4] sm:$0xf]  ;;  %v4833_v29 = vld [vmem:[#allocation7 + $0x154] sm:$0xf0] }
  0xd0   :  { %v381_v61 = vadd.f32 %v377_v55, %v153_v34  ;;  %v6681_v34 = vld [vmem:[#allocation7 + $0x25c] sm:$0xf]  ;;  %v5136_v44 = vor.u32 %v6721_v37, %v5133_v40  ;;  %2310 = vmatpush.bf16.msra.mxu1 %v4816_v33  ;;  %v4692_v50 = vor.u32 %v6613_v45, %v4691_v41  ;;  %v6716_v55 = vld [vmem:[#allocation7 + $0x374] sm:$0xf]  ;;  %v5113_v56 = vld [vmem:[#allocation7 + $0x384] sm:$0xf0]  ;;  %v4916_v37 = vor.u32 %v6666_v30, %v4913_v32 }
  0xd1   :  { %v4976_v28 = vor.u32 %v6681_v34, %v4973_v35  ;;  %v5116_v62 = vor.u32 %v6716_v55, %v5113_v56  ;;  %v6706_v33 = vld [vmem:[#allocation7 + $0x324] sm:$0xf]  ;;  %v5073_v34 = vld [vmem:[#allocation7 + $0x334] sm:$0xf0]  ;;  %v6621_v40 = vld [vmem:[#allocation7 + $0x7c] sm:$0xf] }
  0xd2   :  { %387 = vst.msk [vmem:[#allocation2 + $0x5] sm:$0x1f] %vm7223_vm2, %v381_v61  ;;  %2251 = vmatpush.bf16.msra.mxu0 %v4692_v50  ;;  %v6661_v45 = vld [vmem:[#allocation7 + $0x1bc] sm:$0xf]  ;;  %v6656_v55 = vld [vmem:[#allocation7 + $0x194] sm:$0xf]  ;;  %vm706_vm9 = vmor %vm704_vm7, %vm705_vm8 }
  0xd3   :  { %v320_v1 = vpop.f32.mrf.mxu3  ;;  %v432_v2 = vpop.f32.mrf.mxu2  ;;  %2323 = vmatpush.bf16.msra.mxu2 %v4976_v28  ;;  %2336 = vmatpush.bf16.msrb.mxu3 %v5136_v44  ;;  %v6783_v28 = vld [vmem:[#allocation7 + $0x588] sm:$0xf0]  ;;  %v4733_v44 = vld [vmem:[#allocation7 + $0x8c] sm:$0xf0]  ;;  %v4873_v56 = vld [vmem:[#allocation7 + $0x1a4] sm:$0xf0] }
  0xd4   :  { %v1846_v1 = vunpack.c.l.b16 %v7265_v57  ;;  %2311 = vmatpush.bf16.msra.mxu1 %v4796_v20  ;;  %v4736_v26 = vor.u32 %v6621_v40, %v4733_v44  ;;  %v6646_v27 = vld [vmem:[#allocation7 + $0x144] sm:$0xf] }
  0xd5   :  { %v6686_v30 = vld [vmem:[#allocation7 + $0x284] sm:$0xf] }
  0xd6   :  { %2252 = vmatpush.bf16.msra.mxu0 %v4672_v4  ;;  %v6773_v4 = vld [vmem:[#allocation7 + $0x538] sm:$0xf0] }
  0xd7   :  { %v469_v17 = vpop.f32.mrf.mxu1  ;;  %v7260_v23 = vpop.f32.mrf.mxu0  ;;  %2324 = vmatpush.bf16.msra.mxu2 %v4956_v54  ;;  %2337 = vmatpush.bf16.msrb.mxu3 %v5116_v62  ;;  %v6616_v54 = vld [vmem:[#allocation7 + $0x54] sm:$0xf] }
  0xd8   :  { %v594_v39 = vrot.slane %v469_v17, 5  ;;  %v7273_v17 = vperm.slane %v694_v47, 1  ;;  %2312 = vmatpush.bf16.msra.mxu1 %v4776_v9  ;;  %v596_v41 = vrot.slane %v7260_v23, 7  ;;  %v4893_v47 = vld [vmem:[#allocation7 + $0x1cc] sm:$0xf0] }
  0xd9   :  { %v4896_v50 = vor.u32 %v6661_v45, %v4893_v47  ;;  %v4713_v23 = vld [vmem:[#allocation7 + $0x64] sm:$0xf0]  ;;  %v6696_v62 = vld [vmem:[#allocation7 + $0x2d4] sm:$0xf]  ;;  %v4853_v9 = vld [vmem:[#allocation7 + $0x17c] sm:$0xf0] }
  0xda   :  { %6877 = vrcp.f32 %v7273_v17  ;;  %v5036_v7 = vor.u32 %v6696_v62, %v5033_v63  ;;  %vm719_vm11 = vweird.f32 %v7273_v17 }
  0xdb   :  { %v443_v42 = vpop.f32.mrf.mxu3  ;;  %v482_v43 = vpop.f32.mrf.mxu2  ;;  %2325 = vmatpush.bf16.msra.mxu2 %v4936_v14  ;;  %2338 = vmatpush.bf16.msrb.mxu3 %v5096_v15 }
  0xdc   :  { %v592_v48 = vrot.slane %v443_v42, 7  ;;  %v595_v49 = vrot.slane %v482_v43, 4  ;;  %2313 = vmatpush.bf16.msra.mxu1 %v4756_v31  ;;  %v4993_v31 = vld [vmem:[#allocation7 + $0x294] sm:$0xf0] }
  0xde   :  { %v600_v58 = vsel %vm366_vm3, %v7253_v36, %v592_v48  ;;  %v602_v60 = vsel %vm370_vm5, %v594_v39, %v595_v49  ;;  %v2036_v36 = vpack.c.b16 %v1846_v1, %v1846_v1  ;;  %v5371_v39 = vld [vmem:[#allocation7 + $0x578] sm:$0xf]  ;;  %v6701_v48 = vld [vmem:[#allocation7 + $0x2fc] sm:$0xf]  ;;  %v5053_v49 = vld [vmem:[#allocation7 + $0x30c] sm:$0xf0]  ;;  %v4716_v1 = vor.u32 %v6616_v54, %v4713_v23 }
  0xdf   :  { %v471_v61 = vpop.f32.mrf.mxu1  ;;  %v601_v2 = vsel %vm368_vm4, %v600_v58, %v593_v38  ;;  %v541_v3 = vpop.f32.mrf.mxu0  ;;  %v5076_v38 = vor.u32 %v6706_v33, %v5073_v34  ;;  %v5372_v43 = vor.u32 %v6783_v28, %v5371_v39  ;;  %2326 = vmatpush.bf16.msra.mxu2 %v4916_v37  ;;  %v5056_v20 = vor.u32 %v6701_v48, %v5053_v49 }
  0xe0   :  { %v603_v8 = vsel %vm372_vm6, %v601_v2, %v602_v60  ;;  %v2231_v18 = vsel %vm171_vm0, %v2036_v36, 0  ;;  %v700_v58 = vmul.f32 %v7280_v46, %v7263_v53  ;;  %v5352_v61 = vor.u32 %v6778_v52, %v5351_v51  ;;  %2314 = vmatpush.bf16.msra.mxu1 %v4736_v26  ;;  %v5331_v3 = vld [vmem:[#allocation7 + $0x528] sm:$0xf]  ;;  %v6651_v36 = vld [vmem:[#allocation7 + $0x16c] sm:$0xf]  ;;  %v6878_v32 = vpop.eup %6877 }
  0xe1   :  { %v610_v13 = vadd.f32 %v603_v8, %v388_v59  ;;  %2299 = vmatpush.bf16.msrb.mxu0 %v2231_v18  ;;  %2339 = vmatpush.bf16.msrb.mxu3 %v5076_v38  ;;  %v4876_v2 = vor.u32 %v6656_v55, %v4873_v56  ;;  %v4693_v8 = vld [vmem:[#allocation7 + $0x3c] sm:$0xf0]  ;;  %v5332_v14 = vor.u32 %v6773_v4, %v5331_v3  ;;  %vm720_vm12 = vweird.f32 %v6878_v32 }
  0xe2   :  { %v4696_v15 = vor.u32 %v6611_v5, %v4693_v8  ;;  %v4856_v18 = vor.u32 %v6651_v36, %v4853_v9  ;;  %v4836_v38 = vor.u32 %v6646_v27, %v4833_v29  ;;  %v4996_v28 = vor.u32 %v6686_v30, %v4993_v31  ;;  %vm721_vm13 = vmor %vm719_vm11, %vm720_vm12  ;;  %v5293_v27 = vld [vmem:[#allocation7 + $0x4ec] sm:$0xf0]  ;;  %v4819_v31 = vld [vmem:[#allocation7 + $0x120] sm:$0xf] }
  0xe3   :  { %612 = vst.msk [vmem:[#allocation3] sm:$0x1f] %vm7223_vm2, %v610_v13  ;;  %v445_v19 = vpop.f32.mrf.mxu3  ;;  %v484_v21 = vpop.f32.mrf.mxu2  ;;  %2327 = vmatpush.bf16.msra.mxu2 %v4896_v50  ;;  %v701_v13 = vsub.f32 1.0, %v700_v58  ;;  %v715_v40 = vmul.f32 %v6878_v32, %v7273_v17  ;;  %v389_v50 = vld [vmem:[#allocation3 + $0x5] sm:$0x1f]  ;;  %v725_v55 = vand.u32 2147483648, %v7273_v17  ;;  %v1847_v4 = vunpack.c.h.b16 %v7265_v57 }
  0xe4   :  { %2315 = vmatpush.bf16.msra.mxu1 %v4716_v1  ;;  %v5311_v19 = vld [vmem:[#allocation7 + $0x500] sm:$0xf]  ;;  %v6768_v21 = vld [vmem:[#allocation7 + $0x510] sm:$0xf0]  ;;  %v723_v58 = vand.u32 2147483647, %v7273_v17 }
  0xe5   :  { %2300 = vmatpush.bf16.msrb.mxu0 %v5392_v25  ;;  %2340 = vmatpush.bf16.msrb.mxu3 %v5056_v20  ;;  %v4673_v25 = vld [vmem:[#allocation7 + $0x14] sm:$0xf0]  ;;  %v702_v39 = vmul.f32 %v7280_v46, %v701_v13  ;;  %v716_v44 = vsub.f32 1.0, %v715_v40  ;;  %v4979_v40 = vld [vmem:[#allocation7 + $0x260] sm:$0xf] }
  0xe6   :  { %v4676_v37 = vor.u32 %v6606_v22, %v4673_v25  ;;  %vm724_vm14 = vcmp.eq.f32.partialorder %v723_v58, 8.507059e+37  ;;  %v6761_v25 = vld [vmem:[#allocation7 + $0x4dc] sm:$0xf]  ;;  %v4959_v58 = vld [vmem:[#allocation7 + $0x238] sm:$0xf] }
  0xe7   :  { %v552_v35 = vpop.f32.mrf.mxu1  ;;  %2328 = vmatpush.bf16.msra.mxu2 %v4876_v2  ;;  %v717_v20 = vmul.f32 %v6878_v32, %v716_v44 }
  0xe8   :  { %v597_v42 = vrot.slane %v552_v35, 6  ;;  %v5312_v35 = vor.u32 %v6768_v21, %v5311_v19  ;;  %2316 = vmatpush.bf16.msra.mxu1 %v4696_v15 }
  0xe9   :  { %2301 = vmatpush.bf16.msrb.mxu0 %v5372_v43  ;;  %2341 = vmatpush.bf16.msrb.mxu3 %v5036_v7  ;;  %v708_v43 = vand.u32 2147483647, %v7263_v53  ;;  %v718_v56 = vadd.f32 %v6878_v32, %v717_v20  ;;  %v5273_v20 = vld [vmem:[#allocation7 + $0x4c4] sm:$0xf0] }
  0xea   :  { %v690_v23 = vld [vmem:[#allocation3] sm:$0x1f] }
  0xeb   :  { %v526_v59 = vpop.f32.mrf.mxu3  ;;  %v7284_v60 = vpop.f32.mrf.mxu2  ;;  %2329 = vmatpush.bf16.msra.mxu2 %v4856_v18  ;;  %vm709_vm10 = vcmp.eq.f32.partialorder %v708_v43, 8.507059e+37  ;;  %v2037_v18 = vpack.c.b16 %v1847_v4, %v1847_v4 }
  0xec   :  { %v604_v0 = vsel %vm366_vm3, %v526_v59, %v596_v41  ;;  %v710_v41 = vand.u32 2147483648, %v7263_v53  ;;  %2317 = vmatpush.bf16.msra.mxu1 %v4676_v37  ;;  %v598_v45 = vrot.slane %v7284_v60, 5  ;;  %v726_v60 = vor.u32 1.1754944e-38, %v725_v55 }
  0xed   :  { %v605_v6 = vsel %vm368_vm4, %v604_v0, %v597_v42  ;;  %2302 = vmatpush.bf16.msrb.mxu0 %v5352_v61  ;;  %2342 = vmatpush.bf16.msrb.mxu3 %v5016_v24  ;;  %v703_v42 = vadd.f32 %v7280_v46, %v702_v39  ;;  %v722_v61 = vsel %vm721_vm13, %v6878_v32, %v718_v56  ;;  %v6639_v56 = vld [vmem:[#allocation7 + $0x108] sm:$0xf0] }
  0xee   :  { %v711_v47 = vor.u32 1.1754944e-38, %v710_v41  ;;  %v727_v63 = vsel %vm724_vm14, %v726_v60, %v722_v61  ;;  %v5296_v39 = vor.u32 %v6761_v25, %v5293_v27  ;;  %v6684_v41 = vld [vmem:[#allocation7 + $0x270] sm:$0xf0] }
  0xef   :  { %v554_v10 = vpop.f32.mrf.mxu1  ;;  %2330 = vmatpush.bf16.msra.mxu2 %v4836_v38  ;;  %v707_v49 = vsel %vm706_vm9, %v7280_v46, %v703_v42  ;;  %v6644_v38 = vld [vmem:[#allocation7 + $0x130] sm:$0xf0] }
  0xf0   :  { %v712_v54 = vsel %vm709_vm10, %v711_v47, %v707_v49 }
  0xf1   :  { %2303 = vmatpush.bf16.msrb.mxu0 %v5332_v14  ;;  %2343 = vmatpush.bf16.msrb.mxu3 %v4996_v28  ;;  %v7305_v59 = vmul.f32 %v712_v54, %v690_v23  ;;  %v2234_v28 = vsel %vm171_vm0, %v2037_v18, 0  ;;  %v6786_v54 = vld [vmem:[#allocation7 + $0x5a4] sm:$0xf]  ;;  %v4799_v23 = vld [vmem:[#allocation7 + $0xf8] sm:$0xf] }
  0xf3   :  { %v528_v33 = vpop.f32.mrf.mxu3  ;;  %v567_v34 = vpop.f32.mrf.mxu2  ;;  %v731_v62 = vperm.slane %v7305_v59, 0  ;;  %v732_v1 = vperm.slane %v7305_v59, 1  ;;  %v733_v2 = vperm.slane %v7305_v59, 2  ;;  %v734_v17 = vperm.slane %v7305_v59, 3 }
  0xf4   :  { %v735_v60 = vperm.slane %v7305_v59, 4 }
  0xf5   :  { %2304 = vmatpush.bf16.msrb.mxu0 %v5312_v35  ;;  %v751_v16 = vpack.c.bf16 %v731_v62, %v731_v62  ;;  %v752_v36 = vpack.c.bf16 %v732_v1, %v732_v1  ;;  %v753_v9 = vpack.c.bf16 %v733_v2, %v733_v2  ;;  %v754_v10 = vpack.c.bf16 %v734_v17, %v734_v17  ;;  %v6781_v17 = vld [vmem:[#allocation7 + $0x57c] sm:$0xf] }
  0xf6   :  { %v4800_v1 = vor.u32 %v6639_v56, %v4799_v23  ;;  %v5299_v23 = vld [vmem:[#allocation7 + $0x4e0] sm:$0xf] }
  0xf7   :  { %v1221_v15 = vunpack.c.l.b16 %v751_v16  ;;  %v1222_v57 = vunpack.c.l.b16 %v752_v36  ;;  %v1223_v29 = vunpack.c.l.b16 %v753_v9  ;;  %v1224_v30 = vunpack.c.l.b16 %v754_v10  ;;  %v4779_v16 = vld [vmem:[#allocation7 + $0xd0] sm:$0xf]  ;;  %v6746_v9 = vld [vmem:[#allocation7 + $0x464] sm:$0xf]  ;;  %v5233_v10 = vld [vmem:[#allocation7 + $0x474] sm:$0xf0] }
  0xf8   :  { %v5236_v25 = vor.u32 %v6746_v9, %v5233_v10  ;;  %v4679_v9 = vld [vmem:[#allocation7 + $0x8] sm:$0xf]  ;;  %v6609_v10 = vld [vmem:[#allocation7 + $0x18] sm:$0xf0] }
  0xfb   :  { %v578_v26 = vpop.f32.mrf.mxu3 }
  0xfc   :  { %v599_v48 = vrot.slane %v578_v26, 4 }
  0xfe   :  { %v606_v51 = vsel %vm370_vm5, %v598_v45, %v599_v48 }
  0xff   :  { %v607_v52 = vsel %vm372_vm6, %v605_v6, %v606_v51  ;;  %v4820_v51 = vor.u32 %v6644_v38, %v4819_v31  ;;  %v4899_v38 = vld [vmem:[#allocation7 + $0x1c0] sm:$0xf] }
 0x100   :  { %v611_v53 = vadd.f32 %v607_v52, %v389_v50  ;;  %v6756_v50 = vld [vmem:[#allocation7 + $0x4b4] sm:$0xf]  ;;  %v4980_v52 = vor.u32 %v6684_v41, %v4979_v40 }
 0x101   :  { %v5276_v61 = vor.u32 %v6756_v50, %v5273_v20  ;;  %v6766_v50 = vld [vmem:[#allocation7 + $0x504] sm:$0xf]  ;;  %v5313_v20 = vld [vmem:[#allocation7 + $0x514] sm:$0xf0] }
 0x102   :  { %613 = vst.msk [vmem:[#allocation3 + $0x5] sm:$0x1f] %vm7223_vm2, %v611_v53  ;;  %v5393_v53 = vld [vmem:[#allocation7 + $0x5b4] sm:$0xf0] }
 0x103   :  { %v580_v46 = vpop.f32.mrf.mxu3  ;;  %v5396_v62 = vor.u32 %v6786_v54, %v5393_v53  ;;  %v4879_v54 = vld [vmem:[#allocation7 + $0x198] sm:$0xf]  ;;  %v6659_v53 = vld [vmem:[#allocation7 + $0x1a8] sm:$0xf0] }
 0x104   :  { %v6679_v46 = vld [vmem:[#allocation7 + $0x248] sm:$0xf0] }
 0x105   :  { %v4960_v2 = vor.u32 %v6679_v46, %v4959_v58  ;;  %v5316_v58 = vor.u32 %v6766_v50, %v5313_v20  ;;  %v6731_v46 = vld [vmem:[#allocation7 + $0x3ec] sm:$0xf] }
 0x109   :  { %v691_v0 = vld [vmem:[#allocation3 + $0x5] sm:$0x1f] }
 0x10a   :  { %v728_v3 = vmul.f32 %v727_v63, %v691_v0  ;;  %v6751_v63 = vld [vmem:[#allocation7 + $0x48c] sm:$0xf]  ;;  %v5253_v0 = vld [vmem:[#allocation7 + $0x49c] sm:$0xf0] }
 0x10b   :  { %v5256_v59 = vor.u32 %v6751_v63, %v5253_v0  ;;  %v4699_v63 = vld [vmem:[#allocation7 + $0x30] sm:$0xf] }
 0x10c   :  { %v736_v5 = vperm.slane %v728_v3, 0  ;;  %v737_v6 = vperm.slane %v728_v3, 1  ;;  %v738_v7 = vperm.slane %v728_v3, 2  ;;  %v739_v8 = vperm.slane %v728_v3, 3  ;;  %v7338_v0 = vld [vmem:[#allocation7 + $0x5d0] sm:$0xff] }
 0x10d   :  { %v740_v32 = vperm.slane %v728_v3, 4  ;;  %v5373_v3 = vld [vmem:[#allocation7 + $0x58c] sm:$0xf0] }
 0x10e   :  { %v756_v11 = vpack.c.bf16 %v736_v5, %v736_v5  ;;  %v757_v12 = vpack.c.bf16 %v737_v6, %v737_v6  ;;  %v758_v13 = vpack.c.bf16 %v738_v7, %v738_v7  ;;  %v759_v14 = vpack.c.bf16 %v739_v8, %v739_v8  ;;  %v6634_v5 = vld [vmem:[#allocation7 + $0xe0] sm:$0xf0]  ;;  %v4939_v6 = vld [vmem:[#allocation7 + $0x210] sm:$0xf] }
 0x10f   :  { %v760_v55 = vpack.c.bf16 %v740_v32, %v740_v32  ;;  %v6674_v7 = vld [vmem:[#allocation7 + $0x220] sm:$0xf0]  ;;  %v755_v8 = vpack.c.bf16 %v735_v60, %v735_v60  ;;  %v5376_v36 = vor.u32 %v6781_v17, %v5373_v3  ;;  %v4859_v17 = vld [vmem:[#allocation7 + $0x170] sm:$0xf] }
 0x110   :  { %v1226_v19 = vunpack.c.l.b16 %v756_v11  ;;  %v1227_v21 = vunpack.c.l.b16 %v757_v12  ;;  %v1228_v22 = vunpack.c.l.b16 %v758_v13  ;;  %v1229_v24 = vunpack.c.l.b16 %v759_v14  ;;  %v6776_v11 = vld [vmem:[#allocation7 + $0x554] sm:$0xf]  ;;  %v5353_v14 = vld [vmem:[#allocation7 + $0x564] sm:$0xf0]  ;;  %v6654_v3 = vld [vmem:[#allocation7 + $0x180] sm:$0xf0] }
 0x111   :  { %v1230_v4 = vunpack.c.l.b16 %v760_v55  ;;  %v4780_v12 = vor.u32 %v6634_v5, %v4779_v16  ;;  %v4940_v13 = vor.u32 %v6674_v7, %v4939_v6  ;;  %v5356_v27 = vor.u32 %v6776_v11, %v5353_v14  ;;  %v6764_v55 = vld [vmem:[#allocation7 + $0x4f0] sm:$0xf0]  ;;  %v5279_v16 = vld [vmem:[#allocation7 + $0x4b8] sm:$0xf]  ;;  %v6726_v6 = vld [vmem:[#allocation7 + $0x3c4] sm:$0xf] }
 0x112   :  { %v1231_v33 = vrot.slane %v1226_v19, 7  ;;  %v1234_v34 = vrot.slane %v1227_v21, 7  ;;  %v1236_v35 = vrot.slane %v1228_v22, 7  ;;  %v1238_v37 = vrot.slane %v1229_v24, 7  ;;  %v6629_v19 = vld [vmem:[#allocation7 + $0xb8] sm:$0xf0] }
 0x113   :  { %v1240_v18 = vrot.slane %v1230_v4, 7  ;;  %v4919_v21 = vld [vmem:[#allocation7 + $0x1e8] sm:$0xf]  ;;  %v6669_v22 = vld [vmem:[#allocation7 + $0x1f8] sm:$0xf0]  ;;  %v1225_v24 = vunpack.c.l.b16 %v755_v8  ;;  %v1848_v7 = vunpack.c.l.b16 %v7338_v0 }
 0x114   :  { %v1233_v42 = vsel %vm1232_vm15, %v1231_v33, %v1221_v15  ;;  %v1235_v43 = vsel %vm1232_vm15, %v1234_v34, %v1222_v57  ;;  %v1237_v44 = vsel %vm1232_vm15, %v1236_v35, %v1223_v29  ;;  %v1239_v45 = vsel %vm1232_vm15, %v1238_v37, %v1224_v30  ;;  %v4759_v15 = vld [vmem:[#allocation7 + $0xa8] sm:$0xf]  ;;  %v6741_v57 = vld [vmem:[#allocation7 + $0x43c] sm:$0xf]  ;;  %v5213_v29 = vld [vmem:[#allocation7 + $0x44c] sm:$0xf0] }
 0x115   :  { %v7317_v26 = vpack.c.b16 %v1233_v42, %v1233_v42  ;;  %v7319_v47 = vpack.c.b16 %v1235_v43, %v1235_v43  ;;  %v7321_v48 = vpack.c.b16 %v1237_v44, %v1237_v44  ;;  %v7323_v49 = vpack.c.b16 %v1239_v45, %v1239_v45  ;;  %v6771_v33 = vld [vmem:[#allocation7 + $0x52c] sm:$0xf]  ;;  %v5333_v34 = vld [vmem:[#allocation7 + $0x53c] sm:$0xf0]  ;;  %v6624_v37 = vld [vmem:[#allocation7 + $0x90] sm:$0xf0] }
 0x116   :  { %v4760_v30 = vor.u32 %v6629_v19, %v4759_v15  ;;  %v4920_v31 = vor.u32 %v6669_v22, %v4919_v21  ;;  %v1241_v32 = vsel %vm1232_vm15, %v1240_v18, %v1225_v24  ;;  %v4739_v35 = vld [vmem:[#allocation7 + $0x80] sm:$0xf]  ;;  %v5216_v40 = vor.u32 %v6741_v57, %v5213_v29  ;;  %v6736_v42 = vld [vmem:[#allocation7 + $0x414] sm:$0xf]  ;;  %v5193_v43 = vld [vmem:[#allocation7 + $0x424] sm:$0xf0] }
 0x117   :  { %2253 = vmatmul.bf16.vlgmr.msra.gmra.mxu0 %v7317_v26  ;;  %2266 = vmatmul.bf16.vlgmr.msrb.gmra.mxu1 %v7319_v47  ;;  %v5336_v41 = vor.u32 %v6771_v33, %v5333_v34  ;;  %v4740_v44 = vor.u32 %v6624_v37, %v4739_v35  ;;  %v5196_v56 = vor.u32 %v6736_v42, %v5193_v43  ;;  %v6759_v4 = vld [vmem:[#allocation7 + $0x4c8] sm:$0xf0]  ;;  %v5139_v14 = vld [vmem:[#allocation7 + $0x3a0] sm:$0xf]  ;;  %v6724_v15 = vld [vmem:[#allocation7 + $0x3b0] sm:$0xf0] }
 0x118   :  { %2279 = vmatmul.bf16.vlgmr.msrb.gmra.mxu2 %v7321_v48  ;;  %2292 = vmatmul.bf16.vlgmr.msra.gmra.mxu3 %v7323_v49  ;;  %v5280_v11 = vor.u32 %v6759_v4, %v5279_v16  ;;  %v5259_v18 = vld [vmem:[#allocation7 + $0x490] sm:$0xf]  ;;  %v6754_v19 = vld [vmem:[#allocation7 + $0x4a0] sm:$0xf0]  ;;  %v2038_v22 = vpack.c.b16 %v1848_v7, %v1848_v7  ;;  %v5140_v29 = vor.u32 %v6724_v15, %v5139_v14  ;;  %v5239_v33 = vld [vmem:[#allocation7 + $0x468] sm:$0xf] }
 0x119   :  { %2349 = vmatpush.bf16.msra.mxu0 %v5296_v39  ;;  %2364 = vmatpush.bf16.msrb.mxu1 %v2234_v28  ;;  %v6664_v39 = vld [vmem:[#allocation7 + $0x1d0] sm:$0xf0]  ;;  %v7331_v28 = vpack.c.b16 %v1241_v32, %v1241_v32  ;;  %v6642_v24 = vld [vmem:[#allocation7 + $0x124] sm:$0xf]  ;;  %v6719_v32 = vld [vmem:[#allocation7 + $0x388] sm:$0xf0] }
 0x11a   :  { %2375 = vmatpush.bf16.msrb.mxu2 %v4820_v51  ;;  %2388 = vmatpush.bf16.msra.mxu3 %v4980_v52  ;;  %v4900_v45 = vor.u32 %v6664_v39, %v4899_v38  ;;  %v4719_v51 = vld [vmem:[#allocation7 + $0x58] sm:$0xf]  ;;  %v6619_v52 = vld [vmem:[#allocation7 + $0x68] sm:$0xf0]  ;;  %v6749_v35 = vld [vmem:[#allocation7 + $0x478] sm:$0xf0] }
 0x11b   :  { %v4720_v60 = vor.u32 %v6619_v52, %v4719_v51  ;;  %v5399_v37 = vld [vmem:[#allocation7 + $0x5a8] sm:$0xf]  ;;  %v6789_v38 = vld [vmem:[#allocation7 + $0x5b8] sm:$0xf0]  ;;  %v2237_v39 = vsel %vm171_vm0, %v2038_v22, 0  ;;  %v5240_v43 = vor.u32 %v6749_v35, %v5239_v33 }
 0x11c   :  { %v5400_v50 = vor.u32 %v6789_v38, %v5399_v37  ;;  %v5219_v51 = vld [vmem:[#allocation7 + $0x440] sm:$0xf]  ;;  %v6744_v52 = vld [vmem:[#allocation7 + $0x450] sm:$0xf0]  ;;  %v6762_v33 = vld [vmem:[#allocation7 + $0x4e4] sm:$0xf] }
 0x11d   :  { %2350 = vmatpush.bf16.msra.mxu0 %v5276_v61  ;;  %2365 = vmatpush.bf16.msrb.mxu1 %v5396_v62  ;;  %v4880_v61 = vor.u32 %v6659_v53, %v4879_v54  ;;  %v5173_v62 = vld [vmem:[#allocation7 + $0x3fc] sm:$0xf0]  ;;  %v6784_v53 = vld [vmem:[#allocation7 + $0x590] sm:$0xf0] }
 0x11e   :  { %2376 = vmatpush.bf16.msrb.mxu2 %v4800_v1  ;;  %2389 = vmatpush.bf16.msra.mxu3 %v4960_v2  ;;  %v5300_v1 = vor.u32 %v6764_v55, %v5299_v23  ;;  %v6614_v2 = vld [vmem:[#allocation7 + $0x40] sm:$0xf0]  ;;  %v5176_v5 = vor.u32 %v6731_v46, %v5173_v62  ;;  %v5379_v54 = vld [vmem:[#allocation7 + $0x580] sm:$0xf]  ;;  %v6632_v23 = vld [vmem:[#allocation7 + $0xd4] sm:$0xf] }
 0x11f   :  { %v4700_v8 = vor.u32 %v6614_v2, %v4699_v63  ;;  %v4781_v55 = vld [vmem:[#allocation7 + $0xe4] sm:$0xf0]  ;;  %v5199_v63 = vld [vmem:[#allocation7 + $0x418] sm:$0xf]  ;;  %v4761_v16 = vld [vmem:[#allocation7 + $0xbc] sm:$0xf0] }
 0x120   :  { %v5079_v46 = vld [vmem:[#allocation7 + $0x328] sm:$0xf]  ;;  %v4784_v62 = vor.u32 %v6632_v23, %v4781_v55  ;;  %v5359_v2 = vld [vmem:[#allocation7 + $0x558] sm:$0xf]  ;;  %v6704_v7 = vld [vmem:[#allocation7 + $0x310] sm:$0xf0]  ;;  %v1849_v23 = vunpack.c.h.b16 %v7338_v0 }
 0x121   :  { %2351 = vmatpush.bf16.msra.mxu0 %v5256_v59  ;;  %2366 = vmatpush.bf16.msrb.mxu1 %v5376_v36  ;;  %v4860_v59 = vor.u32 %v6654_v3, %v4859_v17  ;;  %v5153_v36 = vld [vmem:[#allocation7 + $0x3d4] sm:$0xf0]  ;;  %v6779_v17 = vld [vmem:[#allocation7 + $0x568] sm:$0xf0] }
 0x122   :  { %2377 = vmatpush.bf16.msrb.mxu2 %v4780_v12  ;;  %2390 = vmatpush.bf16.msra.mxu3 %v4940_v13  ;;  %v4839_v12 = vld [vmem:[#allocation7 + $0x148] sm:$0xf]  ;;  %v6649_v13 = vld [vmem:[#allocation7 + $0x158] sm:$0xf0]  ;;  %v5156_v21 = vor.u32 %v6726_v6, %v5153_v36  ;;  %v6627_v3 = vld [vmem:[#allocation7 + $0xac] sm:$0xf] }
 0x123   :  { %v4840_v57 = vor.u32 %v6649_v13, %v4839_v12  ;;  %v5059_v6 = vld [vmem:[#allocation7 + $0x300] sm:$0xf]  ;;  %v5179_v36 = vld [vmem:[#allocation7 + $0x3f0] sm:$0xf]  ;;  %v6622_v12 = vld [vmem:[#allocation7 + $0x84] sm:$0xf] }
 0x124   :  { %v4741_v13 = vld [vmem:[#allocation7 + $0x94] sm:$0xf0]  ;;  %v5060_v14 = vor.u32 %v6704_v7, %v5059_v6 }
 0x125   :  { %2352 = vmatpush.bf16.msra.mxu0 %v5236_v25  ;;  %2367 = vmatpush.bf16.msrb.mxu1 %v5356_v27  ;;  %v4821_v25 = vld [vmem:[#allocation7 + $0x134] sm:$0xf0]  ;;  %v4680_v27 = vor.u32 %v6609_v10, %v4679_v9  ;;  %v6734_v9 = vld [vmem:[#allocation7 + $0x400] sm:$0xf0]  ;;  %v5339_v10 = vld [vmem:[#allocation7 + $0x530] sm:$0xf] }
 0x126   :  { %2378 = vmatpush.bf16.msrb.mxu2 %v4760_v30  ;;  %2391 = vmatpush.bf16.msra.mxu3 %v4920_v31  ;;  %v5260_v30 = vor.u32 %v6754_v19, %v5259_v18  ;;  %v5119_v31 = vld [vmem:[#allocation7 + $0x378] sm:$0xf]  ;;  %v4824_v34 = vor.u32 %v6642_v24, %v4821_v25  ;;  %v5180_v15 = vor.u32 %v6734_v9, %v5179_v36  ;;  %v6699_v19 = vld [vmem:[#allocation7 + $0x2e8] sm:$0xf0]  ;;  %v6729_v25 = vld [vmem:[#allocation7 + $0x3d8] sm:$0xf0] }
 0x127   :  { %5409 = vmatmul.msk.bf16.vlgmr.msrb.gmra.mxu0 %vm2226_vm1, %v7331_v28  ;;  %2318 = vmatmul.bf16.vlgmr.msra.gmra.mxu1 %v7317_v26  ;;  %v5120_v42 = vor.u32 %v6719_v32, %v5119_v31  ;;  %v5039_v18 = vld [vmem:[#allocation7 + $0x2d8] sm:$0xf]  ;;  %v4744_v24 = vor.u32 %v6622_v12, %v4741_v13  ;;  %v6722_v31 = vld [vmem:[#allocation7 + $0x3a4] sm:$0xf]  ;;  %v6707_v36 = vld [vmem:[#allocation7 + $0x32c] sm:$0xf] }
 0x128   :  { %2331 = vmatmul.bf16.vlgmr.msra.gmra.mxu2 %v7319_v47  ;;  %2344 = vmatmul.bf16.vlgmr.msrb.gmra.mxu3 %v7321_v48  ;;  %v5141_v32 = vld [vmem:[#allocation7 + $0x3b4] sm:$0xf0]  ;;  %v5040_v35 = vor.u32 %v6699_v19, %v5039_v18  ;;  %v5081_v9 = vld [vmem:[#allocation7 + $0x33c] sm:$0xf0]  ;;  %v6787_v13 = vld [vmem:[#allocation7 + $0x5ac] sm:$0xf] }
 0x129   :  { %2353 = vmatpush.bf16.msra.mxu0 %v5216_v40  ;;  %2368 = vmatpush.bf16.msrb.mxu1 %v5336_v41  ;;  %v6637_v40 = vld [vmem:[#allocation7 + $0xfc] sm:$0xf]  ;;  %v4801_v41 = vld [vmem:[#allocation7 + $0x10c] sm:$0xf0]  ;;  %v5084_v18 = vor.u32 %v6707_v36, %v5081_v9 }
 0x12a   :  { %2379 = vmatpush.bf16.msrb.mxu2 %v4740_v44  ;;  %2392 = vmatpush.bf16.msra.mxu3 %v4900_v45  ;;  %v5099_v44 = vld [vmem:[#allocation7 + $0x350] sm:$0xf]  ;;  %v6714_v45 = vld [vmem:[#allocation7 + $0x360] sm:$0xf0]  ;;  %v4804_v20 = vor.u32 %v6637_v40, %v4801_v41  ;;  %v6725_v9 = vld [vmem:[#allocation7 + $0x3b8] sm:$0xf0] }
 0x12b   :  { %v5019_v40 = vld [vmem:[#allocation7 + $0x2b0] sm:$0xf]  ;;  %v6694_v41 = vld [vmem:[#allocation7 + $0x2c0] sm:$0xf0] }
 0x12d   :  { %2354 = vmatpush.bf16.msra.mxu0 %v5196_v56  ;;  %2369 = vmatpush.bf16.msrb.mxu1 %v5316_v58  ;;  %v5100_v56 = vor.u32 %v6714_v45, %v5099_v44  ;;  %v5220_v58 = vor.u32 %v6744_v52, %v5219_v51  ;;  %v6612_v44 = vld [vmem:[#allocation7 + $0x34] sm:$0xf]  ;;  %v4701_v45 = vld [vmem:[#allocation7 + $0x44] sm:$0xf0]  ;;  %v6757_v51 = vld [vmem:[#allocation7 + $0x4bc] sm:$0xf] }
 0x12e   :  { %2380 = vmatpush.bf16.msrb.mxu2 %v4720_v60  ;;  %2393 = vmatpush.bf16.msra.mxu3 %v4880_v61  ;;  %v6709_v60 = vld [vmem:[#allocation7 + $0x338] sm:$0xf0]  ;;  %v5380_v61 = vor.u32 %v6784_v53, %v5379_v54  ;;  %v5281_v52 = vld [vmem:[#allocation7 + $0x4cc] sm:$0xf0]  ;;  %v5020_v54 = vor.u32 %v6694_v41, %v5019_v40  ;;  %v4999_v53 = vld [vmem:[#allocation7 + $0x288] sm:$0xf]  ;;  %v4704_v55 = vor.u32 %v6612_v44, %v4701_v45 }
 0x12f   :  { %v5080_v4 = vor.u32 %v6709_v60, %v5079_v46  ;;  %v4681_v46 = vld [vmem:[#allocation7 + $0x1c] sm:$0xf0]  ;;  %v5041_v40 = vld [vmem:[#allocation7 + $0x2ec] sm:$0xf0]  ;;  %v6737_v41 = vld [vmem:[#allocation7 + $0x41c] sm:$0xf] }
 0x130   :  { %v5361_v44 = vld [vmem:[#allocation7 + $0x56c] sm:$0xf0] }
 0x131   :  { %2414 = vmatpush.bf16.msra.mxu1 %v5300_v1  ;;  %2355 = vmatpush.bf16.msra.mxu0 %v5176_v5  ;;  %v6739_v1 = vld [vmem:[#allocation7 + $0x428] sm:$0xf0] }
 0x132   :  { %2381 = vmatpush.bf16.msrb.mxu2 %v4700_v8  ;;  %2394 = vmatpush.bf16.msra.mxu3 %v4860_v59  ;;  %v5200_v5 = vor.u32 %v6739_v1, %v5199_v63  ;;  %v5360_v8 = vor.u32 %v6779_v17, %v5359_v2  ;;  %v4764_v59 = vor.u32 %v6627_v3, %v4761_v16  ;;  %v4981_v63 = vld [vmem:[#allocation7 + $0x274] sm:$0xf0]  ;;  %v6712_v1 = vld [vmem:[#allocation7 + $0x354] sm:$0xf]  ;;  %v5101_v2 = vld [vmem:[#allocation7 + $0x364] sm:$0xf0] }
 0x133   :  { %v6752_v17 = vld [vmem:[#allocation7 + $0x494] sm:$0xf]  ;;  %v5261_v3 = vld [vmem:[#allocation7 + $0x4a4] sm:$0xf0]  ;;  %v2039_v16 = vpack.c.b16 %v1849_v23, %v1849_v23  ;;  %v5104_v6 = vor.u32 %v6712_v1, %v5101_v2  ;;  %v6687_v2 = vld [vmem:[#allocation7 + $0x28c] sm:$0xf] }
 0x134   :  { %v5264_v7 = vor.u32 %v6752_v17, %v5261_v3  ;;  %v5021_v23 = vld [vmem:[#allocation7 + $0x2c4] sm:$0xf0]  ;;  %v5001_v17 = vld [vmem:[#allocation7 + $0x29c] sm:$0xf0]  ;;  %v6727_v3 = vld [vmem:[#allocation7 + $0x3cc] sm:$0xf] }
 0x135   :  { %2415 = vmatpush.bf16.msra.mxu1 %v5280_v11  ;;  %2356 = vmatpush.bf16.msra.mxu0 %v5156_v21  ;;  %v6774_v11 = vld [vmem:[#allocation7 + $0x540] sm:$0xf0]  ;;  %v5159_v21 = vld [vmem:[#allocation7 + $0x3c8] sm:$0xf]  ;;  %v2240_v12 = vsel %vm171_vm0, %v2039_v16, 0 }
 0x136   :  { %2382 = vmatpush.bf16.msrb.mxu2 %v4680_v27  ;;  %2395 = vmatpush.bf16.msra.mxu3 %v4840_v57  ;;  %v5340_v22 = vor.u32 %v6774_v11, %v5339_v10  ;;  %v5319_v27 = vld [vmem:[#allocation7 + $0x508] sm:$0xf]  ;;  %v6769_v57 = vld [vmem:[#allocation7 + $0x518] sm:$0xf0]  ;;  %v5160_v37 = vor.u32 %v6729_v25, %v5159_v21  ;;  %v6747_v10 = vld [vmem:[#allocation7 + $0x46c] sm:$0xf] }
 0x137   :  { %5410 = vmatmul.msk.bf16.vlgmr.msrb.gmra.mxu1 %vm2226_vm1, %v7331_v28  ;;  %v5320_v38 = vor.u32 %v6769_v57, %v5319_v27  ;;  %v5241_v11 = vld [vmem:[#allocation7 + $0x47c] sm:$0xf0]  ;;  %v6672_v21 = vld [vmem:[#allocation7 + $0x214] sm:$0xf]  ;;  %v5061_v27 = vld [vmem:[#allocation7 + $0x314] sm:$0xf0] }
 0x138   :  { %2357 = vmatmul.bf16.vlgmr.msra.gmra.mxu0 %v7323_v49  ;;  %v5244_v19 = vor.u32 %v6747_v10, %v5241_v11  ;;  %v6742_v57 = vld [vmem:[#allocation7 + $0x444] sm:$0xf]  ;;  %v5161_v16 = vld [vmem:[#allocation7 + $0x3dc] sm:$0xf0]  ;;  %v5307_v10 = vld [vmem:[#allocation7 + $0x4e8] sm:$0xf] }
 0x139   :  { %2401 = vmatpush.bf16.msrb.mxu0 %v5140_v29  ;;  %2416 = vmatpush.bf16.msra.mxu1 %v5260_v30  ;;  %v6617_v29 = vld [vmem:[#allocation7 + $0x5c] sm:$0xf]  ;;  %v4721_v30 = vld [vmem:[#allocation7 + $0x6c] sm:$0xf0] }
 0x13a   :  { %2429 = vmatpush.bf16.msra.mxu2 %v2237_v39  ;;  %2440 = vmatpush.bf16.msrb.mxu3 %v4824_v34  ;;  %v5301_v34 = vld [vmem:[#allocation7 + $0x4f4] sm:$0xf0]  ;;  %v4724_v39 = vor.u32 %v6617_v29, %v4721_v30  ;;  %v6782_v30 = vld [vmem:[#allocation7 + $0x584] sm:$0xf]  ;;  %v6765_v11 = vld [vmem:[#allocation7 + $0x4f8] sm:$0xf0] }
 0x13b   :  { %2383 = vmatmul.bf16.vlgmr.msrb.gmra.mxu2 %v7317_v26  ;;  %2396 = vmatmul.bf16.vlgmr.msra.gmra.mxu3 %v7319_v47  ;;  %v5221_v29 = vld [vmem:[#allocation7 + $0x454] sm:$0xf0] }
 0x13d   :  { %2402 = vmatpush.bf16.msrb.mxu0 %v5120_v42  ;;  %2417 = vmatpush.bf16.msra.mxu1 %v5240_v43  ;;  %v5144_v42 = vor.u32 %v6722_v31, %v5141_v32  ;;  %v5304_v43 = vor.u32 %v6762_v33, %v5301_v34  ;;  %v5381_v31 = vld [vmem:[#allocation7 + $0x594] sm:$0xf0]  ;;  %v5224_v34 = vor.u32 %v6742_v57, %v5221_v29  ;;  %v5127_v57 = vld [vmem:[#allocation7 + $0x380] sm:$0xf]  ;;  %v6720_v29 = vld [vmem:[#allocation7 + $0x390] sm:$0xf0] }
 0x13e   :  { %2430 = vmatpush.bf16.msra.mxu2 %v5400_v50  ;;  %2441 = vmatpush.bf16.msrb.mxu3 %v4804_v20  ;;  %v6717_v50 = vld [vmem:[#allocation7 + $0x37c] sm:$0xf]  ;;  %v5121_v20 = vld [vmem:[#allocation7 + $0x38c] sm:$0xf0] }
 0x13f   :  { %v5124_v60 = vor.u32 %v6717_v50, %v5121_v20 }
 0x141   :  { %2403 = vmatpush.bf16.msrb.mxu0 %v5100_v56  ;;  %2418 = vmatpush.bf16.msra.mxu1 %v5220_v58  ;;  %v6689_v56 = vld [vmem:[#allocation7 + $0x298] sm:$0xf0]  ;;  %v6607_v58 = vld [vmem:[#allocation7 + $0xc] sm:$0xf] }
 0x142   :  { %2431 = vmatpush.bf16.msra.mxu2 %v5380_v61  ;;  %2442 = vmatpush.bf16.msrb.mxu3 %v4784_v62  ;;  %v5284_v61 = vor.u32 %v6757_v51, %v5281_v52  ;;  %v6682_v62 = vld [vmem:[#allocation7 + $0x264] sm:$0xf]  ;;  %v5000_v0 = vor.u32 %v6689_v56, %v4999_v53  ;;  %v4901_v52 = vld [vmem:[#allocation7 + $0x1d4] sm:$0xf0]  ;;  %v5181_v56 = vld [vmem:[#allocation7 + $0x404] sm:$0xf0] }
 0x143   :  { %v6662_v51 = vld [vmem:[#allocation7 + $0x1c4] sm:$0xf] }
 0x145   :  { %2404 = vmatpush.bf16.msrb.mxu0 %v5080_v4  ;;  %2419 = vmatpush.bf16.msra.mxu1 %v5200_v5  ;;  %v4684_v4 = vor.u32 %v6607_v58, %v4681_v46  ;;  %v4984_v5 = vor.u32 %v6682_v62, %v4981_v63  ;;  %v6772_v58 = vld [vmem:[#allocation7 + $0x534] sm:$0xf]  ;;  %v5341_v46 = vld [vmem:[#allocation7 + $0x544] sm:$0xf0]  ;;  %v4881_v62 = vld [vmem:[#allocation7 + $0x1ac] sm:$0xf0] }
 0x146   :  { %2432 = vmatpush.bf16.msra.mxu2 %v5360_v8  ;;  %2443 = vmatpush.bf16.msrb.mxu3 %v4764_v59  ;;  %v6677_v8 = vld [vmem:[#allocation7 + $0x23c] sm:$0xf]  ;;  %v4961_v59 = vld [vmem:[#allocation7 + $0x24c] sm:$0xf0] }
 0x149   :  { %2405 = vmatpush.bf16.msrb.mxu0 %v5060_v14  ;;  %2420 = vmatpush.bf16.msra.mxu1 %v5180_v15  ;;  %v5401_v14 = vld [vmem:[#allocation7 + $0x5bc] sm:$0xf0]  ;;  %v4964_v15 = vor.u32 %v6677_v8, %v4961_v59  ;;  %v5147_v8 = vld [vmem:[#allocation7 + $0x3a8] sm:$0xf]  ;;  %v623_v59 = vpop.permute.xlu0 %622 }
 0x14a   :  { %2433 = vmatpush.bf16.msra.mxu2 %v5340_v22  ;;  %2444 = vmatpush.bf16.msrb.mxu3 %v4744_v24  ;;  %v4941_v22 = vld [vmem:[#allocation7 + $0x224] sm:$0xf0]  ;;  %v6702_v24 = vld [vmem:[#allocation7 + $0x304] sm:$0xf]  ;;  %v5404_v25 = vor.u32 %v6787_v13, %v5401_v14  ;;  %v5004_v13 = vor.u32 %v6687_v2, %v5001_v17  ;;  %v5164_v14 = vor.u32 %v6727_v3, %v5161_v16  ;;  %v6635_v16 = vld [vmem:[#allocation7 + $0xe8] sm:$0xf0] }
 0x14b   :  { %v4944_v32 = vor.u32 %v6672_v21, %v4941_v22  ;;  %v5064_v33 = vor.u32 %v6702_v24, %v5061_v27  ;;  %v4861_v21 = vld [vmem:[#allocation7 + $0x184] sm:$0xf0]  ;;  %v5148_v22 = vor.u32 %v6725_v9, %v5147_v8  ;;  %v5308_v24 = vor.u32 %v6765_v11, %v5307_v10  ;;  %v6680_v27 = vld [vmem:[#allocation7 + $0x250] sm:$0xf0]  ;;  %v6745_v9 = vld [vmem:[#allocation7 + $0x458] sm:$0xf0] }
 0x14c   :  { %v5067_v8 = vld [vmem:[#allocation7 + $0x308] sm:$0xf] }
 0x14d   :  { %2406 = vmatpush.bf16.msrb.mxu0 %v5040_v35  ;;  %2421 = vmatpush.bf16.msra.mxu1 %v5160_v37  ;;  %v6667_v35 = vld [vmem:[#allocation7 + $0x1ec] sm:$0xf]  ;;  %v4921_v37 = vld [vmem:[#allocation7 + $0x1fc] sm:$0xf0] }
 0x14e   :  { %2434 = vmatpush.bf16.msra.mxu2 %v5320_v38  ;;  %2445 = vmatpush.bf16.msrb.mxu3 %v4724_v39  ;;  %v6697_v38 = vld [vmem:[#allocation7 + $0x2dc] sm:$0xf]  ;;  %v5384_v39 = vor.u32 %v6782_v30, %v5381_v31  ;;  %v4924_v45 = vor.u32 %v6667_v35, %v4921_v37  ;;  %v5287_v30 = vld [vmem:[#allocation7 + $0x4c0] sm:$0xf]  ;;  %v6760_v31 = vld [vmem:[#allocation7 + $0x4d0] sm:$0xf0] }
 0x14f   :  { %v5044_v50 = vor.u32 %v6697_v38, %v5041_v40  ;;  %v4841_v37 = vld [vmem:[#allocation7 + $0x15c] sm:$0xf0]  ;;  %v4827_v38 = vld [vmem:[#allocation7 + $0x128] sm:$0xf]  ;;  %v5128_v40 = vor.u32 %v6720_v29, %v5127_v57  ;;  %v6740_v29 = vld [vmem:[#allocation7 + $0x430] sm:$0xf0] }
 0x150   :  { %2422 = vmatmul.bf16.vlgmr.msra.gmra.mxu1 %v7323_v49  ;;  %v5207_v57 = vld [vmem:[#allocation7 + $0x420] sm:$0xf] }
 0x151   :  { %2466 = vmatpush.bf16.msrb.mxu1 %v5144_v42  ;;  %5411 = vmatmul.msk.bf16.vlgmr.msra.gmra.mxu2 %vm2226_vm1, %v7331_v28  ;;  %v5201_v42 = vld [vmem:[#allocation7 + $0x42c] sm:$0xf0] }
 0x152   :  { %2479 = vmatpush.bf16.msrb.mxu2 %v5304_v43  ;;  %2407 = vmatpush.bf16.msrb.mxu0 %v5020_v54  ;;  %v6777_v43 = vld [vmem:[#allocation7 + $0x55c] sm:$0xf]  ;;  %v5204_v20 = vor.u32 %v6737_v41, %v5201_v42  ;;  %v6692_v54 = vld [vmem:[#allocation7 + $0x2b4] sm:$0xf]  ;;  %v5288_v41 = vor.u32 %v6760_v31, %v5287_v30  ;;  %v4947_v42 = vld [vmem:[#allocation7 + $0x218] sm:$0xf] }
 0x153   :  { %2446 = vmatpush.bf16.msrb.mxu3 %v4704_v55  ;;  %v5364_v53 = vor.u32 %v6777_v43, %v5361_v44  ;;  %v6732_v55 = vld [vmem:[#allocation7 + $0x3f4] sm:$0xf]  ;;  %v5024_v63 = vor.u32 %v6692_v54, %v5021_v23  ;;  %v6675_v43 = vld [vmem:[#allocation7 + $0x228] sm:$0xf0]  ;;  %v5107_v44 = vld [vmem:[#allocation7 + $0x358] sm:$0xf] }
 0x154   :  { %v5184_v1 = vor.u32 %v6732_v55, %v5181_v56  ;;  %v4948_v54 = vor.u32 %v6675_v43, %v4947_v42  ;;  %v6640_v23 = vld [vmem:[#allocation7 + $0x110] sm:$0xf0]  ;;  %v6695_v43 = vld [vmem:[#allocation7 + $0x2c8] sm:$0xf0] }
 0x155   :  { %2467 = vmatpush.bf16.msrb.mxu1 %v5124_v60  ;;  %v4904_v60 = vor.u32 %v6662_v51, %v4901_v52 }
 0x156   :  { %2480 = vmatpush.bf16.msrb.mxu2 %v5284_v61  ;;  %2408 = vmatpush.bf16.msrb.mxu0 %v5000_v0  ;;  %v6657_v61 = vld [vmem:[#allocation7 + $0x19c] sm:$0xf]  ;;  %v5344_v0 = vor.u32 %v6772_v58, %v5341_v46  ;;  %v4927_v46 = vld [vmem:[#allocation7 + $0x1f0] sm:$0xf] }
 0x157   :  { %2447 = vmatpush.bf16.msrb.mxu3 %v4684_v4  ;;  %v6767_v4 = vld [vmem:[#allocation7 + $0x50c] sm:$0xf]  ;;  %v4884_v36 = vor.u32 %v6657_v61, %v4881_v62  ;;  %v5087_v61 = vld [vmem:[#allocation7 + $0x330] sm:$0xf]  ;;  %v6710_v62 = vld [vmem:[#allocation7 + $0x340] sm:$0xf0] }
 0x159   :  { %2468 = vmatpush.bf16.msrb.mxu1 %v5104_v6  ;;  %2409 = vmatmul.bf16.vlgmr.msrb.gmra.mxu0 %v7321_v48  ;;  %v4987_v6 = vld [vmem:[#allocation7 + $0x268] sm:$0xf] }
 0x15a   :  { %2453 = vmatpush.bf16.msra.mxu0 %v4984_v5  ;;  %2481 = vmatpush.bf16.msrb.mxu2 %v5264_v7  ;;  %v5321_v5 = vld [vmem:[#allocation7 + $0x51c] sm:$0xf0]  ;;  %v6685_v7 = vld [vmem:[#allocation7 + $0x278] sm:$0xf0] }
 0x15b   :  { %2494 = vmatpush.bf16.msra.mxu3 %v2240_v12  ;;  %v7354_v12 = vperm.slane %v623_v59, 1 }
 0x15c   :  { %2448 = vmatmul.bf16.vlgmr.msrb.gmra.mxu3 %v7317_v26 }
 0x15d   :  { %2469 = vmatpush.bf16.msrb.mxu1 %v5084_v18  ;;  %v4988_v18 = vor.u32 %v6685_v7, %v4987_v6  ;;  %6879 = vrcp.f32 %v7354_v12  ;;  %v4907_v6 = vld [vmem:[#allocation7 + $0x1c8] sm:$0xf]  ;;  %v6665_v7 = vld [vmem:[#allocation7 + $0x1d8] sm:$0xf0]  ;;  %vm648_vm2 = vweird.f32 %v7354_v12 }
 0x15e   :  { %2454 = vmatpush.bf16.msra.mxu0 %v4964_v15  ;;  %2482 = vmatpush.bf16.msrb.mxu2 %v5244_v19  ;;  %v5324_v15 = vor.u32 %v6767_v4, %v5321_v5  ;;  %v6652_v19 = vld [vmem:[#allocation7 + $0x174] sm:$0xf]  ;;  %v5088_v4 = vor.u32 %v6710_v62, %v5087_v61  ;;  %v5007_v62 = vld [vmem:[#allocation7 + $0x290] sm:$0xf] }
 0x15f   :  { %2495 = vmatpush.bf16.msra.mxu3 %v5404_v25  ;;  %v4967_v25 = vld [vmem:[#allocation7 + $0x240] sm:$0xf] }
 0x160   :  { %v4968_v35 = vor.u32 %v6680_v27, %v4967_v25  ;;  %v5047_v25 = vld [vmem:[#allocation7 + $0x2e0] sm:$0xf]  ;;  %v6700_v27 = vld [vmem:[#allocation7 + $0x2f0] sm:$0xf0] }
 0x161   :  { %2470 = vmatpush.bf16.msrb.mxu1 %v5064_v33  ;;  %v4864_v33 = vor.u32 %v6652_v19, %v4861_v21 }
 0x162   :  { %2455 = vmatpush.bf16.msra.mxu0 %v4944_v32  ;;  %2483 = vmatpush.bf16.msrb.mxu2 %v5224_v34  ;;  %v7356_v32 = vperm.slane %v623_v59, 0  ;;  %v6647_v34 = vld [vmem:[#allocation7 + $0x14c] sm:$0xf]  ;;  %v6705_v59 = vld [vmem:[#allocation7 + $0x318] sm:$0xf0] }
 0x163   :  { %2496 = vmatpush.bf16.msra.mxu3 %v5384_v39  ;;  %v6645_v39 = vld [vmem:[#allocation7 + $0x138] sm:$0xf0]  ;;  %v4844_v51 = vor.u32 %v6647_v34, %v4841_v37  ;;  %v7363_v55 = vpop.eup %6879  ;;  %v5068_v19 = vor.u32 %v6705_v59, %v5067_v8  ;;  %v4747_v34 = vld [vmem:[#allocation7 + $0x88] sm:$0xf]  ;;  %v5048_v37 = vor.u32 %v6700_v27, %v5047_v25  ;;  %v6538_v59 = vld [vmem:[#allocation4 + $0x3a8] sm:$0xf0] }
 0x164   :  { %v4828_v52 = vor.u32 %v6645_v39, %v4827_v38  ;;  %6881 = vrcp.f32 %v7356_v32  ;;  %v644_v2 = vmul.f32 %v7363_v55, %v7354_v12  ;;  %vm649_vm3 = vweird.f32 %v7363_v55  ;;  %v4867_v39 = vld [vmem:[#allocation7 + $0x178] sm:$0xf]  ;;  %v5876_v8 = vld [vmem:[#allocation4 + $0x398] sm:$0xf]  ;;  %v6453_v27 = vld [vmem:[#allocation4 + $0x100] sm:$0xf0] }
 0x165   :  { %2471 = vmatpush.bf16.msrb.mxu1 %v5044_v50  ;;  %v5267_v50 = vld [vmem:[#allocation7 + $0x498] sm:$0xf]  ;;  %v5208_v38 = vor.u32 %v6740_v29, %v5207_v57  ;;  %vm7383_vm4 = vmor %vm648_vm2, %vm649_vm3  ;;  %vm633_vm5 = vweird.f32 %v7356_v32  ;;  %v5877_v25 = vor.u32 %v6538_v59, %v5876_v8  ;;  %v5696_v57 = vld [vmem:[#allocation4 + $0x230] sm:$0xf] }
 0x166   :  { %2456 = vmatpush.bf16.msra.mxu0 %v4924_v45  ;;  %2484 = vmatpush.bf16.msrb.mxu2 %v5204_v20  ;;  %v6715_v45 = vld [vmem:[#allocation7 + $0x368] sm:$0xf0]  ;;  %v645_v11 = vsub.f32 1.0, %v644_v2  ;;  %v6493_v29 = vld [vmem:[#allocation4 + $0x240] sm:$0xf0] }
 0x167   :  { %2497 = vmatpush.bf16.msra.mxu3 %v5364_v53  ;;  %v6755_v20 = vld [vmem:[#allocation7 + $0x4a8] sm:$0xf0]  ;;  %v4807_v53 = vld [vmem:[#allocation7 + $0x100] sm:$0xf]  ;;  %v5108_v56 = vor.u32 %v6715_v45, %v5107_v44  ;;  %v5187_v44 = vld [vmem:[#allocation7 + $0x3f8] sm:$0xf] }
 0x168   :  { %v5268_v58 = vor.u32 %v6755_v20, %v5267_v50  ;;  %v4808_v17 = vor.u32 %v6640_v23, %v4807_v53  ;;  %v646_v42 = vmul.f32 %v7363_v55, %v645_v11  ;;  %v6735_v45 = vld [vmem:[#allocation7 + $0x408] sm:$0xf0]  ;;  %v6785_v8 = vld [vmem:[#allocation7 + $0x598] sm:$0xf0] }
 0x169   :  { %2472 = vmatpush.bf16.msrb.mxu1 %v5024_v63  ;;  %v5247_v63 = vld [vmem:[#allocation7 + $0x470] sm:$0xf]  ;;  %v5188_v61 = vor.u32 %v6735_v45, %v5187_v44  ;;  %v5516_v45 = vld [vmem:[#allocation4 + $0xc8] sm:$0xf] }
 0x16a   :  { %2457 = vmatpush.bf16.msra.mxu0 %v4904_v60  ;;  %2485 = vmatpush.bf16.msrb.mxu2 %v5184_v1  ;;  %v6670_v60 = vld [vmem:[#allocation7 + $0x200] sm:$0xf0]  ;;  %v7369_v10 = vpop.eup %6881  ;;  %v647_v2 = vadd.f32 %v7363_v55, %v646_v42  ;;  %v5676_v20 = vld [vmem:[#allocation4 + $0x208] sm:$0xf] }
 0x16b   :  { %2498 = vmatpush.bf16.msra.mxu3 %v5344_v0  ;;  %v6750_v1 = vld [vmem:[#allocation7 + $0x480] sm:$0xf0]  ;;  %v4928_v3 = vor.u32 %v6670_v60, %v4927_v46  ;;  %v4787_v0 = vld [vmem:[#allocation7 + $0xd8] sm:$0xf]  ;;  %v7373_v30 = vmul.f32 %v7369_v10, %v7356_v32  ;;  %vm634_vm7 = vweird.f32 %v7369_v10 }
 0x16c   :  { %v5248_v5 = vor.u32 %v6750_v1, %v5247_v63  ;;  %v6650_v46 = vld [vmem:[#allocation7 + $0x160] sm:$0xf0]  ;;  %v5167_v1 = vld [vmem:[#allocation7 + $0x3d0] sm:$0xf]  ;;  %vm7404_vm8 = vmor %vm633_vm5, %vm634_vm7 }
 0x16d   :  { %2473 = vmatpush.bf16.msrb.mxu1 %v5004_v13  ;;  %v4788_v13 = vor.u32 %v6635_v16, %v4787_v0  ;;  %v630_v50 = vsub.f32 1.0, %v7373_v30  ;;  %v6690_v63 = vld [vmem:[#allocation7 + $0x2a0] sm:$0xf0]  ;;  %v5716_v0 = vld [vmem:[#allocation4 + $0x258] sm:$0xf] }
 0x16e   :  { %2458 = vmatpush.bf16.msra.mxu0 %v4884_v36  ;;  %2486 = vmatpush.bf16.msrb.mxu2 %v5164_v14  ;;  %v5227_v36 = vld [vmem:[#allocation7 + $0x448] sm:$0xf]  ;;  %v4908_v14 = vor.u32 %v6665_v7, %v4907_v6  ;;  %v6498_v16 = vld [vmem:[#allocation4 + $0x268] sm:$0xf0]  ;;  %v5856_v30 = vld [vmem:[#allocation4 + $0x370] sm:$0xf] }
 0x16f   :  { %2499 = vmatpush.bf16.msra.mxu3 %v5324_v15  ;;  %v4767_v15 = vld [vmem:[#allocation7 + $0xb0] sm:$0xf]  ;;  %v5228_v21 = vor.u32 %v6745_v9, %v5227_v36  ;;  %v5008_v9 = vor.u32 %v6690_v63, %v5007_v62  ;;  %v5496_v63 = vld [vmem:[#allocation4 + $0xa0] sm:$0xf] }
 0x170   :  { %2474 = vmatmul.bf16.vlgmr.msrb.gmra.mxu1 %v7321_v48 }
 0x171   :  { %2518 = vmatpush.bf16.msra.mxu1 %v4988_v18  ;;  %2487 = vmatmul.bf16.vlgmr.msrb.gmra.mxu2 %v7323_v49  ;;  %v6630_v18 = vld [vmem:[#allocation7 + $0xc0] sm:$0xf0] }
 0x172   :  { %2531 = vmatpush.bf16.msra.mxu2 %v5148_v22  ;;  %5412 = vmatmul.msk.bf16.vlgmr.msra.gmra.mxu3 %vm2226_vm1, %v7331_v28  ;;  %v4887_v22 = vld [vmem:[#allocation7 + $0x1a0] sm:$0xf]  ;;  %v4768_v31 = vor.u32 %v6630_v18, %v4767_v15  ;;  %v5717_v15 = vor.u32 %v6498_v16, %v5716_v0  ;;  %v4707_v18 = vld [vmem:[#allocation7 + $0x38] sm:$0xf]  ;;  %v618_v0 = vld [vmem:[#allocation2] sm:$0x1f] }
 0x173   :  { %2544 = vmatpush.bf16.msrb.mxu3 %v5308_v24  ;;  %2459 = vmatpush.bf16.msra.mxu0 %v4864_v33  ;;  %v6660_v24 = vld [vmem:[#allocation7 + $0x1b0] sm:$0xf0] }
 0x174   :  { %v4888_v33 = vor.u32 %v6660_v24, %v4887_v22  ;;  %v631_v24 = vmul.f32 %v7369_v10, %v630_v50  ;;  %v6448_v50 = vld [vmem:[#allocation4 + $0xd8] sm:$0xf0] }
 0x175   :  { %2519 = vmatpush.bf16.msra.mxu1 %v4968_v35  ;;  %v6625_v35 = vld [vmem:[#allocation7 + $0x98] sm:$0xf0] }
 0x176   :  { %2532 = vmatpush.bf16.msra.mxu2 %v5128_v40  ;;  %v6655_v40 = vld [vmem:[#allocation7 + $0x188] sm:$0xf0]  ;;  %v4748_v53 = vor.u32 %v6625_v35, %v4747_v34  ;;  %v639_v34 = vand.u32 2147483648, %v7356_v32  ;;  %v632_v44 = vadd.f32 %v7369_v10, %v631_v24 }
 0x177   :  { %2545 = vmatpush.bf16.msrb.mxu3 %v5288_v41  ;;  %2460 = vmatpush.bf16.msra.mxu0 %v4844_v51  ;;  %v5027_v41 = vld [vmem:[#allocation7 + $0x2b8] sm:$0xf]  ;;  %v652_v51 = vand.u32 2147483647, %v7354_v12  ;;  %v4868_v23 = vor.u32 %v6655_v40, %v4867_v39  ;;  %v5697_v39 = vor.u32 %v6493_v29, %v5696_v57  ;;  %v4687_v40 = vld [vmem:[#allocation7 + $0x10] sm:$0xf] }
 0x178   :  { %v5028_v60 = vor.u32 %v6695_v43, %v5027_v41  ;;  %v6610_v41 = vld [vmem:[#allocation7 + $0x20] sm:$0xf0]  ;;  %v619_v43 = vld [vmem:[#allocation2 + $0x5] sm:$0x1f] }
 0x179   :  { %2520 = vmatpush.bf16.msra.mxu1 %v4948_v54  ;;  %v4727_v54 = vld [vmem:[#allocation7 + $0x60] sm:$0xf]  ;;  %vm7391_vm6 = vcmp.eq.f32.partialorder %v652_v51, 8.507059e+37 }
 0x17a   :  { %2533 = vmatpush.bf16.msra.mxu2 %v5108_v56  ;;  %2461 = vmatmul.bf16.vlgmr.msra.gmra.mxu0 %v7319_v47  ;;  %v6620_v56 = vld [vmem:[#allocation7 + $0x70] sm:$0xf0]  ;;  %v6488_v51 = vld [vmem:[#allocation4 + $0x218] sm:$0xf0] }
 0x17b   :  { %2505 = vmatpush.bf16.msrb.mxu0 %v4828_v52  ;;  %2546 = vmatpush.bf16.msrb.mxu3 %v5268_v58  ;;  %v654_v52 = vand.u32 2147483648, %v7354_v12  ;;  %v4847_v58 = vld [vmem:[#allocation7 + $0x150] sm:$0xf]  ;;  %v4728_v6 = vor.u32 %v6620_v56, %v4727_v54  ;;  %v6528_v54 = vld [vmem:[#allocation4 + $0x358] sm:$0xf0] }
 0x17c   :  { %v6458_v12 = vld [vmem:[#allocation4 + $0x128] sm:$0xf0]  ;;  %v4848_v7 = vor.u32 %v6650_v46, %v4847_v58  ;;  %v5517_v46 = vor.u32 %v6448_v50, %v5516_v45 }
 0x17d   :  { %2521 = vmatpush.bf16.msra.mxu1 %v4928_v3  ;;  %v5556_v3 = vld [vmem:[#allocation4 + $0x118] sm:$0xf]  ;;  %v655_v36 = vor.u32 1.1754944e-38, %v654_v52  ;;  %v5836_v52 = vld [vmem:[#allocation4 + $0x348] sm:$0xf] }
 0x17e   :  { %2534 = vmatpush.bf16.msra.mxu2 %v5088_v4  ;;  %v1210_v4 = vld [vmem:[#allocation7 + $0x5d8] sm:$0xf]  ;;  %v5837_v62 = vor.u32 %v6528_v54, %v5836_v52  ;;  %v6775_v52 = vld [vmem:[#allocation7 + $0x548] sm:$0xf0] }
 0x17f   :  { %2506 = vmatpush.bf16.msrb.mxu0 %v4808_v17  ;;  %2547 = vmatpush.bf16.msrb.mxu3 %v5248_v5  ;;  %v6730_v17 = vld [vmem:[#allocation7 + $0x3e0] sm:$0xf0]  ;;  %v1850_v22 = vunpack.c.l.b16 %v1210_v4 }
 0x180   :  { %v5168_v11 = vor.u32 %v6730_v17, %v5167_v1  ;;  %v6443_v1 = vld [vmem:[#allocation4 + $0xb0] sm:$0xf0] }
 0x181   :  { %2522 = vmatpush.bf16.msra.mxu1 %v4908_v14  ;;  %v5557_v14 = vor.u32 %v6458_v12, %v5556_v3  ;;  %v2040_v42 = vpack.c.b16 %v1850_v22, %v1850_v22  ;;  %v6483_v17 = vld [vmem:[#allocation4 + $0x1f0] sm:$0xf0]  ;;  %v5816_v3 = vld [vmem:[#allocation4 + $0x320] sm:$0xf] }
 0x182   :  { %2535 = vmatpush.bf16.msra.mxu2 %v5068_v19  ;;  %v6615_v19 = vld [vmem:[#allocation7 + $0x48] sm:$0xf0]  ;;  %v6523_v12 = vld [vmem:[#allocation4 + $0x330] sm:$0xf0] }
 0x183   :  { %2507 = vmatpush.bf16.msrb.mxu0 %v4788_v13  ;;  %2548 = vmatpush.bf16.msrb.mxu3 %v5228_v21  ;;  %v651_v13 = vsel %vm7383_vm4, %v7363_v55, %v647_v2  ;;  %v5536_v21 = vld [vmem:[#allocation4 + $0xf0] sm:$0xf]  ;;  %v2243_v58 = vsel %vm171_vm0, %v2040_v42, 0  ;;  %v5656_v2 = vld [vmem:[#allocation4 + $0x1e0] sm:$0xf]  ;;  %v7434_v42 = vld [vmem:[#allocation4 + $0x5c8] sm:$0xff] }
 0x184   :  { %v656_v35 = vsel %vm7391_vm6, %v655_v36, %v651_v13  ;;  %v5657_v36 = vor.u32 %v6483_v17, %v5656_v2  ;;  %v6438_v13 = vld [vmem:[#allocation4 + $0x88] sm:$0xf0] }
 0x185   :  { %2523 = vmatpush.bf16.msra.mxu1 %v4888_v33  ;;  %v637_v33 = vand.u32 2147483647, %v7356_v32  ;;  %v7420_v56 = vmul.f32 %v656_v35, %v619_v43  ;;  %v5456_v35 = vld [vmem:[#allocation4 + $0x50] sm:$0xf] }
 0x186   :  { %2536 = vmatpush.bf16.msra.mxu2 %v5048_v37  ;;  %v4708_v37 = vor.u32 %v6615_v19, %v4707_v18  ;;  %v5796_v18 = vld [vmem:[#allocation4 + $0x2f8] sm:$0xf]  ;;  %v6518_v19 = vld [vmem:[#allocation4 + $0x308] sm:$0xf0] }
 0x187   :  { %2508 = vmatpush.bf16.msrb.mxu0 %v4768_v31  ;;  %2549 = vmatpush.bf16.msrb.mxu3 %v5208_v38  ;;  %v6533_v31 = vld [vmem:[#allocation4 + $0x380] sm:$0xf0]  ;;  %v5537_v38 = vor.u32 %v6453_v27, %v5536_v21  ;;  %vm7416_vm9 = vcmp.eq.f32.partialorder %v637_v33, 8.507059e+37  ;;  %v665_v16 = vperm.slane %v7420_v56, 0  ;;  %v666_v4 = vperm.slane %v7420_v56, 1 }
 0x188   :  { %v5857_v32 = vor.u32 %v6533_v31, %v5856_v30  ;;  %v667_v59 = vperm.slane %v7420_v56, 2  ;;  %v5367_v30 = vld [vmem:[#allocation7 + $0x560] sm:$0xf]  ;;  %v6780_v31 = vld [vmem:[#allocation7 + $0x570] sm:$0xf0] }
 0x189   :  { %2524 = vmatpush.bf16.msra.mxu1 %v4868_v23  ;;  %v4688_v23 = vor.u32 %v6610_v41, %v4687_v40  ;;  %v685_v22 = vpack.c.bf16 %v665_v16, %v665_v16  ;;  %v686_v24 = vpack.c.bf16 %v666_v4, %v666_v4  ;;  %v5776_v40 = vld [vmem:[#allocation4 + $0x2d0] sm:$0xf]  ;;  %v6513_v41 = vld [vmem:[#allocation4 + $0x2e0] sm:$0xf0]  ;;  %v5368_v50 = vor.u32 %v6780_v31, %v5367_v30 }
 0x18a   :  { %2537 = vmatpush.bf16.msra.mxu2 %v5028_v60  ;;  %v6790_v60 = vld [vmem:[#allocation7 + $0x5c0] sm:$0xf0]  ;;  %v687_v55 = vpack.c.bf16 %v667_v59, %v667_v59  ;;  %v5558_v31 = vld [vmem:[#allocation4 + $0x12c] sm:$0xf0] }
 0x18b   :  { %2509 = vmatpush.bf16.msrb.mxu0 %v4748_v53  ;;  %2550 = vmatpush.bf16.msrb.mxu3 %v5188_v61  ;;  %v5677_v61 = vor.u32 %v6488_v51, %v5676_v20  ;;  %v2586_v45 = vunpack.c.l.b16 %v686_v24  ;;  %v5347_v51 = vld [vmem:[#allocation7 + $0x538] sm:$0xf] }
 0x18c   :  { %v2587_v53 = vunpack.c.l.b16 %v687_v55  ;;  %v6496_v55 = vld [vmem:[#allocation4 + $0x25c] sm:$0xf] }
 0x18d   :  { %2525 = vmatpush.bf16.msra.mxu1 %v4848_v7  ;;  %v5387_v7 = vld [vmem:[#allocation7 + $0x588] sm:$0xf] }
 0x18e   :  { %2538 = vmatpush.bf16.msra.mxu2 %v5008_v9  ;;  %v5817_v9 = vor.u32 %v6523_v12, %v5816_v3  ;;  %v2592_v3 = vrot.slane %v2586_v45, 7 }
 0x18f   :  { %2510 = vmatpush.bf16.msrb.mxu0 %v4728_v6  ;;  %2551 = vmatpush.bf16.msrb.mxu3 %v5168_v11  ;;  %v5497_v6 = vor.u32 %v6443_v1, %v5496_v63  ;;  %v5476_v11 = vld [vmem:[#allocation4 + $0x78] sm:$0xf] }
 0x190   :  { %2526 = vmatmul.bf16.vlgmr.msra.gmra.mxu1 %v7319_v47  ;;  %v640_v47 = vor.u32 1.1754944e-38, %v639_v34  ;;  %v5477_v27 = vor.u32 %v6438_v13, %v5476_v11  ;;  %v5576_v11 = vld [vmem:[#allocation4 + $0x140] sm:$0xf] }
 0x191   :  { %3602 = vmatpush.bf16.msrb.mxu1 %v5557_v14  ;;  %2539 = vmatmul.bf16.vlgmr.msra.gmra.mxu2 %v7321_v48  ;;  %v5407_v48 = vld [vmem:[#allocation7 + $0x5b0] sm:$0xf]  ;;  %v5636_v14 = vld [vmem:[#allocation4 + $0x1b8] sm:$0xf] }
 0x192   :  { %3615 = vmatpush.bf16.msrb.mxu2 %v5717_v15  ;;  %2552 = vmatmul.bf16.vlgmr.msrb.gmra.mxu3 %v7323_v49  ;;  %v636_v49 = vsel %vm7404_vm8, %v7369_v10, %v632_v44  ;;  %v5408_v10 = vor.u32 %v6790_v60, %v5407_v48  ;;  %v6478_v15 = vld [vmem:[#allocation4 + $0x1c8] sm:$0xf0]  ;;  %v2585_v44 = vunpack.c.l.b16 %v685_v22  ;;  %v5596_v48 = vld [vmem:[#allocation4 + $0x168] sm:$0xf]  ;;  %v6468_v60 = vld [vmem:[#allocation4 + $0x178] sm:$0xf0] }
 0x193   :  { %3628 = vmatpush.bf16.msra.mxu3 %v5877_v25  ;;  %2511 = vmatpush.bf16.msrb.mxu0 %v4708_v37  ;;  %v641_v5 = vsel %vm7416_vm9, %v640_v47, %v636_v49  ;;  %v5388_v25 = vor.u32 %v6785_v8, %v5387_v7  ;;  %v5637_v33 = vor.u32 %v6478_v15, %v5636_v14  ;;  %v6433_v37 = vld [vmem:[#allocation4 + $0x60] sm:$0xf0]  ;;  %v5756_v49 = vld [vmem:[#allocation4 + $0x2a8] sm:$0xf]  ;;  %v2594_v7 = vrot.slane %v2587_v53, 7 }
 0x194   :  { %v7432_v21 = vmul.f32 %v641_v5, %v618_v0  ;;  %v2254_v57 = vpop.f32.mrf.mxu0  ;;  %v2267_v29 = vpop.f32.mrf.mxu1  ;;  %v5457_v20 = vor.u32 %v6433_v37, %v5456_v35  ;;  %v5777_v47 = vor.u32 %v6513_v41, %v5776_v40  ;;  %v2590_v17 = vrot.slane %v2585_v44, 7  ;;  %v6463_v15 = vld [vmem:[#allocation4 + $0x150] sm:$0xf0]  ;;  %v6573_v44 = vld [vmem:[#allocation4 + $0x4c0] sm:$0xf0] }
 0x195   :  { %3603 = vmatpush.bf16.msrb.mxu1 %v5537_v38  ;;  %v2268_v34 = vadd.f32 %v2267_v29, %v2254_v57  ;;  %v5616_v38 = vld [vmem:[#allocation4 + $0x190] sm:$0xf]  ;;  %v5348_v0 = vor.u32 %v6775_v52, %v5347_v51  ;;  %v5597_v8 = vor.u32 %v6468_v60, %v5596_v48  ;;  %v6456_v57 = vld [vmem:[#allocation4 + $0x11c] sm:$0xf]  ;;  %v6136_v52 = vld [vmem:[#allocation4 + $0x5a0] sm:$0xf] }
 0x196   :  { %3616 = vmatpush.bf16.msrb.mxu2 %v5697_v39  ;;  %v6473_v39 = vld [vmem:[#allocation4 + $0x1a0] sm:$0xf0]  ;;  %v660_v43 = vperm.slane %v7432_v21, 0  ;;  %v662_v54 = vperm.slane %v7432_v21, 2  ;;  %v6451_v53 = vld [vmem:[#allocation4 + $0xf4] sm:$0xf] }
 0x197   :  { %3629 = vmatpush.bf16.msra.mxu3 %v5857_v32  ;;  %2512 = vmatpush.bf16.msrb.mxu0 %v4688_v23  ;;  %v661_v32 = vperm.slane %v7432_v21, 1  ;;  %v5617_v23 = vor.u32 %v6473_v39, %v5616_v38  ;;  %v6491_v48 = vld [vmem:[#allocation4 + $0x234] sm:$0xf]  ;;  %v5698_v60 = vld [vmem:[#allocation4 + $0x244] sm:$0xf0] }
 0x198   :  { %v680_v2 = vpack.c.bf16 %v660_v43, %v660_v43  ;;  %v682_v24 = vpack.c.bf16 %v662_v54, %v662_v54  ;;  %v6016_v43 = vld [vmem:[#allocation4 + $0x4b0] sm:$0xf]  ;;  %v6603_v54 = vld [vmem:[#allocation4 + $0x5b0] sm:$0xf0] }
 0x199   :  { %3604 = vmatpush.bf16.msrb.mxu1 %v5517_v46  ;;  %v6428_v46 = vld [vmem:[#allocation4 + $0x38] sm:$0xf0]  ;;  %v681_v13 = vpack.c.bf16 %v661_v32, %v661_v32  ;;  %v5561_v32 = vor.u32 %v6456_v57, %v5558_v31  ;;  %v5658_v31 = vld [vmem:[#allocation4 + $0x1f4] sm:$0xf0] }
 0x19a   :  { %3617 = vmatpush.bf16.msrb.mxu2 %v5677_v61  ;;  %2513 = vmatmul.bf16.vlgmr.msrb.gmra.mxu0 %v7317_v26  ;;  %v5797_v26 = vor.u32 %v6518_v19, %v5796_v18  ;;  %v6508_v61 = vld [vmem:[#allocation4 + $0x2b8] sm:$0xf0]  ;;  %v5736_v18 = vld [vmem:[#allocation4 + $0x280] sm:$0xf]  ;;  %v6503_v19 = vld [vmem:[#allocation4 + $0x290] sm:$0xf0]  ;;  %v2582_v41 = vunpack.c.l.b16 %v682_v24 }
 0x19b   :  { %2559 = vmatpush.bf16.msra.mxu0 %v2243_v58  ;;  %3630 = vmatpush.bf16.msra.mxu3 %v5837_v62  ;;  %v5436_v58 = vld [vmem:[#allocation4 + $0x28] sm:$0xf]  ;;  %v3204_v62 = vunpack.c.l.b16 %v7434_v42  ;;  %v2280_v63 = vpop.f32.mrf.mxu2  ;;  %v2293_v1 = vpop.f32.mrf.mxu3  ;;  %v5757_v59 = vor.u32 %v6508_v61, %v5756_v49  ;;  %v5737_v35 = vor.u32 %v6503_v19, %v5736_v18  ;;  %v2581_v37 = vunpack.c.l.b16 %v681_v13  ;;  %v6563_v13 = vld [vmem:[#allocation4 + $0x470] sm:$0xf0]  ;;  %v6096_v19 = vld [vmem:[#allocation4 + $0x550] sm:$0xf] }
 0x19c   :  { %v2281_v12 = vadd.f32 %v2280_v63, %v2268_v34  ;;  %v5437_v16 = vor.u32 %v6428_v46, %v5436_v58  ;;  %v2256_v4 = vpop.f32.mrf.mxu0  ;;  %v2269_v5 = vpop.f32.mrf.mxu1  ;;  %v5577_v34 = vor.u32 %v6463_v15, %v5576_v11  ;;  %v5538_v46 = vld [vmem:[#allocation4 + $0x104] sm:$0xf0]  ;;  %v5976_v11 = vld [vmem:[#allocation4 + $0x460] sm:$0xf]  ;;  %v6441_v24 = vld [vmem:[#allocation4 + $0xa4] sm:$0xf] }
 0x19d   :  { %3605 = vmatpush.bf16.msrb.mxu1 %v5497_v6  ;;  %v6770_v6 = vld [vmem:[#allocation7 + $0x520] sm:$0xf0]  ;;  %v3394_v22 = vpack.c.b16 %v3204_v62, %v3204_v62  ;;  %v2593_v51 = vsel %vm1232_vm15, %v2592_v3, %v2581_v37  ;;  %v669_v62 = vperm.slane %v7420_v56, 4  ;;  %v6568_v3 = vld [vmem:[#allocation4 + $0x498] sm:$0xf0] }
 0x19e   :  { %3618 = vmatpush.bf16.msrb.mxu2 %v5657_v36  ;;  %v5416_v36 = vld [vmem:[#allocation4] sm:$0xf]  ;;  %v2294_v14 = vadd.f32 %v2293_v1, %v2281_v12  ;;  %v7449_v63 = vpack.c.b16 %v2593_v51, %v2593_v51  ;;  %v6017_v1 = vor.u32 %v6573_v44, %v6016_v43  ;;  %v6116_v4 = vld [vmem:[#allocation4 + $0x578] sm:$0xf]  ;;  %v6598_v5 = vld [vmem:[#allocation4 + $0x588] sm:$0xf0] }
 0x19f   :  { %2560 = vmatpush.bf16.msra.mxu0 %v5408_v10  ;;  %3631 = vmatpush.bf16.msra.mxu3 %v5817_v9  ;;  %v5327_v10 = vld [vmem:[#allocation7 + $0x510] sm:$0xf]  ;;  %v6423_v9 = vld [vmem:[#allocation4 + $0x10] sm:$0xf0]  ;;  %v3588_v39 = vsel %vm171_vm0, %v3394_v22, 0 }
 0x1a0   :  { %v5328_v29 = vor.u32 %v6770_v6, %v5327_v10  ;;  %v5417_v30 = vor.u32 %v6423_v9, %v5416_v36  ;;  %v6446_v10 = vld [vmem:[#allocation4 + $0xcc] sm:$0xf]  ;;  %v5518_v6 = vld [vmem:[#allocation4 + $0xdc] sm:$0xf0]  ;;  %v6117_v9 = vor.u32 %v6598_v5, %v6116_v4  ;;  %v6593_v22 = vld [vmem:[#allocation4 + $0x560] sm:$0xf0] }
 0x1a1   :  { %3606 = vmatpush.bf16.msrb.mxu1 %v5477_v27  ;;  %v6578_v27 = vld [vmem:[#allocation4 + $0x4e8] sm:$0xf0]  ;;  %v5956_v37 = vld [vmem:[#allocation4 + $0x438] sm:$0xf]  ;;  %v6076_v43 = vld [vmem:[#allocation4 + $0x528] sm:$0xf] }
 0x1a2   :  { %3619 = vmatpush.bf16.msrb.mxu2 %v5637_v33  ;;  %v5718_v33 = vld [vmem:[#allocation4 + $0x26c] sm:$0xf0]  ;;  %v6588_v44 = vld [vmem:[#allocation4 + $0x538] sm:$0xf0]  ;;  %v663_v5 = vperm.slane %v7432_v21, 3 }
 0x1a3   :  { %2561 = vmatpush.bf16.msra.mxu0 %v5388_v25  ;;  %3632 = vmatpush.bf16.msra.mxu3 %v5797_v26  ;;  %v6036_v25 = vld [vmem:[#allocation4 + $0x4d8] sm:$0xf]  ;;  %v2580_v26 = vunpack.c.l.b16 %v680_v2  ;;  %v5721_v45 = vor.u32 %v6496_v55, %v5718_v33  ;;  %v6137_v2 = vor.u32 %v6603_v54, %v6136_v52  ;;  %v664_v55 = vperm.slane %v7432_v21, 4  ;;  %v6038_v4 = vld [vmem:[#allocation4 + $0x4ec] sm:$0xf0] }
 0x1a4   :  { %v6037_v38 = vor.u32 %v6578_v27, %v6036_v25  ;;  %v2319_v58 = vpop.f32.mrf.mxu1  ;;  %v6077_v54 = vor.u32 %v6588_v44, %v6076_v43  ;;  %v5438_v21 = vld [vmem:[#allocation4 + $0x3c] sm:$0xf0]  ;;  %v6536_v43 = vld [vmem:[#allocation4 + $0x39c] sm:$0xf] }
 0x1a5   :  { %3607 = vmatpush.bf16.msrb.mxu1 %v5457_v20  ;;  %v2591_v40 = vsel %vm1232_vm15, %v2590_v17, %v2580_v26  ;;  %v2295_v20 = vpop.f32.mrf.mxu3  ;;  %v5996_v17 = vld [vmem:[#allocation4 + $0x488] sm:$0xf]  ;;  %v684_v51 = vpack.c.bf16 %v664_v55, %v664_v55  ;;  %v683_v55 = vpack.c.bf16 %v663_v5, %v663_v5  ;;  %v6601_v5 = vld [vmem:[#allocation4 + $0x5a4] sm:$0xf] }
 0x1a6   :  { %3620 = vmatpush.bf16.msrb.mxu2 %v5617_v23  ;;  %v2595_v23 = vsel %vm1232_vm15, %v2594_v7, %v2582_v41  ;;  %v7444_v49 = vpack.c.b16 %v2591_v40, %v2591_v40  ;;  %v6486_v7 = vld [vmem:[#allocation4 + $0x20c] sm:$0xf]  ;;  %v5997_v36 = vor.u32 %v6568_v3, %v5996_v17  ;;  %v5638_v20 = vld [vmem:[#allocation4 + $0x1cc] sm:$0xf0]  ;;  %v5458_v17 = vld [vmem:[#allocation4 + $0x64] sm:$0xf0] }
 0x1a7   :  { %2562 = vmatpush.bf16.msra.mxu0 %v5368_v50  ;;  %3633 = vmatpush.bf16.msra.mxu3 %v5777_v47  ;;  %v2282_v50 = vpop.f32.mrf.mxu2  ;;  %v2306_v47 = vpop.f32.mrf.mxu0  ;;  %v7451_v12 = vpack.c.b16 %v2595_v23, %v2595_v23  ;;  %v6553_v23 = vld [vmem:[#allocation4 + $0x420] sm:$0xf0]  ;;  %v6471_v3 = vld [vmem:[#allocation4 + $0x194] sm:$0xf] }
 0x1a8   :  { %v7446_v61 = vadd.f32 %v2306_v47, %v2294_v14  ;;  %v5521_v14 = vor.u32 %v6446_v10, %v5518_v6  ;;  %v6476_v50 = vld [vmem:[#allocation4 + $0x1bc] sm:$0xf] }
 0x1a9   :  { %3608 = vmatpush.bf16.msrb.mxu1 %v5437_v16  ;;  %v5701_v16 = vor.u32 %v6491_v48, %v5698_v60 }
 0x1aa   :  { %3621 = vmatpush.bf16.msrb.mxu2 %v5597_v8  ;;  %v5678_v8 = vld [vmem:[#allocation4 + $0x21c] sm:$0xf0] }
 0x1ab   :  { %2563 = vmatpush.bf16.msra.mxu0 %v5348_v0  ;;  %3634 = vmatpush.bf16.msra.mxu3 %v5757_v59  ;;  %v5541_v0 = vor.u32 %v6451_v53, %v5538_v46  ;;  %v689_v59 = vpack.c.bf16 %v669_v62, %v669_v62  ;;  %v5936_v53 = vld [vmem:[#allocation4 + $0x410] sm:$0xf]  ;;  %v5641_v46 = vor.u32 %v6476_v50, %v5638_v20  ;;  %v6056_v62 = vld [vmem:[#allocation4 + $0x500] sm:$0xf]  ;;  %v6566_v20 = vld [vmem:[#allocation4 + $0x48c] sm:$0xf] }
 0x1ac   :  { %v2321_v57 = vpop.f32.mrf.mxu1  ;;  %v5878_v50 = vld [vmem:[#allocation4 + $0x3ac] sm:$0xf0] }
 0x1ad   :  { %3609 = vmatpush.bf16.msrb.mxu1 %v5417_v30  ;;  %v2345_v18 = vpop.f32.mrf.mxu3  ;;  %v6481_v30 = vld [vmem:[#allocation4 + $0x1e4] sm:$0xf]  ;;  %v2589_v33 = vunpack.c.l.b16 %v689_v59  ;;  %v2584_v59 = vunpack.c.l.b16 %v684_v51  ;;  %v6571_v57 = vld [vmem:[#allocation4 + $0x4b4] sm:$0xf]  ;;  %v5998_v51 = vld [vmem:[#allocation4 + $0x49c] sm:$0xf0] }
 0x1ae   :  { %3622 = vmatpush.bf16.msrb.mxu2 %v5577_v34  ;;  %v5977_v34 = vor.u32 %v6563_v13, %v5976_v11  ;;  %v5661_v41 = vor.u32 %v6481_v30, %v5658_v31  ;;  %v5896_v31 = vld [vmem:[#allocation4 + $0x3c0] sm:$0xf] }
 0x1af   :  { %2564 = vmatpush.bf16.msra.mxu0 %v5328_v29  ;;  %3635 = vmatpush.bf16.msra.mxu3 %v5737_v35  ;;  %v2332_v15 = vpop.f32.mrf.mxu2  ;;  %v2308_v27 = vpop.f32.mrf.mxu0  ;;  %v5498_v29 = vld [vmem:[#allocation4 + $0xb4] sm:$0xf0]  ;;  %v6097_v35 = vor.u32 %v6593_v22, %v6096_v19  ;;  %v2598_v47 = vrot.slane %v2589_v33, 7  ;;  %v6466_v22 = vld [vmem:[#allocation4 + $0x16c] sm:$0xf] }
 0x1b0   :  { %3610 = vmatmul.bf16.vlgmr.msrb.gmra.mxu1 %v7444_v49  ;;  %v2333_v25 = vadd.f32 %v2332_v15, %v2319_v58  ;;  %v5501_v40 = vor.u32 %v6441_v24, %v5498_v29  ;;  %v6426_v15 = vld [vmem:[#allocation4 + $0x2c] sm:$0xf]  ;;  %v5598_v24 = vld [vmem:[#allocation4 + $0x17c] sm:$0xf0]  ;;  %v6018_v29 = vld [vmem:[#allocation4 + $0x4c4] sm:$0xf0] }
 0x1b1   :  { %3656 = vmatpush.bf16.msra.mxu1 %v3588_v39  ;;  %3623 = vmatmul.bf16.vlgmr.msrb.gmra.mxu2 %v7449_v63  ;;  %v668_v39 = vperm.slane %v7420_v56, 3  ;;  %v2599_v19 = vsel %vm1232_vm15, %v2598_v47, %v2584_v59  ;;  %v5564_v47 = vld [vmem:[#allocation4 + $0x120] sm:$0xf] }
 0x1b2   :  { %3667 = vmatpush.bf16.msra.mxu2 %v5561_v32  ;;  %5413 = vmatmul.msk.bf16.vlgmr.msra.gmra.mxu0 %vm2226_vm1, %v7331_v28  ;;  %v5681_v28 = vor.u32 %v6486_v7, %v5678_v8  ;;  %v2346_v26 = vadd.f32 %v2345_v18, %v2333_v25  ;;  %v6436_v32 = vld [vmem:[#allocation4 + $0x7c] sm:$0xf]  ;;  %v5937_v7 = vor.u32 %v6553_v23, %v5936_v53  ;;  %v3205_v25 = vunpack.c.h.b16 %v7434_v42 }
 0x1b3   :  { %3641 = vmatpush.bf16.msrb.mxu0 %v6037_v38  ;;  %3680 = vmatpush.bf16.msrb.mxu3 %v5721_v45  ;;  %v6558_v38 = vld [vmem:[#allocation4 + $0x448] sm:$0xf0]  ;;  %v5478_v45 = vld [vmem:[#allocation4 + $0x8c] sm:$0xf0]  ;;  %v688_v58 = vpack.c.bf16 %v668_v39, %v668_v39  ;;  %v5418_v39 = vld [vmem:[#allocation4 + $0x14] sm:$0xf0]  ;;  %v6021_v42 = vor.u32 %v6571_v57, %v6018_v29 }
 0x1b4   :  { %3636 = vmatmul.bf16.vlgmr.msra.gmra.mxu3 %v7451_v12  ;;  %v5957_v52 = vor.u32 %v6558_v38, %v5956_v37  ;;  %v5481_v56 = vor.u32 %v6436_v32, %v5478_v45  ;;  %v2371_v6 = vpop.f32.mrf.mxu1  ;;  %v6543_v37 = vld [vmem:[#allocation4 + $0x3d0] sm:$0xf0]  ;;  %v6421_v38 = vld [vmem:[#allocation4 + $0x4] sm:$0xf]  ;;  %v3395_v44 = vpack.c.b16 %v3205_v25, %v3205_v25 }
 0x1b5   :  { %3657 = vmatpush.bf16.msra.mxu1 %v6137_v2  ;;  %v2347_v60 = vpop.f32.mrf.mxu3  ;;  %v6431_v2 = vld [vmem:[#allocation4 + $0x54] sm:$0xf]  ;;  %v5897_v23 = vor.u32 %v6543_v37, %v5896_v31  ;;  %v6449_v25 = vld [vmem:[#allocation4 + $0xe0] sm:$0xf0]  ;;  %v5818_v31 = vld [vmem:[#allocation4 + $0x334] sm:$0xf0] }
 0x1b6   :  { %3668 = vmatpush.bf16.msra.mxu2 %v5541_v0  ;;  %v5618_v0 = vld [vmem:[#allocation4 + $0x1a4] sm:$0xf0]  ;;  %v5461_v11 = vor.u32 %v6431_v2, %v5458_v17  ;;  %v5881_v60 = vor.u32 %v6536_v43, %v5878_v50  ;;  %v6531_v2 = vld [vmem:[#allocation4 + $0x374] sm:$0xf] }
 0x1b7   :  { %3642 = vmatpush.bf16.msrb.mxu0 %v6017_v1  ;;  %3681 = vmatpush.bf16.msrb.mxu3 %v5701_v16  ;;  %v2334_v48 = vpop.f32.mrf.mxu2  ;;  %v6583_v1 = vld [vmem:[#allocation4 + $0x510] sm:$0xf0]  ;;  %v6576_v16 = vld [vmem:[#allocation4 + $0x4dc] sm:$0xf]  ;;  %v2358_v10 = vpop.f32.mrf.mxu0  ;;  %v5621_v13 = vor.u32 %v6471_v3, %v5618_v0  ;;  %v5858_v17 = vld [vmem:[#allocation4 + $0x384] sm:$0xf0] }
 0x1b8   :  { %v6057_v8 = vor.u32 %v6583_v1, %v6056_v62  ;;  %v6041_v18 = vor.u32 %v6576_v16, %v6038_v4  ;;  %v2583_v48 = vunpack.c.l.b16 %v683_v55  ;;  %v6001_v62 = vor.u32 %v6566_v20, %v5998_v51  ;;  %v6561_v16 = vld [vmem:[#allocation4 + $0x464] sm:$0xf]  ;;  %v5978_v4 = vld [vmem:[#allocation4 + $0x474] sm:$0xf0]  ;;  %v6591_v37 = vld [vmem:[#allocation4 + $0x554] sm:$0xf] }
 0x1b9   :  { %3658 = vmatpush.bf16.msra.mxu1 %v6117_v9  ;;  %v2359_v9 = vadd.f32 %v2358_v10, %v2346_v26  ;;  %v7465_v26 = vpack.c.b16 %v2599_v19, %v2599_v19  ;;  %v3591_v1 = vsel %vm171_vm0, %v3395_v44, 0  ;;  %v6138_v10 = vld [vmem:[#allocation4 + $0x5b4] sm:$0xf0]  ;;  %v5861_v59 = vor.u32 %v6531_v2, %v5858_v17  ;;  %v5958_v19 = vld [vmem:[#allocation4 + $0x44c] sm:$0xf0] }
 0x1ba   :  { %3669 = vmatpush.bf16.msra.mxu2 %v5521_v14  ;;  %v5916_v14 = vld [vmem:[#allocation4 + $0x3e8] sm:$0xf]  ;;  %v6516_v44 = vld [vmem:[#allocation4 + $0x2fc] sm:$0xf]  ;;  %v6546_v20 = vld [vmem:[#allocation4 + $0x3ec] sm:$0xf] }
 0x1bb   :  { %3643 = vmatpush.bf16.msrb.mxu0 %v5997_v36  ;;  %3682 = vmatpush.bf16.msrb.mxu3 %v5681_v28  ;;  %v2588_v36 = vunpack.c.l.b16 %v688_v58  ;;  %v6548_v28 = vld [vmem:[#allocation4 + $0x3f8] sm:$0xf0]  ;;  %v7463_v27 = vadd.f32 %v2371_v6, %v2359_v9  ;;  %v6459_v58 = vld [vmem:[#allocation4 + $0x130] sm:$0xf0]  ;;  %v5544_v6 = vld [vmem:[#allocation4 + $0xf8] sm:$0xf] }
 0x1bc   :  { %v5917_v30 = vor.u32 %v6548_v28, %v5916_v14  ;;  %v2373_v53 = vpop.f32.mrf.mxu1  ;;  %v5565_v3 = vor.u32 %v6459_v58, %v5564_v47  ;;  %v6526_v9 = vld [vmem:[#allocation4 + $0x34c] sm:$0xf]  ;;  %v5918_v51 = vld [vmem:[#allocation4 + $0x3fc] sm:$0xf0]  ;;  %v6439_v47 = vld [vmem:[#allocation4 + $0x90] sm:$0xf0] }
 0x1bd   :  { %3659 = vmatpush.bf16.msra.mxu1 %v6097_v35  ;;  %v2596_v33 = vrot.slane %v2588_v36, 7  ;;  %v5601_v35 = vor.u32 %v6466_v22, %v5598_v24  ;;  %v5981_v36 = vor.u32 %v6561_v16, %v5978_v4  ;;  %v6118_v22 = vld [vmem:[#allocation4 + $0x58c] sm:$0xf0]  ;;  %v6078_v53 = vld [vmem:[#allocation4 + $0x53c] sm:$0xf0] }
 0x1be   :  { %3670 = vmatpush.bf16.msra.mxu2 %v5501_v40  ;;  %v6461_v40 = vld [vmem:[#allocation4 + $0x144] sm:$0xf]  ;;  %v2397_v45 = vpop.f32.mrf.mxu3  ;;  %v5524_v24 = vld [vmem:[#allocation4 + $0xd0] sm:$0xf]  ;;  %v5898_v2 = vld [vmem:[#allocation4 + $0x3d4] sm:$0xf0] }
 0x1bf   :  { %3644 = vmatpush.bf16.msrb.mxu0 %v5977_v34  ;;  %3683 = vmatpush.bf16.msrb.mxu3 %v5661_v41  ;;  %v5441_v34 = vor.u32 %v6426_v15, %v5438_v21  ;;  %v5578_v41 = vld [vmem:[#allocation4 + $0x154] sm:$0xf0]  ;;  %v2384_v32 = vpop.f32.mrf.mxu2  ;;  %v2597_v0 = vsel %vm1232_vm15, %v2596_v33, %v2583_v48  ;;  %v6596_v21 = vld [vmem:[#allocation4 + $0x57c] sm:$0xf]  ;;  %v5525_v33 = vor.u32 %v6449_v25, %v5524_v24  ;;  %v5778_v48 = vld [vmem:[#allocation4 + $0x2e4] sm:$0xf0] }
 0x1c0   :  { %v6121_v55 = vor.u32 %v6596_v21, %v6118_v22  ;;  %v6581_v17 = vld [vmem:[#allocation4 + $0x504] sm:$0xf]  ;;  %v5464_v16 = vld [vmem:[#allocation4 + $0x58] sm:$0xf]  ;;  %v6434_v4 = vld [vmem:[#allocation4 + $0x68] sm:$0xf0] }
 0x1c1   :  { %3660 = vmatpush.bf16.msra.mxu1 %v6077_v54  ;;  %v2360_v54 = vpop.f32.mrf.mxu0  ;;  %v5444_v25 = vld [vmem:[#allocation4 + $0x30] sm:$0xf] }
 0x1c2   :  { %3671 = vmatpush.bf16.msra.mxu2 %v5481_v56  ;;  %v5421_v56 = vor.u32 %v6421_v38, %v5418_v39  ;;  %v6098_v38 = vld [vmem:[#allocation4 + $0x564] sm:$0xf0]  ;;  %v6586_v54 = vld [vmem:[#allocation4 + $0x52c] sm:$0xf] }
 0x1c3   :  { %3645 = vmatpush.bf16.msrb.mxu0 %v5957_v52  ;;  %3684 = vmatpush.bf16.msrb.mxu3 %v5641_v46  ;;  %v7469_v52 = vadd.f32 %v2397_v45, %v2384_v32  ;;  %v5581_v46 = vor.u32 %v6461_v40, %v5578_v41  ;;  %v5504_v39 = vld [vmem:[#allocation4 + $0xa8] sm:$0xf]  ;;  %v5798_v32 = vld [vmem:[#allocation4 + $0x30c] sm:$0xf0]  ;;  %v6101_v45 = vor.u32 %v6591_v37, %v6098_v38  ;;  %v5738_v38 = vld [vmem:[#allocation4 + $0x294] sm:$0xf0] }
 0x1c4   :  { %v5801_v58 = vor.u32 %v6516_v44, %v5798_v32  ;;  %v5724_v32 = vld [vmem:[#allocation4 + $0x260] sm:$0xf] }
 0x1c5   :  { %3661 = vmatpush.bf16.msra.mxu1 %v6057_v8  ;;  %v7473_v8 = vpack.c.b16 %v2597_v0, %v2597_v0 }
 0x1c6   :  { %3672 = vmatpush.bf16.msra.mxu2 %v5461_v11  ;;  %v5838_v11 = vld [vmem:[#allocation4 + $0x35c] sm:$0xf0]  ;;  %v2399_v15 = vpop.f32.mrf.mxu3 }
 0x1c7   :  { %3646 = vmatpush.bf16.msrb.mxu0 %v5937_v7  ;;  %3685 = vmatpush.bf16.msrb.mxu3 %v5621_v13  ;;  %v6454_v7 = vld [vmem:[#allocation4 + $0x108] sm:$0xf0]  ;;  %v6141_v13 = vor.u32 %v6601_v5, %v6138_v10  ;;  %v2386_v28 = vpop.f32.mrf.mxu2  ;;  %v5841_v57 = vor.u32 %v6526_v9, %v5838_v11  ;;  %v5884_v5 = vld [vmem:[#allocation4 + $0x3a0] sm:$0xf] }
 0x1c8   :  { %6154 = vmatmul.msk.bf16.vlgmr.msra.gmra.mxu1 %vm2226_vm1, %v7465_v26  ;;  %v5545_v14 = vor.u32 %v6454_v7, %v5544_v6  ;;  %v6539_v7 = vld [vmem:[#allocation4 + $0x3b0] sm:$0xf0]  ;;  %v5465_v28 = vor.u32 %v6434_v4, %v5464_v16  ;;  %v6506_v15 = vld [vmem:[#allocation4 + $0x2ac] sm:$0xf]  ;;  %v6144_v16 = vld [vmem:[#allocation4 + $0x5a8] sm:$0xf] }
 0x1c9   :  { %3706 = vmatpush.bf16.msrb.mxu1 %v6041_v18  ;;  %v6556_v18 = vld [vmem:[#allocation4 + $0x43c] sm:$0xf]  ;;  %v5885_v22 = vor.u32 %v6539_v7, %v5884_v5 }
 0x1ca   :  { %3673 = vmatpush.bf16.msra.mxu2 %v5441_v34  ;;  %v5961_v29 = vor.u32 %v6556_v18, %v5958_v19  ;;  %v6551_v34 = vld [vmem:[#allocation4 + $0x414] sm:$0xf]  ;;  %v5758_v18 = vld [vmem:[#allocation4 + $0x2bc] sm:$0xf0]  ;;  %v6604_v4 = vld [vmem:[#allocation4 + $0x5b8] sm:$0xf0] }
 0x1cb   :  { %3647 = vmatpush.bf16.msrb.mxu0 %v5917_v30  ;;  %3686 = vmatpush.bf16.msrb.mxu3 %v5601_v35  ;;  %v6521_v30 = vld [vmem:[#allocation4 + $0x324] sm:$0xf]  ;;  %v5938_v35 = vld [vmem:[#allocation4 + $0x424] sm:$0xf0]  ;;  %v7479_v19 = vld [vmem:[#allocation4 + $0x5d0] sm:$0xff] }
 0x1cc   :  { %v5821_v41 = vor.u32 %v6521_v30, %v5818_v31  ;;  %v5941_v43 = vor.u32 %v6551_v34, %v5938_v35  ;;  %v6534_v30 = vld [vmem:[#allocation4 + $0x388] sm:$0xf0]  ;;  %v6024_v31 = vld [vmem:[#allocation4 + $0x4b8] sm:$0xf]  ;;  %v3206_v34 = vunpack.c.l.b16 %v7479_v19 }
 0x1cd   :  { %3707 = vmatpush.bf16.msrb.mxu1 %v6021_v42  ;;  %v6444_v42 = vld [vmem:[#allocation4 + $0xb8] sm:$0xf0]  ;;  %v2423_v40 = vpop.f32.mrf.mxu1 }
 0x1ce   :  { %3674 = vmatpush.bf16.msra.mxu2 %v5421_v56  ;;  %v5505_v50 = vor.u32 %v6444_v42, %v5504_v39  ;;  %v5921_v56 = vor.u32 %v6546_v20, %v5918_v51  ;;  %v5424_v39 = vld [vmem:[#allocation4 + $0x8] sm:$0xf]  ;;  %v6424_v42 = vld [vmem:[#allocation4 + $0x18] sm:$0xf0]  ;;  %v6529_v51 = vld [vmem:[#allocation4 + $0x360] sm:$0xf0] }
 0x1cf   :  { %3648 = vmatpush.bf16.msrb.mxu0 %v5897_v23  ;;  %3687 = vmatpush.bf16.msrb.mxu3 %v5581_v46  ;;  %v5484_v23 = vld [vmem:[#allocation4 + $0x80] sm:$0xf]  ;;  %v6511_v46 = vld [vmem:[#allocation4 + $0x2d4] sm:$0xf] }
 0x1d0   :  { %v5781_v11 = vor.u32 %v6511_v46, %v5778_v48 }
 0x1d1   :  { %3708 = vmatpush.bf16.msrb.mxu1 %v6001_v62  ;;  %3675 = vmatmul.bf16.vlgmr.msra.gmra.mxu2 %v7444_v49  ;;  %v6081_v62 = vor.u32 %v6586_v54, %v6078_v53  ;;  %v6004_v54 = vld [vmem:[#allocation4 + $0x490] sm:$0xf]  ;;  %v6569_v53 = vld [vmem:[#allocation4 + $0x4a0] sm:$0xf0] }
 0x1d2   :  { %3721 = vmatpush.bf16.msrb.mxu2 %v3591_v1  ;;  %3649 = vmatmul.bf16.vlgmr.msrb.gmra.mxu0 %v7473_v8  ;;  %v5485_v1 = vor.u32 %v6439_v47, %v5484_v23  ;;  %v3396_v47 = vpack.c.b16 %v3206_v34, %v3206_v34  ;;  %v6005_v48 = vor.u32 %v6569_v53, %v6004_v54  ;;  %v6594_v34 = vld [vmem:[#allocation4 + $0x568] sm:$0xf0]  ;;  %v6589_v54 = vld [vmem:[#allocation4 + $0x540] sm:$0xf0] }
 0x1d3   :  { %3693 = vmatpush.bf16.msra.mxu0 %v5881_v60  ;;  %3732 = vmatpush.bf16.msra.mxu3 %v5565_v3  ;;  %v6541_v60 = vld [vmem:[#allocation4 + $0x3c4] sm:$0xf]  ;;  %v6058_v3 = vld [vmem:[#allocation4 + $0x514] sm:$0xf0] }
 0x1d4   :  { %3688 = vmatmul.bf16.vlgmr.msrb.gmra.mxu3 %v7449_v63  ;;  %v2436_v0 = vpop.f32.mrf.mxu2 }
 0x1d5   :  { %3709 = vmatpush.bf16.msrb.mxu1 %v5981_v36  ;;  %v2425_v6 = vpop.f32.mrf.mxu1  ;;  %v6579_v36 = vld [vmem:[#allocation4 + $0x4f0] sm:$0xf0] }
 0x1d6   :  { %3722 = vmatpush.bf16.msrb.mxu2 %v6141_v13  ;;  %v2410_v10 = vpop.f32.mrf.mxu0  ;;  %v5901_v13 = vor.u32 %v6541_v60, %v5898_v2  ;;  %v5704_v60 = vld [vmem:[#allocation4 + $0x238] sm:$0xf]  ;;  %v6524_v2 = vld [vmem:[#allocation4 + $0x338] sm:$0xf0] }
 0x1d7   :  { %3694 = vmatpush.bf16.msra.mxu0 %v5861_v59  ;;  %3733 = vmatpush.bf16.msra.mxu3 %v5545_v14  ;;  %v6044_v59 = vld [vmem:[#allocation4 + $0x4e0] sm:$0xf]  ;;  %v2411_v9 = vadd.f32 %v2410_v10, %v7469_v52  ;;  %v6061_v14 = vor.u32 %v6581_v17, %v6058_v3  ;;  %v5761_v52 = vor.u32 %v6506_v15, %v5758_v18  ;;  %v5984_v17 = vld [vmem:[#allocation4 + $0x468] sm:$0xf]  ;;  %v6564_v3 = vld [vmem:[#allocation4 + $0x478] sm:$0xf0] }
 0x1d8   :  { %v6045_v24 = vor.u32 %v6579_v36, %v6044_v59  ;;  %v5985_v7 = vor.u32 %v6564_v3, %v5984_v17  ;;  %v5684_v59 = vld [vmem:[#allocation4 + $0x210] sm:$0xf]  ;;  %v6489_v36 = vld [vmem:[#allocation4 + $0x220] sm:$0xf0]  ;;  %v6124_v15 = vld [vmem:[#allocation4 + $0x580] sm:$0xf] }
 0x1d9   :  { %3710 = vmatpush.bf16.msrb.mxu1 %v5961_v29  ;;  %v2424_v21 = vadd.f32 %v2423_v40, %v2411_v9  ;;  %v5864_v29 = vld [vmem:[#allocation4 + $0x378] sm:$0xf]  ;;  %v5804_v9 = vld [vmem:[#allocation4 + $0x300] sm:$0xf]  ;;  %v6599_v18 = vld [vmem:[#allocation4 + $0x590] sm:$0xf0] }
 0x1da   :  { %3723 = vmatpush.bf16.msrb.mxu2 %v6121_v55  ;;  %v6574_v55 = vld [vmem:[#allocation4 + $0x4c8] sm:$0xf0]  ;;  %v6064_v17 = vld [vmem:[#allocation4 + $0x508] sm:$0xf]  ;;  %v6584_v3 = vld [vmem:[#allocation4 + $0x518] sm:$0xf0] }
 0x1db   :  { %3695 = vmatpush.bf16.msra.mxu0 %v5841_v57  ;;  %3734 = vmatpush.bf16.msra.mxu3 %v5525_v33  ;;  %v6429_v57 = vld [vmem:[#allocation4 + $0x40] sm:$0xf0]  ;;  %v7482_v35 = vadd.f32 %v2436_v0, %v2424_v21  ;;  %v6025_v44 = vor.u32 %v6574_v55, %v6024_v31  ;;  %v3594_v0 = vsel %vm171_vm0, %v3396_v47, 0  ;;  %v5685_v21 = vor.u32 %v6489_v36, %v5684_v59  ;;  %v6514_v31 = vld [vmem:[#allocation4 + $0x2e8] sm:$0xf0] }
 0x1dc   :  { %v6501_v33 = vld [vmem:[#allocation4 + $0x284] sm:$0xf]  ;;  %v5445_v37 = vor.u32 %v6429_v57, %v5444_v25  ;;  %v2438_v40 = vpop.f32.mrf.mxu2  ;;  %v5664_v25 = vld [vmem:[#allocation4 + $0x1e8] sm:$0xf]  ;;  %v6484_v57 = vld [vmem:[#allocation4 + $0x1f8] sm:$0xf0] }
 0x1dd   :  { %3711 = vmatpush.bf16.msrb.mxu1 %v5941_v43  ;;  %v5865_v43 = vor.u32 %v6534_v30, %v5864_v29  ;;  %v5741_v23 = vor.u32 %v6501_v33, %v5738_v38  ;;  %v5784_v29 = vld [vmem:[#allocation4 + $0x2d8] sm:$0xf]  ;;  %v6125_v30 = vor.u32 %v6599_v18, %v6124_v15  ;;  %v5665_v38 = vor.u32 %v6484_v57, %v5664_v25  ;;  %v5644_v40 = vld [vmem:[#allocation4 + $0x1c0] sm:$0xf]  ;;  %v6474_v47 = vld [vmem:[#allocation4 + $0x1a8] sm:$0xf0] }
 0x1de   :  { %3724 = vmatpush.bf16.msrb.mxu2 %v6101_v45  ;;  %v6499_v45 = vld [vmem:[#allocation4 + $0x270] sm:$0xf0]  ;;  %v2412_v20 = vpop.f32.mrf.mxu0  ;;  %v5944_v55 = vld [vmem:[#allocation4 + $0x418] sm:$0xf]  ;;  %v6577_v36 = vld [vmem:[#allocation4 + $0x4e4] sm:$0xf] }
 0x1df   :  { %3696 = vmatpush.bf16.msra.mxu0 %v5821_v41  ;;  %3735 = vmatpush.bf16.msra.mxu3 %v5505_v50  ;;  %v7484_v41 = vpop.f32.mrf.mxu3  ;;  %v5844_v50 = vld [vmem:[#allocation4 + $0x350] sm:$0xf]  ;;  %v6104_v33 = vld [vmem:[#allocation4 + $0x558] sm:$0xf]  ;;  %v6549_v20 = vld [vmem:[#allocation4 + $0x400] sm:$0xf0] }
 0x1e0   :  { %v5845_v46 = vor.u32 %v6529_v51, %v5844_v50  ;;  %v5924_v50 = vld [vmem:[#allocation4 + $0x3f0] sm:$0xf]  ;;  %v5886_v59 = vld [vmem:[#allocation4 + $0x3b4] sm:$0xf0]  ;;  %v6492_v57 = vld [vmem:[#allocation4 + $0x23c] sm:$0xf] }
 0x1e1   :  { %3712 = vmatpush.bf16.msrb.mxu1 %v5921_v56  ;;  %v5725_v56 = vor.u32 %v6499_v45, %v5724_v32  ;;  %v6105_v32 = vor.u32 %v6594_v34, %v6104_v33  ;;  %v6509_v45 = vld [vmem:[#allocation4 + $0x2c0] sm:$0xf0]  ;;  %v6084_v51 = vld [vmem:[#allocation4 + $0x530] sm:$0xf]  ;;  %v5584_v33 = vld [vmem:[#allocation4 + $0x148] sm:$0xf] }
 0x1e2   :  { %3725 = vmatpush.bf16.msrb.mxu2 %v6081_v62  ;;  %v6494_v62 = vld [vmem:[#allocation4 + $0x248] sm:$0xf0]  ;;  %v5604_v18 = vld [vmem:[#allocation4 + $0x170] sm:$0xf] }
 0x1e3   :  { %3697 = vmatpush.bf16.msra.mxu0 %v5801_v58  ;;  %3736 = vmatpush.bf16.msra.mxu3 %v5485_v1  ;;  %v5425_v58 = vor.u32 %v6424_v42, %v5424_v39  ;;  %v5824_v1 = vld [vmem:[#allocation4 + $0x328] sm:$0xf]  ;;  %v5705_v5 = vor.u32 %v6494_v62, %v5704_v60  ;;  %v5785_v39 = vor.u32 %v6514_v31, %v5784_v29  ;;  %v5706_v29 = vld [vmem:[#allocation4 + $0x24c] sm:$0xf0] }
 0x1e4   :  { %v5825_v6 = vor.u32 %v6524_v2, %v5824_v1  ;;  %v5904_v60 = vld [vmem:[#allocation4 + $0x3c8] sm:$0xf]  ;;  %v6085_v62 = vor.u32 %v6589_v54, %v6084_v51  ;;  %v6544_v2 = vld [vmem:[#allocation4 + $0x3d8] sm:$0xf0]  ;;  %v5866_v31 = vld [vmem:[#allocation4 + $0x38c] sm:$0xf0] }
 0x1e5   :  { %3713 = vmatpush.bf16.msrb.mxu1 %v5901_v13  ;;  %v6519_v13 = vld [vmem:[#allocation4 + $0x310] sm:$0xf0] }
 0x1e6   :  { %3726 = vmatpush.bf16.msrb.mxu2 %v6061_v14  ;;  %v5964_v14 = vld [vmem:[#allocation4 + $0x440] sm:$0xf] }
 0x1e7   :  { %3698 = vmatpush.bf16.msra.mxu0 %v5781_v11  ;;  %3737 = vmatpush.bf16.msra.mxu3 %v5465_v28  ;;  %v2451_v10 = vpop.f32.mrf.mxu3  ;;  %v6145_v11 = vor.u32 %v6604_v4, %v6144_v16  ;;  %v6559_v28 = vld [vmem:[#allocation4 + $0x450] sm:$0xf0]  ;;  %v6497_v16 = vld [vmem:[#allocation4 + $0x264] sm:$0xf]  ;;  %v5726_v4 = vld [vmem:[#allocation4 + $0x274] sm:$0xf0] }
 0x1e8   :  { %3714 = vmatmul.bf16.vlgmr.msrb.gmra.mxu1 %v7473_v8  ;;  %v5729_v15 = vor.u32 %v6497_v16, %v5726_v4  ;;  %v6562_v16 = vld [vmem:[#allocation4 + $0x46c] sm:$0xf]  ;;  %v5986_v4 = vld [vmem:[#allocation4 + $0x47c] sm:$0xf0] }
 0x1e9   :  { %3758 = vmatpush.bf16.msra.mxu1 %v5885_v22  ;;  %6155 = vmatmul.msk.bf16.vlgmr.msrb.gmra.mxu2 %vm2226_vm1, %v7465_v26  ;;  %v5805_v22 = vor.u32 %v6519_v13, %v5804_v9  ;;  %v6046_v9 = vld [vmem:[#allocation4 + $0x4f4] sm:$0xf0] }
 0x1ea   :  { %3771 = vmatpush.bf16.msra.mxu2 %v6045_v24  ;;  %v5965_v24 = vor.u32 %v6559_v28, %v5964_v14  ;;  %v5905_v14 = vor.u32 %v6544_v2, %v5904_v60  ;;  %v6065_v28 = vor.u32 %v6584_v3, %v6064_v17  ;;  %v6049_v25 = vor.u32 %v6577_v36, %v6046_v9  ;;  %v5546_v60 = vld [vmem:[#allocation4 + $0x10c] sm:$0xf0]  ;;  %v6482_v2 = vld [vmem:[#allocation4 + $0x1ec] sm:$0xf]  ;;  %v5666_v17 = vld [vmem:[#allocation4 + $0x1fc] sm:$0xf0] }
 0x1eb   :  { %3699 = vmatpush.bf16.msra.mxu0 %v5761_v52  ;;  %3738 = vmatpush.bf16.msra.mxu3 %v5445_v37  ;;  %v6554_v52 = vld [vmem:[#allocation4 + $0x428] sm:$0xf0]  ;;  %v5989_v36 = vor.u32 %v6562_v16, %v5986_v4  ;;  %v6477_v9 = vld [vmem:[#allocation4 + $0x1c4] sm:$0xf]  ;;  %v6460_v4 = vld [vmem:[#allocation4 + $0x138] sm:$0xf0] }
 0x1ec   :  { %v5945_v42 = vor.u32 %v6554_v52, %v5944_v55  ;;  %v6572_v55 = vld [vmem:[#allocation4 + $0x4bc] sm:$0xf]  ;;  %v6026_v52 = vld [vmem:[#allocation4 + $0x4cc] sm:$0xf0]  ;;  %v6522_v3 = vld [vmem:[#allocation4 + $0x32c] sm:$0xf] }
 0x1ed   :  { %3759 = vmatpush.bf16.msra.mxu1 %v5865_v43  ;;  %v2475_v37 = vpop.f32.mrf.mxu1  ;;  %v6479_v43 = vld [vmem:[#allocation4 + $0x1d0] sm:$0xf0] }
 0x1ee   :  { %3772 = vmatpush.bf16.msra.mxu2 %v6025_v44  ;;  %v5764_v44 = vld [vmem:[#allocation4 + $0x2b0] sm:$0xf]  ;;  %v5645_v53 = vor.u32 %v6479_v43, %v5644_v40  ;;  %v5566_v40 = vld [vmem:[#allocation4 + $0x134] sm:$0xf0] }
 0x1ef   :  { %3700 = vmatpush.bf16.msra.mxu0 %v5741_v23  ;;  %3739 = vmatpush.bf16.msra.mxu3 %v5425_v58  ;;  %v5624_v23 = vld [vmem:[#allocation4 + $0x198] sm:$0xf]  ;;  %v5765_v58 = vor.u32 %v6509_v45, %v5764_v44  ;;  %v6487_v45 = vld [vmem:[#allocation4 + $0x214] sm:$0xf] }
 0x1f1   :  { %3760 = vmatpush.bf16.msra.mxu1 %v5845_v46  ;;  %v5744_v46 = vld [vmem:[#allocation4 + $0x288] sm:$0xf] }
 0x1f2   :  { %3773 = vmatpush.bf16.msra.mxu2 %v6005_v48  ;;  %3701 = vmatmul.bf16.vlgmr.msra.gmra.mxu0 %v7451_v12  ;;  %v6504_v48 = vld [vmem:[#allocation4 + $0x298] sm:$0xf0] }
 0x1f3   :  { %3745 = vmatpush.bf16.msrb.mxu0 %v5725_v56  ;;  %3786 = vmatpush.bf16.msrb.mxu3 %v3594_v0  ;;  %v5925_v56 = vor.u32 %v6549_v20, %v5924_v50  ;;  %v5745_v13 = vor.u32 %v6504_v48, %v5744_v46  ;;  %v5686_v50 = vld [vmem:[#allocation4 + $0x224] sm:$0xf0]  ;;  %v6527_v20 = vld [vmem:[#allocation4 + $0x354] sm:$0xf]  ;;  %v6452_v48 = vld [vmem:[#allocation4 + $0xfc] sm:$0xf] }
 0x1f4   :  { %3740 = vmatmul.bf16.vlgmr.msra.gmra.mxu3 %v7444_v49  ;;  %v2488_v1 = vpop.f32.mrf.mxu2  ;;  %v5689_v46 = vor.u32 %v6487_v45, %v5686_v50  ;;  %v5766_v45 = vld [vmem:[#allocation4 + $0x2c4] sm:$0xf0]  ;;  %v6547_v50 = vld [vmem:[#allocation4 + $0x3f4] sm:$0xf] }
 0x1f5   :  { %3761 = vmatpush.bf16.msra.mxu1 %v5825_v6  ;;  %v2501_v0 = vpop.f32.mrf.mxu3  ;;  %v2477_v6 = vpop.f32.mrf.mxu1 }
 0x1f6   :  { %3774 = vmatpush.bf16.msra.mxu2 %v5985_v7  ;;  %v5625_v7 = vor.u32 %v6474_v47, %v5624_v23  ;;  %v6567_v23 = vld [vmem:[#allocation4 + $0x494] sm:$0xf]  ;;  %v6006_v47 = vld [vmem:[#allocation4 + $0x4a4] sm:$0xf0] }
 0x1f7   :  { %3746 = vmatpush.bf16.msrb.mxu0 %v5705_v5  ;;  %3787 = vmatpush.bf16.msrb.mxu3 %v6145_v11  ;;  %v6537_v5 = vld [vmem:[#allocation4 + $0x3a4] sm:$0xf]  ;;  %v2462_v10 = vpop.f32.mrf.mxu0  ;;  %v6447_v6 = vld [vmem:[#allocation4 + $0xd4] sm:$0xf] }
 0x1f8   :  { %v2463_v11 = vadd.f32 %v2462_v10, %v7484_v41  ;;  %v5669_v10 = vor.u32 %v6482_v2, %v5666_v17  ;;  %v6542_v17 = vld [vmem:[#allocation4 + $0x3cc] sm:$0xf] }
 0x1f9   :  { %3762 = vmatpush.bf16.msra.mxu1 %v5805_v22 }
 0x1fa   :  { %3775 = vmatpush.bf16.msra.mxu2 %v5965_v24  ;;  %v2476_v22 = vadd.f32 %v2475_v37, %v2463_v11  ;;  %v5889_v24 = vor.u32 %v6537_v5, %v5886_v59  ;;  %v6457_v37 = vld [vmem:[#allocation4 + $0x124] sm:$0xf]  ;;  %v5549_v5 = vor.u32 %v6452_v48, %v5546_v60  ;;  %v5646_v11 = vld [vmem:[#allocation4 + $0x1d4] sm:$0xf0]  ;;  %v5586_v48 = vld [vmem:[#allocation4 + $0x15c] sm:$0xf0] }
 0x1fb   :  { %3747 = vmatpush.bf16.msrb.mxu0 %v5685_v21  ;;  %3788 = vmatpush.bf16.msrb.mxu3 %v6125_v30  ;;  %v6469_v21 = vld [vmem:[#allocation4 + $0x180] sm:$0xf0]  ;;  %v6532_v30 = vld [vmem:[#allocation4 + $0x37c] sm:$0xf]  ;;  %v6502_v60 = vld [vmem:[#allocation4 + $0x28c] sm:$0xf] }
 0x1fc   :  { %v5605_v41 = vor.u32 %v6469_v21, %v5604_v18  ;;  %v2489_v34 = vadd.f32 %v2488_v1, %v2476_v22  ;;  %v5869_v44 = vor.u32 %v6532_v30, %v5866_v31  ;;  %v6009_v1 = vor.u32 %v6567_v23, %v6006_v47  ;;  %v6442_v22 = vld [vmem:[#allocation4 + $0xac] sm:$0xf]  ;;  %v5626_v30 = vld [vmem:[#allocation4 + $0x1ac] sm:$0xf0]  ;;  %v6512_v31 = vld [vmem:[#allocation4 + $0x2dc] sm:$0xf] }
 0x1fd   :  { %3763 = vmatpush.bf16.msra.mxu1 %v5785_v39  ;;  %v5709_v39 = vor.u32 %v6492_v57, %v5706_v29  ;;  %v2503_v43 = vpop.f32.mrf.mxu3  ;;  %v5649_v21 = vor.u32 %v6477_v9, %v5646_v11  ;;  %v6472_v29 = vld [vmem:[#allocation4 + $0x19c] sm:$0xf]  ;;  %v5466_v47 = vld [vmem:[#allocation4 + $0x6c] sm:$0xf0] }
 0x1fe   :  { %3776 = vmatpush.bf16.msra.mxu2 %v5945_v42  ;;  %v6464_v42 = vld [vmem:[#allocation4 + $0x158] sm:$0xf0]  ;;  %v7493_v51 = vadd.f32 %v2501_v0, %v2489_v34  ;;  %v5826_v0 = vld [vmem:[#allocation4 + $0x33c] sm:$0xf0]  ;;  %v6467_v43 = vld [vmem:[#allocation4 + $0x174] sm:$0xf] }
 0x1ff   :  { %3748 = vmatpush.bf16.msrb.mxu0 %v5665_v38  ;;  %3789 = vmatpush.bf16.msrb.mxu3 %v6105_v32  ;;  %v2490_v38 = vpop.f32.mrf.mxu2  ;;  %v6029_v32 = vor.u32 %v6572_v55, %v6026_v52  ;;  %v2464_v54 = vpop.f32.mrf.mxu0  ;;  %v5829_v59 = vor.u32 %v6522_v3, %v5826_v0  ;;  %v5786_v55 = vld [vmem:[#allocation4 + $0x2ec] sm:$0xf0]  ;;  %v6552_v52 = vld [vmem:[#allocation4 + $0x41c] sm:$0xf]  ;;  %v5906_v3 = vld [vmem:[#allocation4 + $0x3dc] sm:$0xf0] }
 0x200   :  { %v5629_v38 = vor.u32 %v6472_v29, %v5626_v30  ;;  %v6432_v23 = vld [vmem:[#allocation4 + $0x5c] sm:$0xf]  ;;  %v5572_v0 = vld [vmem:[#allocation4 + $0x128] sm:$0xf]  ;;  %v6455_v29 = vld [vmem:[#allocation4 + $0x110] sm:$0xf0] }
 0x201   :  { %3764 = vmatpush.bf16.msra.mxu1 %v5765_v58  ;;  %v5585_v58 = vor.u32 %v6464_v42, %v5584_v33  ;;  %v5486_v42 = vld [vmem:[#allocation4 + $0x94] sm:$0xf0]  ;;  %v6540_v9 = vld [vmem:[#allocation4 + $0x3b8] sm:$0xf0]  ;;  %v5712_v30 = vld [vmem:[#allocation4 + $0x240] sm:$0xf] }
 0x202   :  { %3777 = vmatpush.bf16.msra.mxu2 %v5925_v56  ;;  %v5569_v56 = vor.u32 %v6457_v37, %v5566_v40  ;;  %v5789_v37 = vor.u32 %v6512_v31, %v5786_v55  ;;  %v6495_v31 = vld [vmem:[#allocation4 + $0x250] sm:$0xf0]  ;;  %v5872_v55 = vld [vmem:[#allocation4 + $0x380] sm:$0xf] }
 0x203   :  { %3749 = vmatpush.bf16.msrb.mxu0 %v5645_v53  ;;  %3790 = vmatpush.bf16.msrb.mxu3 %v6085_v62  ;;  %v5846_v53 = vld [vmem:[#allocation4 + $0x364] sm:$0xf0] }
 0x204   :  { %v5849_v62 = vor.u32 %v6527_v20, %v5846_v53  ;;  %v5926_v20 = vld [vmem:[#allocation4 + $0x404] sm:$0xf0] }
 0x205   :  { %3765 = vmatpush.bf16.msra.mxu1 %v5745_v13  ;;  %v6517_v13 = vld [vmem:[#allocation4 + $0x304] sm:$0xf] }
 0x206   :  { %3778 = vmatpush.bf16.msra.mxu2 %v5905_v14  ;;  %v5806_v14 = vld [vmem:[#allocation4 + $0x314] sm:$0xf0] }
 0x207   :  { %3750 = vmatpush.bf16.msrb.mxu0 %v5625_v7  ;;  %3791 = vmatpush.bf16.msrb.mxu3 %v6065_v28  ;;  %v5526_v7 = vld [vmem:[#allocation4 + $0xe4] sm:$0xf0]  ;;  %v6557_v28 = vld [vmem:[#allocation4 + $0x444] sm:$0xf] }
 0x208   :  { %3766 = vmatmul.bf16.vlgmr.msra.gmra.mxu1 %v7451_v12  ;;  %v5529_v18 = vor.u32 %v6447_v6, %v5526_v7  ;;  %v5469_v7 = vor.u32 %v6432_v23, %v5466_v47 }
 0x209   :  { %3810 = vmatpush.bf16.msrb.mxu1 %v5729_v15  ;;  %3779 = vmatmul.bf16.vlgmr.msra.gmra.mxu2 %v7473_v8  ;;  %v5966_v15 = vld [vmem:[#allocation4 + $0x454] sm:$0xf0] }
 0x20a   :  { %3823 = vmatpush.bf16.msrb.mxu2 %v5889_v24  ;;  %6156 = vmatmul.msk.bf16.vlgmr.msrb.gmra.mxu3 %vm2226_vm1, %v7465_v26  ;;  %v5506_v24 = vld [vmem:[#allocation4 + $0xbc] sm:$0xf0]  ;;  %v5969_v57 = vor.u32 %v6557_v28, %v5966_v15  ;;  %v5573_v28 = vor.u32 %v6460_v4, %v5572_v0  ;;  %v6525_v0 = vld [vmem:[#allocation4 + $0x340] sm:$0xf0] }
 0x20b   :  { %3836 = vmatpush.bf16.msra.mxu3 %v6049_v25  ;;  %3751 = vmatpush.bf16.msrb.mxu0 %v5605_v41  ;;  %v5809_v25 = vor.u32 %v6517_v13, %v5806_v14  ;;  %v5946_v41 = vld [vmem:[#allocation4 + $0x42c] sm:$0xf0]  ;;  %v5509_v34 = vor.u32 %v6442_v22, %v5506_v24  ;;  %v5909_v14 = vor.u32 %v6542_v17, %v5906_v3  ;;  %v5552_v22 = vld [vmem:[#allocation4 + $0x100] sm:$0xf]  ;;  %v3207_v24 = vunpack.c.h.b16 %v7479_v19  ;;  %v6485_v17 = vld [vmem:[#allocation4 + $0x200] sm:$0xf0] }
 0x20c   :  { %v5949_v40 = vor.u32 %v6552_v52, %v5946_v41  ;;  %v6535_v52 = vld [vmem:[#allocation4 + $0x390] sm:$0xf0]  ;;  %v5713_v19 = vor.u32 %v6495_v31, %v5712_v30  ;;  %v5832_v3 = vld [vmem:[#allocation4 + $0x330] sm:$0xf]  ;;  %v5792_v31 = vld [vmem:[#allocation4 + $0x2e0] sm:$0xf] }
 0x20d   :  { %3811 = vmatpush.bf16.msrb.mxu1 %v5709_v39  ;;  %v2527_v33 = vpop.f32.mrf.mxu1  ;;  %v6437_v39 = vld [vmem:[#allocation4 + $0x84] sm:$0xf]  ;;  %v6475_v30 = vld [vmem:[#allocation4 + $0x1b0] sm:$0xf0] }
 0x20e   :  { %3824 = vmatpush.bf16.msrb.mxu2 %v5869_v44  ;;  %v5606_v44 = vld [vmem:[#allocation4 + $0x184] sm:$0xf0]  ;;  %v5489_v54 = vor.u32 %v6437_v39, %v5486_v42  ;;  %v5553_v39 = vor.u32 %v6455_v29, %v5552_v22  ;;  %v6422_v42 = vld [vmem:[#allocation4 + $0xc] sm:$0xf]  ;;  %v5632_v29 = vld [vmem:[#allocation4 + $0x1a0] sm:$0xf] }
 0x20f   :  { %3837 = vmatpush.bf16.msra.mxu3 %v6029_v32  ;;  %3752 = vmatpush.bf16.msrb.mxu0 %v5585_v58  ;;  %v6507_v32 = vld [vmem:[#allocation4 + $0x2b4] sm:$0xf]  ;;  %v5609_v53 = vor.u32 %v6467_v43, %v5606_v44  ;;  %v6462_v58 = vld [vmem:[#allocation4 + $0x14c] sm:$0xf]  ;;  %v5873_v43 = vor.u32 %v6535_v52, %v5872_v55  ;;  %v5532_v44 = vld [vmem:[#allocation4 + $0xd8] sm:$0xf] }
 0x210   :  { %v6515_v55 = vld [vmem:[#allocation4 + $0x2f0] sm:$0xf0] }
 0x211   :  { %3812 = vmatpush.bf16.msrb.mxu1 %v5689_v46  ;;  %v5929_v46 = vor.u32 %v6547_v50, %v5926_v20  ;;  %v6490_v20 = vld [vmem:[#allocation4 + $0x228] sm:$0xf0] }
 0x212   :  { %3825 = vmatpush.bf16.msrb.mxu2 %v5849_v62  ;;  %3753 = vmatmul.bf16.vlgmr.msrb.gmra.mxu0 %v7449_v63  ;;  %v5746_v62 = vld [vmem:[#allocation4 + $0x29c] sm:$0xf0] }
 0x213   :  { %3797 = vmatpush.bf16.msra.mxu0 %v5569_v56  ;;  %3838 = vmatpush.bf16.msra.mxu3 %v6009_v1  ;;  %v5769_v56 = vor.u32 %v6507_v32, %v5766_v45  ;;  %v5749_v13 = vor.u32 %v6502_v60, %v5746_v62  ;;  %v6450_v32 = vld [vmem:[#allocation4 + $0xe8] sm:$0xf0]  ;;  %v5692_v45 = vld [vmem:[#allocation4 + $0x218] sm:$0xf]  ;;  %v5512_v62 = vld [vmem:[#allocation4 + $0xb0] sm:$0xf] }
 0x214   :  { %v2540_v1 = vpop.f32.mrf.mxu2 }
 0x215   :  { %3813 = vmatpush.bf16.msrb.mxu1 %v5669_v10  ;;  %v2553_v2 = vpop.f32.mrf.mxu3  ;;  %v2529_v16 = vpop.f32.mrf.mxu1  ;;  %v6500_v10 = vld [vmem:[#allocation4 + $0x278] sm:$0xf0] }
 0x216   :  { %3826 = vmatpush.bf16.msrb.mxu2 %v5829_v59  ;;  %v5589_v59 = vor.u32 %v6462_v58, %v5586_v48  ;;  %v5533_v58 = vor.u32 %v6450_v32, %v5532_v44  ;;  %v5693_v48 = vor.u32 %v6490_v20, %v5692_v45  ;;  %v5452_v44 = vld [vmem:[#allocation4 + $0x38] sm:$0xf]  ;;  %v6430_v32 = vld [vmem:[#allocation4 + $0x48] sm:$0xf0] }
 0x217   :  { %3798 = vmatpush.bf16.msra.mxu0 %v5549_v5  ;;  %3839 = vmatpush.bf16.msra.mxu3 %v5989_v36  ;;  %v5732_v5 = vld [vmem:[#allocation4 + $0x268] sm:$0xf]  ;;  %v2514_v6 = vpop.f32.mrf.mxu0  ;;  %v5612_v45 = vld [vmem:[#allocation4 + $0x178] sm:$0xf] }
 0x218   :  { %v5892_v36 = vld [vmem:[#allocation4 + $0x3a8] sm:$0xf]  ;;  %v2528_v11 = vadd.f32 %v2527_v33, %v2514_v6  ;;  %v5733_v15 = vor.u32 %v6500_v10, %v5732_v5  ;;  %v6597_v5 = vld [vmem:[#allocation4 + $0x584] sm:$0xf]  ;;  %v6126_v10 = vld [vmem:[#allocation4 + $0x594] sm:$0xf0] }
 0x219   :  { %3814 = vmatpush.bf16.msrb.mxu1 %v5649_v21  ;;  %v5446_v21 = vld [vmem:[#allocation4 + $0x44] sm:$0xf0]  ;;  %v5772_v20 = vld [vmem:[#allocation4 + $0x2b8] sm:$0xf] }
 0x21a   :  { %3827 = vmatpush.bf16.msrb.mxu2 %v5809_v25  ;;  %v2541_v25 = vadd.f32 %v2540_v1, %v2528_v11  ;;  %v6445_v1 = vld [vmem:[#allocation4 + $0xc0] sm:$0xf0]  ;;  %v6480_v11 = vld [vmem:[#allocation4 + $0x1d8] sm:$0xf0] }
 0x21b   :  { %3799 = vmatpush.bf16.msra.mxu0 %v5529_v18  ;;  %3840 = vmatpush.bf16.msra.mxu3 %v5969_v57  ;;  %v6427_v18 = vld [vmem:[#allocation4 + $0x34] sm:$0xf]  ;;  %v5893_v57 = vor.u32 %v6540_v9, %v5892_v36  ;;  %v5513_v4 = vor.u32 %v6445_v1, %v5512_v62  ;;  %v6440_v36 = vld [vmem:[#allocation4 + $0x98] sm:$0xf0]  ;;  %v5652_v9 = vld [vmem:[#allocation4 + $0x1c8] sm:$0xf] }
 0x21c   :  { %v5449_v41 = vor.u32 %v6427_v18, %v5446_v21  ;;  %v7501_v33 = vadd.f32 %v2553_v2, %v2541_v25  ;;  %v5672_v2 = vld [vmem:[#allocation4 + $0x1f0] sm:$0xf]  ;;  %v6592_v18 = vld [vmem:[#allocation4 + $0x55c] sm:$0xf]  ;;  %v5653_v22 = vor.u32 %v6480_v11, %v5652_v9  ;;  %v5472_v25 = vld [vmem:[#allocation4 + $0x60] sm:$0xf] }
 0x21d   :  { %3815 = vmatpush.bf16.msrb.mxu1 %v5629_v38  ;;  %v2555_v38 = vpop.f32.mrf.mxu3  ;;  %v5673_v6 = vor.u32 %v6485_v17, %v5672_v2  ;;  %v6106_v21 = vld [vmem:[#allocation4 + $0x56c] sm:$0xf0]  ;;  %v6465_v1 = vld [vmem:[#allocation4 + $0x160] sm:$0xf0] }
 0x21e   :  { %3828 = vmatpush.bf16.msrb.mxu2 %v5789_v37  ;;  %v5426_v37 = vld [vmem:[#allocation4 + $0x1c] sm:$0xf0]  ;;  %v5592_v62 = vld [vmem:[#allocation4 + $0x150] sm:$0xf]  ;;  %v6505_v17 = vld [vmem:[#allocation4 + $0x2a0] sm:$0xf0] }
 0x21f   :  { %3800 = vmatpush.bf16.msra.mxu0 %v5509_v34  ;;  %3841 = vmatpush.bf16.msra.mxu3 %v5949_v40  ;;  %v2542_v34 = vpop.f32.mrf.mxu2  ;;  %v3397_v40 = vpack.c.b16 %v3207_v24, %v3207_v24  ;;  %v2516_v50 = vpop.f32.mrf.mxu0  ;;  %v5429_v23 = vor.u32 %v6422_v42, %v5426_v37  ;;  %v985_v42 = vld [vmem:[#allocation4 + $0x5d8] sm:$0xf]  ;;  %v5752_v2 = vld [vmem:[#allocation4 + $0x290] sm:$0xf] }
 0x220   :  { %v6109_v34 = vor.u32 %v6592_v18, %v6106_v21  ;;  %v6470_v50 = vld [vmem:[#allocation4 + $0x188] sm:$0xf0]  ;;  %v5753_v9 = vor.u32 %v6505_v17, %v5752_v2  ;;  %v6152_v18 = vld [vmem:[#allocation4 + $0x5b0] sm:$0xf]  ;;  %v6605_v21 = vld [vmem:[#allocation4 + $0x5c0] sm:$0xf0] }
 0x221   :  { %3816 = vmatpush.bf16.msrb.mxu1 %v5609_v53  ;;  %v6530_v53 = vld [vmem:[#allocation4 + $0x368] sm:$0xf0]  ;;  %v3597_v47 = vsel %vm171_vm0, %v3397_v40, 0  ;;  %v5633_v40 = vor.u32 %v6475_v30, %v5632_v29  ;;  %v6803_v2 = vld [vmem:[#allocation9 + $0x60] sm:$0xff] }
 0x222   :  { %3829 = vmatpush.bf16.msrb.mxu2 %v5769_v56  ;;  %v6602_v56 = vld [vmem:[#allocation4 + $0x5ac] sm:$0xf] }
 0x223   :  { %3801 = vmatpush.bf16.msra.mxu0 %v5489_v54  ;;  %3842 = vmatpush.bf16.msra.mxu3 %v5929_v46  ;;  %v5852_v54 = vld [vmem:[#allocation4 + $0x358] sm:$0xf]  ;;  %v6146_v46 = vld [vmem:[#allocation4 + $0x5bc] sm:$0xf0]  ;;  %v6570_v29 = vld [vmem:[#allocation4 + $0x4a8] sm:$0xf0] }
 0x224   :  { %v5853_v60 = vor.u32 %v6530_v53, %v5852_v54  ;;  %v6149_v16 = vor.u32 %v6602_v56, %v6146_v46  ;;  %v6510_v54 = vld [vmem:[#allocation4 + $0x2c8] sm:$0xf0]  ;;  %v3208_v53 = vunpack.c.l.b16 %v985_v42  ;;  %v6066_v56 = vld [vmem:[#allocation4 + $0x51c] sm:$0xf0]  ;;  %v5613_v46 = vor.u32 %v6470_v50, %v5612_v45  ;;  %v5992_v42 = vld [vmem:[#allocation4 + $0x470] sm:$0xf] }
 0x225   :  { %3817 = vmatpush.bf16.msrb.mxu1 %v5589_v59  ;;  %v5492_v59 = vld [vmem:[#allocation4 + $0x88] sm:$0xf] }
 0x226   :  { %3830 = vmatpush.bf16.msrb.mxu2 %v5749_v13  ;;  %v5812_v13 = vld [vmem:[#allocation4 + $0x308] sm:$0xf] }
 0x227   :  { %3802 = vmatpush.bf16.msra.mxu0 %v5469_v7  ;;  %3843 = vmatpush.bf16.msra.mxu3 %v5909_v14  ;;  %v5833_v7 = vor.u32 %v6525_v0, %v5832_v3  ;;  %v6520_v14 = vld [vmem:[#allocation4 + $0x318] sm:$0xf0] }
 0x228   :  { %3818 = vmatmul.bf16.vlgmr.msrb.gmra.mxu1 %v7449_v63  ;;  %v5813_v24 = vor.u32 %v6520_v14, %v5812_v13  ;;  %v6032_v13 = vld [vmem:[#allocation4 + $0x4c0] sm:$0xf]  ;;  %v6575_v14 = vld [vmem:[#allocation4 + $0x4d0] sm:$0xf0] }
 0x229   :  { %3862 = vmatpush.bf16.msra.mxu1 %v5573_v28  ;;  %3831 = vmatmul.bf16.vlgmr.msrb.gmra.mxu2 %v7451_v12  ;;  %v6129_v28 = vor.u32 %v6597_v5, %v6126_v10  ;;  %v3398_v5 = vpack.c.b16 %v3208_v53, %v3208_v53  ;;  %v6092_v53 = vld [vmem:[#allocation4 + $0x538] sm:$0xf] }
 0x22a   :  { %3875 = vmatpush.bf16.msra.mxu2 %v5733_v15  ;;  %3844 = vmatmul.bf16.vlgmr.msra.gmra.mxu3 %v7473_v8  ;;  %v5493_v15 = vor.u32 %v6440_v36, %v5492_v59  ;;  %v5593_v36 = vor.u32 %v6465_v1, %v5592_v62  ;;  %v6072_v62 = vld [vmem:[#allocation4 + $0x510] sm:$0xf]  ;;  %v6585_v1 = vld [vmem:[#allocation4 + $0x520] sm:$0xf0] }
 0x22b   :  { %3888 = vmatpush.bf16.msrb.mxu3 %v5893_v57  ;;  %3803 = vmatpush.bf16.msra.mxu0 %v5449_v41  ;;  %v6435_v57 = vld [vmem:[#allocation4 + $0x70] sm:$0xf0] }
 0x22c   :  { %v5473_v38 = vor.u32 %v6435_v57, %v5472_v25  ;;  %v6797_v25 = vld [vmem:[#allocation9 + $0x30] sm:$0xff]  ;;  %v6012_v57 = vld [vmem:[#allocation4 + $0x498] sm:$0xf] }
 0x22d   :  { %3863 = vmatpush.bf16.msra.mxu1 %v5553_v39  ;;  %v7508_v41 = vpop.f32.mrf.mxu1  ;;  %v6587_v39 = vld [vmem:[#allocation4 + $0x534] sm:$0xf] }
 0x22e   :  { %3876 = vmatpush.bf16.msra.mxu2 %v5713_v19  ;;  %v6086_v19 = vld [vmem:[#allocation4 + $0x544] sm:$0xf0] }
 0x22f   :  { %3889 = vmatpush.bf16.msrb.mxu3 %v5873_v43  ;;  %3804 = vmatpush.bf16.msra.mxu0 %v5429_v23  ;;  %v2566_v52 = vpop.f32.mrf.mxu0  ;;  %v5793_v43 = vor.u32 %v6515_v55, %v5792_v31  ;;  %v6089_v23 = vor.u32 %v6587_v39, %v6086_v19  ;;  %v6132_v55 = vld [vmem:[#allocation4 + $0x588] sm:$0xf]  ;;  %v6796_v19 = vld [vmem:[#allocation9 + $0x28] sm:$0xff] }
 0x230   :  { %v7511_v37 = vadd.f32 %v2566_v52, %v7501_v33  ;;  %v5773_v33 = vor.u32 %v6510_v54, %v5772_v20  ;;  %v6600_v52 = vld [vmem:[#allocation4 + $0x598] sm:$0xf0]  ;;  %v5972_v20 = vld [vmem:[#allocation4 + $0x448] sm:$0xf]  ;;  %v3612_v54 = vadd.f32 %v7508_v41, %v7446_v61  ;;  %v7529_v61 = vld [vmem:[%s7644_s8] sm:$0x1f] }
 0x231   :  { %3864 = vmatpush.bf16.msra.mxu1 %v5533_v58  ;;  %v6582_v58 = vld [vmem:[#allocation4 + $0x50c] sm:$0xf]  ;;  %v6133_v39 = vor.u32 %v6600_v52, %v6132_v55 }
 0x232   :  { %3877 = vmatpush.bf16.msra.mxu2 %v5693_v48  ;;  %3805 = vmatmul.bf16.vlgmr.msra.gmra.mxu0 %v7444_v49  ;;  %v5432_v48 = vld [vmem:[#allocation4 + $0x10] sm:$0xf]  ;;  %v6813_v55 = vld [vmem:[#allocation9 + $0xb0] sm:$0xff] }
 0x233   :  { %3851 = vmatpush.bf16.msrb.mxu0 %v3597_v47  ;;  %3890 = vmatpush.bf16.msrb.mxu3 %v5853_v60  ;;  %v5453_v47 = vor.u32 %v6430_v32, %v5452_v44  ;;  %v6425_v60 = vld [vmem:[#allocation4 + $0x20] sm:$0xf0]  ;;  %v6595_v44 = vld [vmem:[#allocation4 + $0x570] sm:$0xf0]  ;;  %v6805_v32 = vld [vmem:[#allocation9 + $0x70] sm:$0xff] }
 0x234   :  { %v7513_v3 = vpop.f32.mrf.mxu2  ;;  %v5433_v59 = vor.u32 %v6425_v60, %v5432_v48  ;;  %v5952_v48 = vld [vmem:[#allocation4 + $0x420] sm:$0xf]  ;;  %v6555_v60 = vld [vmem:[#allocation4 + $0x430] sm:$0xf0] }
 0x235   :  { %3865 = vmatpush.bf16.msra.mxu1 %v5513_v4  ;;  %v6580_v4 = vld [vmem:[#allocation4 + $0x4f8] sm:$0xf0] }
 0x236   :  { %3878 = vmatpush.bf16.msra.mxu2 %v5673_v6  ;;  %v3613_v6 = vpop.f32.mrf.mxu1 }
 0x237   :  { %3852 = vmatpush.bf16.msrb.mxu0 %v6149_v16  ;;  %3891 = vmatpush.bf16.msrb.mxu3 %v5833_v7  ;;  %v7515_v0 = vpop.f32.mrf.mxu3  ;;  %v6052_v16 = vld [vmem:[#allocation4 + $0x4e8] sm:$0xf]  ;;  %v2568_v10 = vpop.f32.mrf.mxu0  ;;  %v6069_v7 = vor.u32 %v6582_v58, %v6066_v56  ;;  %v3625_v58 = vadd.f32 %v7513_v3, %v3612_v54  ;;  %v3929_v6 = vperm.slane %v7529_v61, 0 }
 0x238   :  { %v6053_v11 = vor.u32 %v6580_v4, %v6052_v16  ;;  %v5953_v16 = vor.u32 %v6555_v60, %v5952_v48  ;;  %v6073_v4 = vor.u32 %v6585_v1, %v6072_v62  ;;  %v6822_v48 = vld [vmem:[#allocation9 + $0xf8] sm:$0xff] }
 0x239   :  { %3866 = vmatpush.bf16.msra.mxu1 %v5493_v15  ;;  %v6798_v15 = vld [vmem:[#allocation9 + $0x38] sm:$0xff]  ;;  %v3638_v41 = vadd.f32 %v7515_v0, %v3625_v58 }
 0x23a   :  { %3879 = vmatpush.bf16.msra.mxu2 %v5653_v22  ;;  %v6033_v22 = vor.u32 %v6575_v14, %v6032_v13  ;;  %v6792_v13 = vld [vmem:[#allocation9 + $0x8] sm:$0xff]  ;;  %v5912_v14 = vld [vmem:[#allocation4 + $0x3d0] sm:$0xf] }
 0x23b   :  { %3853 = vmatpush.bf16.msrb.mxu0 %v6129_v28  ;;  %3892 = vmatpush.bf16.msrb.mxu3 %v5813_v24  ;;  %v3600_v28 = vsel %vm171_vm0, %v3398_v5, 0  ;;  %v6153_v24 = vor.u32 %v6605_v21, %v6152_v18  ;;  %v6793_v5 = vld [vmem:[#allocation9 + $0x10] sm:$0xff] }
 0x23c   :  { %v3626_v30 = vpop.f32.mrf.mxu2 }
 0x23d   :  { %3867 = vmatpush.bf16.msra.mxu1 %v5473_v38  ;;  %v6013_v38 = vor.u32 %v6570_v29, %v6012_v57  ;;  %v6791_v57 = vld [vmem:[#allocation9] sm:$0xff]  ;;  %v6800_v29 = vld [vmem:[#allocation9 + $0x48] sm:$0xff]  ;;  %v6814_v30 = vld [vmem:[#allocation9 + $0xb8] sm:$0xff] }
 0x23e   :  { %3880 = vmatpush.bf16.msra.mxu2 %v5633_v40  ;;  %v6565_v40 = vld [vmem:[#allocation4 + $0x480] sm:$0xf0] }
 0x23f   :  { %3854 = vmatpush.bf16.msrb.mxu0 %v6109_v34  ;;  %3893 = vmatpush.bf16.msrb.mxu3 %v5793_v43  ;;  %v3639_v31 = vpop.f32.mrf.mxu3  ;;  %v6806_v34 = vld [vmem:[#allocation9 + $0x78] sm:$0xff]  ;;  %v6112_v43 = vld [vmem:[#allocation4 + $0x560] sm:$0xf] }
 0x240   :  { %v6113_v50 = vor.u32 %v6595_v44, %v6112_v43 }
 0x241   :  { %3868 = vmatpush.bf16.msra.mxu1 %v5453_v47  ;;  %v6804_v47 = vld [vmem:[#allocation9 + $0x68] sm:$0xff] }
 0x242   :  { %3881 = vmatpush.bf16.msra.mxu2 %v5613_v46 }
 0x243   :  { %3855 = vmatpush.bf16.msrb.mxu0 %v6089_v23  ;;  %3894 = vmatpush.bf16.msrb.mxu3 %v5773_v33  ;;  %v6590_v23 = vld [vmem:[#allocation4 + $0x548] sm:$0xf0]  ;;  %v6794_v33 = vld [vmem:[#allocation9 + $0x18] sm:$0xff] }
 0x244   :  { %v6093_v46 = vor.u32 %v6590_v23, %v6092_v53 }
 0x245   :  { %3869 = vmatpush.bf16.msra.mxu1 %v5433_v59  ;;  %v3663_v45 = vpop.f32.mrf.mxu1  ;;  %v6550_v59 = vld [vmem:[#allocation4 + $0x408] sm:$0xf0] }
 0x246   :  { %3882 = vmatpush.bf16.msra.mxu2 %v5593_v36  ;;  %v6802_v36 = vld [vmem:[#allocation9 + $0x58] sm:$0xff] }
 0x247   :  { %3856 = vmatpush.bf16.msrb.mxu0 %v6069_v7  ;;  %3895 = vmatpush.bf16.msrb.mxu3 %v5753_v9  ;;  %v5932_v7 = vld [vmem:[#allocation4 + $0x3f8] sm:$0xf] }
 0x248   :  { %3870 = vmatmul.bf16.vlgmr.msra.gmra.mxu1 %v7444_v49  ;;  %v5993_v49 = vor.u32 %v6565_v40, %v5992_v42 }
 0x249   :  { %3916 = vmatpush.bf16.msrb.mxu1 %v3600_v28  ;;  %3883 = vmatmul.bf16.vlgmr.msra.gmra.mxu2 %v7449_v63  ;;  %v6795_v63 = vld [vmem:[#allocation9 + $0x20] sm:$0xff]  ;;  %v6545_v28 = vld [vmem:[#allocation4 + $0x3e0] sm:$0xf0] }
 0x24a   :  { %4264 = vmatpush.bf16.msrb.mxu2 %v6798_v15  ;;  %6157 = vmatmul.msk.bf16.vlgmr.msrb.gmra.mxu0 %vm2226_vm1, %v7465_v26 }
 0x24b   :  { %3901 = vmatpush.bf16.msra.mxu0 %v6053_v11  ;;  %3896 = vmatmul.bf16.vlgmr.msrb.gmra.mxu3 %v7451_v12  ;;  %v6560_v12 = vld [vmem:[#allocation4 + $0x458] sm:$0xf0]  ;;  %v5933_v11 = vor.u32 %v6550_v59, %v5932_v7 }
 0x24c   :  { %4277 = vmatpush.bf16.msra.mxu3 %v6806_v34  ;;  %v5973_v56 = vor.u32 %v6560_v12, %v5972_v20  ;;  %v6799_v34 = vld [vmem:[#allocation9 + $0x40] sm:$0xff] }
 0x24d   :  { %3917 = vmatpush.bf16.msrb.mxu1 %v6153_v24  ;;  %v3665_v17 = vpop.f32.mrf.mxu1  ;;  %v5913_v24 = vor.u32 %v6545_v28, %v5912_v14  ;;  %v6817_v14 = vld [vmem:[#allocation9 + $0xd0] sm:$0xff] }
 0x24e   :  { %4265 = vmatpush.bf16.msrb.mxu2 %v6797_v25  ;;  %v6801_v25 = vld [vmem:[#allocation9 + $0x50] sm:$0xff] }
 0x24f   :  { %3902 = vmatpush.bf16.msra.mxu0 %v6033_v22  ;;  %v3650_v3 = vpop.f32.mrf.mxu0 }
 0x250   :  { %4278 = vmatpush.bf16.msra.mxu3 %v6805_v32  ;;  %v3651_v10 = vadd.f32 %v3650_v3, %v3638_v41  ;;  %v6821_v3 = vld [vmem:[#allocation9 + $0xf0] sm:$0xff] }
 0x251   :  { %3918 = vmatpush.bf16.msrb.mxu1 %v6133_v39 }
 0x252   :  { %4266 = vmatpush.bf16.msrb.mxu2 %v6796_v19  ;;  %v3664_v9 = vadd.f32 %v3663_v45, %v3651_v10  ;;  %v6811_v19 = vld [vmem:[#allocation9 + $0xa0] sm:$0xff]  ;;  %v3931_v10 = vperm.slane %v7529_v61, 2 }
 0x253   :  { %3903 = vmatpush.bf16.msra.mxu0 %v6013_v38  ;;  %v6812_v38 = vld [vmem:[#allocation9 + $0xa8] sm:$0xff] }
 0x254   :  { %4279 = vmatpush.bf16.msra.mxu3 %v6804_v47  ;;  %v3939_v0 = vadd.f32 %v3929_v6, %v3664_v9  ;;  %v3676_v15 = vpop.f32.mrf.mxu2  ;;  %v6810_v47 = vld [vmem:[#allocation9 + $0x98] sm:$0xff] }
 0x255   :  { %3919 = vmatpush.bf16.msrb.mxu1 %v6113_v50  ;;  %v3677_v42 = vadd.f32 %v3676_v15, %v7463_v27  ;;  %v3930_v50 = vperm.slane %v7529_v61, 1  ;;  %v6809_v27 = vld [vmem:[#allocation9 + $0x90] sm:$0xff] }
 0x256   :  { %4267 = vmatpush.bf16.msrb.mxu2 %v6795_v63  ;;  %v3944_v21 = vmax.f32 %v3939_v0, 0.0  ;;  %v6835_v15 = vld [vmem:[%s7647_s11 + $0x38] sm:$0xff] }
 0x257   :  { %3904 = vmatpush.bf16.msra.mxu0 %v5993_v49  ;;  %v3689_v18 = vpop.f32.mrf.mxu3  ;;  %v3652_v22 = vpop.f32.mrf.mxu0 }
 0x258   :  { %4280 = vmatpush.bf16.msra.mxu3 %v6803_v2  ;;  %v3949_v31 = vpack.c.bf16 %v3944_v21, %v3944_v21  ;;  %v3690_v40 = vadd.f32 %v3689_v18, %v3677_v42  ;;  %v6816_v18 = vld [vmem:[#allocation9 + $0xc8] sm:$0xff] }
 0x259   :  { %3920 = vmatpush.bf16.msrb.mxu1 %v6093_v46  ;;  %v6807_v46 = vld [vmem:[#allocation9 + $0x80] sm:$0xff] }
 0x25a   :  { %4268 = vmatpush.bf16.msrb.mxu2 %v6794_v33 }
 0x25b   :  { %3905 = vmatpush.bf16.msra.mxu0 %v5973_v56  ;;  %v6808_v56 = vld [vmem:[#allocation9 + $0x88] sm:$0xff] }
 0x25c   :  { %4281 = vmatpush.bf16.msra.mxu3 %v6802_v36  ;;  %v3678_v52 = vpop.f32.mrf.mxu2  ;;  %v6819_v36 = vld [vmem:[#allocation9 + $0xe0] sm:$0xff] }
 0x25d   :  { %3921 = vmatpush.bf16.msrb.mxu1 %v6073_v4  ;;  %v6820_v4 = vld [vmem:[#allocation9 + $0xe8] sm:$0xff] }
 0x25e   :  { %4269 = vmatpush.bf16.msrb.mxu2 %v6793_v5 }
 0x25f   :  { %3906 = vmatpush.bf16.msra.mxu0 %v5953_v16 }
 0x260   :  { %6158 = vmatmul.msk.bf16.vlgmr.msrb.gmra.mxu1 %vm2226_vm1, %v7465_v26  ;;  %4282 = vmatpush.bf16.msra.mxu3 %v6801_v25  ;;  %v3691_v26 = vpop.f32.mrf.mxu3 }
 0x261   :  { %4303 = vmatpush.bf16.msra.mxu1 %v6822_v48  ;;  %v6824_v48 = vld [vmem:[#allocation9 + $0x108] sm:$0xff] }
 0x262   :  { %4270 = vmatpush.bf16.msrb.mxu2 %v6792_v13 }
 0x263   :  { %3907 = vmatpush.bf16.msra.mxu0 %v5933_v11 }
 0x264   :  { %4283 = vmatpush.bf16.msra.mxu3 %v6800_v29 }
 0x265   :  { %v3715_v39 = vpop.f32.mrf.mxu1  ;;  %4304 = vmatpush.bf16.msra.mxu1 %v6821_v3 }
 0x266   :  { %4271 = vmatpush.bf16.msrb.mxu2 %v6791_v57  ;;  %v6815_v57 = vld [vmem:[#allocation9 + $0xc0] sm:$0xff] }
 0x267   :  { %3908 = vmatpush.bf16.msra.mxu0 %v5913_v24  ;;  %v6834_v24 = vld [vmem:[%s7647_s11 + $0x30] sm:$0xff] }
 0x268   :  { %4284 = vmatpush.bf16.msra.mxu3 %v6799_v34  ;;  %v6832_v34 = vld [vmem:[%s7647_s11 + $0x20] sm:$0xff] }
 0x269   :  { %4272 = vmatmul.bf16.vlgmr.msrb.gmra.mxu2 %v3949_v31  ;;  %4305 = vmatpush.bf16.msra.mxu1 %v6820_v4  ;;  %v4028_v31 = vld [vmem:[#allocation9 + $0x128] sm:$0xf] }
 0x26a   :  { %3909 = vmatmul.bf16.vlgmr.msra.gmra.mxu0 %v7473_v8  ;;  %v4182_v26 = vunpack.c.l.b16 %v4028_v31  ;;  %v6841_v31 = vld [vmem:[%s7649_s13 + $0x28] sm:$0xff] }
 0x26b   :  { %4290 = vmatpush.bf16.msrb.mxu0 %v6814_v30  ;;  %v6833_v30 = vld [vmem:[%s7647_s11 + $0x28] sm:$0xff] }
 0x26c   :  { %v3728_v43 = vpop.f32.mrf.mxu2  ;;  %4399 = vmatpush.bf16.msrb.mxu3 %v6835_v15 }
 0x26d   :  { %v3717_v32 = vpop.f32.mrf.mxu1  ;;  %4306 = vmatpush.bf16.msra.mxu1 %v6819_v36 }
 0x26e   :  { %v6830_v32 = vld [vmem:[%s7647_s11 + $0x10] sm:$0xff] }
 0x26f   :  { %4291 = vmatpush.bf16.msrb.mxu0 %v6813_v55  ;;  %v3702_v44 = vpop.f32.mrf.mxu0 }
 0x270   :  { %v3703_v45 = vadd.f32 %v3702_v44, %v3690_v40  ;;  %4400 = vmatpush.bf16.msrb.mxu3 %v6834_v24  ;;  %v6831_v40 = vld [vmem:[%s7647_s11 + $0x18] sm:$0xff]  ;;  %v6850_v24 = vld [vmem:[%s7650_s14 + $0x30] sm:$0xff] }
 0x272   :  { %v3716_v49 = vadd.f32 %v3715_v39, %v3703_v45  ;;  %v6826_v45 = vld [vmem:[#allocation9 + $0x118] sm:$0xff] }
 0x273   :  { %4292 = vmatpush.bf16.msrb.mxu0 %v6812_v38 }
 0x274   :  { %v3729_v8 = vadd.f32 %v3728_v43, %v3716_v49  ;;  %v3730_v20 = vpop.f32.mrf.mxu2  ;;  %4401 = vmatpush.bf16.msrb.mxu3 %v6833_v30  ;;  %v6827_v43 = vld [vmem:[#allocation9 + $0x120] sm:$0xff]  ;;  %v6848_v30 = vld [vmem:[%s7650_s14 + $0x20] sm:$0xff] }
 0x275   :  { %v6829_v49 = vld [vmem:[%s7647_s11 + $0x8] sm:$0xff] }
 0x276   :  { %v3940_v63 = vadd.f32 %v3930_v50, %v3729_v8  ;;  %v3932_v8 = vperm.slane %v7529_v61, 3 }
 0x277   :  { %4293 = vmatpush.bf16.msrb.mxu0 %v6811_v19  ;;  %v3741_v12 = vpop.f32.mrf.mxu3  ;;  %v3704_v54 = vpop.f32.mrf.mxu0  ;;  %v4220_v19 = vpack.c.b16 %v4182_v26, %v4182_v26  ;;  %v6839_v26 = vld [vmem:[%s7649_s13 + $0x18] sm:$0xff] }
 0x278   :  { %v3945_v53 = vmax.f32 %v3940_v63, 0.0  ;;  %v3742_v62 = vadd.f32 %v3741_v12, %v7482_v35  ;;  %v6818_v35 = vld [vmem:[#allocation9 + $0xd8] sm:$0xff]  ;;  %4402 = vmatpush.bf16.msrb.mxu3 %v6832_v34  ;;  %v6846_v34 = vld [vmem:[%s7650_s14 + $0x10] sm:$0xff] }
 0x279   :  { %4307 = vmatpush.bf16.msra.mxu1 %v6818_v35  ;;  %v4262_v42 = vsel %vm171_vm0, %v4220_v19, 0  ;;  %v6844_v19 = vld [vmem:[%s7650_s14] sm:$0xff]  ;;  %vm4612_vm0 = vcmask 523264  }
 0x27a   :  { %v3950_v23 = vpack.c.bf16 %v3945_v53, %v3945_v53  ;;  %4318 = vmatpush.bf16.msra.mxu2 %v4262_v42 }
 0x27b   :  { %4294 = vmatpush.bf16.msrb.mxu0 %v6810_v47 }
 0x27c   :  { %4285 = vmatmul.bf16.vlgmr.msra.gmra.mxu3 %v3950_v23 }
 0x27d   :  { %4308 = vmatpush.bf16.msra.mxu1 %v6817_v14  ;;  %4403 = vmatpush.bf16.msrb.mxu3 %v6831_v40  ;;  %v6872_v40 = vld [vmem:[%s7648_s12] ss:$0 sm:$0xff] }
 0x27e   :  { %4319 = vmatpush.bf16.msra.mxu2 %v6827_v43 }
 0x27f   :  { %v3743_v58 = vpop.f32.mrf.mxu3  ;;  %4295 = vmatpush.bf16.msrb.mxu0 %v6809_v27  ;;  %v6825_v27 = vld [vmem:[#allocation9 + $0x110] sm:$0xff] }
 0x280   :  { %v6828_v58 = vld [vmem:[%s7647_s11] sm:$0xff] }
 0x281   :  { %4309 = vmatpush.bf16.msra.mxu1 %v6816_v18  ;;  %4404 = vmatpush.bf16.msrb.mxu3 %v6830_v32 }
 0x282   :  { %4320 = vmatpush.bf16.msra.mxu2 %v6826_v45  ;;  %v6837_v45 = vld [vmem:[%s7649_s13 + $0x8] sm:$0xff] }
 0x283   :  { %4296 = vmatpush.bf16.msrb.mxu0 %v6808_v56 }
 0x285   :  { %v3767_v33 = vpop.f32.mrf.mxu1  ;;  %4310 = vmatpush.bf16.msra.mxu1 %v6815_v57  ;;  %4405 = vmatpush.bf16.msrb.mxu3 %v6829_v49  ;;  %v6849_v57 = vld [vmem:[%s7650_s14 + $0x28] sm:$0xff]  ;;  %v6836_v49 = vld [vmem:[%s7649_s13] sm:$0xff] }
 0x286   :  { %4321 = vmatpush.bf16.msra.mxu2 %v6825_v27  ;;  %v6854_v27 = vld [vmem:[#allocation10 + $0x10] sm:$0xff] }
 0x287   :  { %4297 = vmatpush.bf16.msrb.mxu0 %v6807_v46 }
 0x289   :  { %4406 = vmatpush.bf16.msrb.mxu3 %v6828_v58 }
 0x28a   :  { %4322 = vmatpush.bf16.msra.mxu2 %v6824_v48  ;;  %v6873_v48 = vld [vmem:[%s7651_s15] ss:$0 sm:$0xff] }
 0x28c   :  { %v3780_v60 = vpop.f32.mrf.mxu2 }
 0x28d   :  { %v3793_v1 = vpop.f32.mrf.mxu3  ;;  %v3769_v41 = vpop.f32.mrf.mxu1 }
 0x28f   :  { %v3754_v2 = vpop.f32.mrf.mxu0 }
 0x290   :  { %v3755_v17 = vadd.f32 %v3754_v2, %v3742_v62  ;;  %v6823_v62 = vld [vmem:[#allocation9 + $0x100] sm:$0xff] }
 0x291   :  { %4323 = vmatpush.bf16.msra.mxu2 %v6823_v62 }
 0x292   :  { %v3768_v16 = vadd.f32 %v3767_v33, %v3755_v17 }
 0x294   :  { %v3781_v5 = vadd.f32 %v3780_v60, %v3768_v16  ;;  %v3782_v6 = vpop.f32.mrf.mxu2  ;;  %v4330_v60 = vld [vmem:[%s7640_s4] sm:$0x1] }
 0x295   :  { %v3795_v59 = vpop.f32.mrf.mxu3  ;;  %4407 = vmatmul.bf16.vlgmr.msrb.gmra.mxu3 %v4330_v60  ;;  %v3933_v6 = vperm.slane %v7529_v61, 4 }
 0x296   :  { %v3794_v7 = vadd.f32 %v3793_v1, %v3781_v5 }
 0x297   :  { %v3756_v9 = vpop.f32.mrf.mxu0 }
 0x298   :  { %v3941_v11 = vadd.f32 %v3931_v10, %v3794_v7 }
 0x29a   :  { %v3946_v0 = vmax.f32 %v3941_v11, 0.0 }
 0x29c   :  { %v3951_v13 = vpack.c.bf16 %v3946_v0, %v3946_v0 }
 0x29e   :  { %4298 = vmatmul.bf16.vlgmr.msrb.gmra.mxu0 %v3951_v13 }
 0x2a5   :  { %v3819_v28 = vpop.f32.mrf.mxu1 }
 0x2ac   :  { %v3832_v21 = vpop.f32.mrf.mxu2 }
 0x2ad   :  { %v3845_v22 = vpop.f32.mrf.mxu3  ;;  %v3821_v25 = vpop.f32.mrf.mxu1 }
 0x2ae   :  { %v6843_v25 = vld [vmem:[%s7649_s13 + $0x38] sm:$0xff] }
 0x2af   :  { %v3806_v29 = vpop.f32.mrf.mxu0  ;;  %4556 = vmatpush.bf16.msrb.mxu1 %v6843_v25 }
 0x2b0   :  { %v3807_v38 = vadd.f32 %v3806_v29, %v7493_v51  ;;  %v6842_v29 = vld [vmem:[%s7649_s13 + $0x30] sm:$0xff] }
 0x2b2   :  { %v3820_v44 = vadd.f32 %v3819_v28, %v3807_v38  ;;  %v6845_v38 = vld [vmem:[%s7650_s14 + $0x8] sm:$0xff] }
 0x2b3   :  { %4557 = vmatpush.bf16.msrb.mxu1 %v6842_v29 }
 0x2b4   :  { %v3834_v55 = vpop.f32.mrf.mxu2  ;;  %v3833_v51 = vadd.f32 %v3832_v21, %v3820_v44 }
 0x2b5   :  { %v3847_v52 = vpop.f32.mrf.mxu3  ;;  %v6847_v55 = vld [vmem:[%s7650_s14 + $0x18] sm:$0xff] }
 0x2b6   :  { %v3846_v50 = vadd.f32 %v3845_v22, %v3833_v51  ;;  %v6851_v22 = vld [vmem:[%s7650_s14 + $0x38] sm:$0xff]  ;;  %v6840_v52 = vld [vmem:[%s7649_s13 + $0x20] sm:$0xff] }
 0x2b7   :  { %v3808_v39 = vpop.f32.mrf.mxu0  ;;  %4495 = vmatpush.bf16.msra.mxu0 %v6851_v22  ;;  %4558 = vmatpush.bf16.msrb.mxu1 %v6841_v31 }
 0x2b8   :  { %v6838_v39 = vld [vmem:[%s7649_s13 + $0x10] sm:$0xff] }
 0x2bb   :  { %4496 = vmatpush.bf16.msra.mxu0 %v6850_v24  ;;  %4559 = vmatpush.bf16.msrb.mxu1 %v6840_v52 }
 0x2bf   :  { %4497 = vmatpush.bf16.msra.mxu0 %v6849_v57  ;;  %4560 = vmatpush.bf16.msrb.mxu1 %v6839_v26 }
 0x2c3   :  { %4498 = vmatpush.bf16.msra.mxu0 %v6848_v30  ;;  %4561 = vmatpush.bf16.msrb.mxu1 %v6838_v39 }
 0x2c5   :  { %v3871_v12 = vpop.f32.mrf.mxu1 }
 0x2c6   :  { %v3872_v17 = vadd.f32 %v3871_v12, %v7511_v37  ;;  %v6871_v37 = vld [vmem:[%s7646_s10] ss:$0 sm:$0xff] }
 0x2c7   :  { %v3858_v63 = vpop.f32.mrf.mxu0  ;;  %4499 = vmatpush.bf16.msra.mxu0 %v6847_v55  ;;  %4562 = vmatpush.bf16.msrb.mxu1 %v6837_v45 }
 0x2c8   :  { %v3859_v20 = vadd.f32 %v3858_v63, %v3846_v50 }
 0x2ca   :  { %v3942_v54 = vadd.f32 %v3932_v8, %v3859_v20 }
 0x2cb   :  { %4500 = vmatpush.bf16.msra.mxu0 %v6846_v34  ;;  %4563 = vmatpush.bf16.msrb.mxu1 %v6836_v49 }
 0x2cc   :  { %v3947_v53 = vmax.f32 %v3942_v54, 0.0  ;;  %v3884_v47 = vpop.f32.mrf.mxu2 }
 0x2cd   :  { %v3873_v33 = vpop.f32.mrf.mxu1  ;;  %v3885_v3 = vadd.f32 %v3884_v47, %v3872_v17  ;;  %v6855_v47 = vld [vmem:[#allocation10 + $0x18] sm:$0xff] }
 0x2ce   :  { %v3952_v23 = vpack.c.bf16 %v3947_v53, %v3947_v53  ;;  %v3897_v56 = vpop.f32.mrf.mxu3  ;;  %4620 = vmatpush.bf16.msrb.mxu2 %v6855_v47 }
 0x2cf   :  { %v3860_v46 = vpop.f32.mrf.mxu0  ;;  %v3898_v16 = vadd.f32 %v3897_v56, %v3885_v3  ;;  %4501 = vmatpush.bf16.msra.mxu0 %v6845_v38  ;;  %v6853_v56 = vld [vmem:[#allocation10 + $0x8] sm:$0xff] }
 0x2d0   :  { %4311 = vmatmul.bf16.vlgmr.msra.gmra.mxu1 %v3952_v23  ;;  %v6852_v46 = vld [vmem:[#allocation10] sm:$0xff]  ;;  %v6874_v3 = vld [vmem:[%s7653_s17] ss:$0 sm:$0xff] }
 0x2d2   :  { %4621 = vmatpush.bf16.msrb.mxu2 %v6854_v27 }
 0x2d3   :  { %4502 = vmatpush.bf16.msra.mxu0 %v6844_v19 }
 0x2d4   :  { %v3886_v1 = vpop.f32.mrf.mxu2 }
 0x2d6   :  { %v3899_v2 = vpop.f32.mrf.mxu3  ;;  %4622 = vmatpush.bf16.msrb.mxu2 %v6853_v56 }
 0x2da   :  { %4623 = vmatpush.bf16.msrb.mxu2 %v6852_v46 }
 0x2dd   :  { %v3923_v41 = vpop.f32.mrf.mxu1 }
 0x2e5   :  { %v3925_v5 = vpop.f32.mrf.mxu1 }
 0x2e7   :  { %v3910_v4 = vpop.f32.mrf.mxu0 }
 0x2e8   :  { %v3911_v10 = vadd.f32 %v3910_v4, %v3898_v16 }
 0x2ea   :  { %v3924_v7 = vadd.f32 %v3923_v41, %v3911_v10 }
 0x2ec   :  { %v3943_v59 = vadd.f32 %v3933_v6, %v3924_v7  ;;  %v4273_v9 = vpop.f32.mrf.mxu2 }
 0x2ed   :  { %v4274_v13 = vadd.f32 %v6871_v37, %v4273_v9 }
 0x2ee   :  { %v3948_v36 = vmax.f32 %v3943_v59, 0.0 }
 0x2ef   :  { %v3912_v11 = vpop.f32.mrf.mxu0 }
 0x2f0   :  { %v3953_v0 = vpack.c.bf16 %v3948_v36, %v3948_v36 }
 0x2f2   :  { %6307 = vmatmul.msk.bf16.vlgmr.msra.gmra.mxu2 %vm2226_vm1, %v3953_v0 }
 0x2f4   :  { %v4275_v35 = vpop.f32.mrf.mxu2 }
 0x2ff   :  { %v4286_v14 = vpop.f32.mrf.mxu3 }
 0x300   :  { %v4287_v28 = vadd.f32 %v4286_v14, %v4274_v13 }
 0x307   :  { %v4288_v15 = vpop.f32.mrf.mxu3 }
 0x318   :  { %v4408_v44 = vpop.f32.mrf.mxu3 }
 0x319   :  { %v4409_v32 = vadd.f32 %v6872_v40, %v4408_v44 }
 0x31b   :  { %v4299_v18 = vpop.f32.mrf.mxu0  ;;  %v4412_v51 = vmax.f32 %v4409_v32, 0.0 }
 0x31c   :  { %v4300_v21 = vadd.f32 %v4299_v18, %v4287_v28 }
 0x31d   :  { %v4430_v50 = vpack.c.bf16 %v4412_v51, %v4412_v51 }
 0x31f   :  { %4503 = vmatmul.bf16.vlgmr.msra.gmra.mxu0 %v4430_v50 }
 0x320   :  { %v4410_v8 = vpop.f32.mrf.mxu3 }
 0x323   :  { %v4301_v61 = vpop.f32.mrf.mxu0 }
 0x34d   :  { %v4312_v42 = vpop.f32.mrf.mxu1 }
 0x34e   :  { %v4313_v63 = vadd.f32 %v4312_v42, %v4300_v21 }
 0x355   :  { %v4314_v43 = vpop.f32.mrf.mxu1 }
 0x375   :  { %v4325_v20 = vpop.f32.mrf.mxu2 }
 0x376   :  { %v4326_v12 = vadd.f32 %v4325_v20, %v4313_v63 }
 0x378   :  { %v4329_v54 = vmax.f32 %v4326_v12, 0.0 }
 0x37a   :  { %v4413_v53 = vpack.c.bf16 %v4329_v54, %v4329_v54 }
 0x37c   :  { %4564 = vmatmul.bf16.vlgmr.msrb.gmra.mxu1 %v4413_v53 }
 0x37d   :  { %v4327_v23 = vpop.f32.mrf.mxu2 }
 0x39c   :  { %v4504_v58 = vpop.f32.mrf.mxu0 }
 0x3a4   :  { %v4506_v33 = vpop.f32.mrf.mxu0 }
 0x3f9   :  { %v4565_v60 = vpop.f32.mrf.mxu1 }
 0x3fa   :  { %v4566_v62 = vadd.f32 %v4565_v60, %v4504_v58 }
 0x3fc   :  { %v4573_v1 = vadd.f32 %v6873_v48, %v4566_v62 }
 0x3fe   :  { %v4574_v2 = vmax.f32 %v4573_v1, 0.0 }
 0x400   :  { %v4575_v41 = vpack.c.bf16 %v4574_v2, %v4574_v2 }
 0x401   :  { %v4567_v17 = vpop.f32.mrf.mxu1 }
 0x402   :  { %6420 = vmatmul.msk.bf16.vlgmr.msrb.gmra.mxu2 %vm4612_vm0, %v4575_v41 }
 0x485   :  { %v4625_v16 = vpop.f32.mrf.mxu2 }
 0x486   :  { %v4626_v4 = vadd.f32 %v6874_v3, %v4625_v16 }
 0x488   :  { %4629 = vst [vmem:[#allocation12] sm:$0x3] %v4626_v4 }
 0x489   :  { %4640 = dma.vmem_to_hbm [thread:$0]  %s4636_s21, 32, %s4638_s23, [#allocation6]  }
 0x48d   :  { %v4627_v5 = vpop.f32.mrf.mxu2 }
 0x48e   :  { %7009 = dma.done.wait [#allocation6], 32  }
 0x48f   :  { %7010 = vsyncadd [#allocation6], 4294967264 }
 0x490   :  { %4645 = vsyncpa [#allocation5], 1 }
 0x491   :  { %4646 = vsyncpa [#allocation8], 1 }
 0x492   :  { %4647 = vsyncpa [#allocation11], 1 }
 0x493   :  { %4648 = vsyncpa [#allocation6], 1 }

</bundles_post_ra>
